<compile_context>
chip_gen: v5e
topology: v5e:2x2
jax: 0.10.0
libtpu: 0.0.40
codegen_flags: <defaults>
</compile_context>

<pallas_src>
import functools

import numpy as np
import jax
import jax.numpy as jnp
from jax import lax
from jax.experimental import pallas as pl
from jax.experimental.pallas import tpu as pltpu

# Keep all f32 matmuls (host composition, reference and the in-kernel MXU dots) at
# full f32 precision so the kernel/reference cross-check is tight.
jax.config.update("jax_default_matmul_precision", "highest")

# ----------------------------- configuration ------------------------------
FFT_LIST = (4, 8)          # fft_list == fft_n_list (pooling=False)
C_IN = 4
C_OUT = 8
BATCH_SIZE = 2
SER_SIZE = 32              # time length T (divisible by every fft_n)
FFT_L_SIZE = len(FFT_LIST)
C_OUT_PER = C_OUT // FFT_L_SIZE
BN_EPS = 1e-5

N4, N8 = FFT_LIST
RATIO = N8 // N4
NT4 = SER_SIZE // N4       # 8 retained frames at scale 4
NT8 = SER_SIZE // N8       # 4 retained frames at scale 8
F4 = N4 // 2 + 1           # 3 one-sided bins at scale 4
F8 = N8 // 2 + 1           # 5 one-sided bins at scale 8
K4 = NT4 * F4 * C_IN       # 96  flattened (nt, f, c) spectrum, scale 4
K8 = NT8 * F8 * C_IN       # 80  flattened (nt, f, c) spectrum, scale 8
KM = NT8 * F4 * C_IN       # 48  flattened merged (nt2, f, c) spectrum
OT = C_OUT_PER * SER_SIZE  # 128 flattened (o, t) output per scale

assert all(SER_SIZE % n == 0 for n in FFT_LIST)
assert C_OUT % FFT_L_SIZE == 0
assert FFT_L_SIZE == 2 and N8 % N4 == 0
# TODO(synk): FREQ_CONV_FLAG=True (Hermitian-padded complex Conv2d) and
# ACT_DOMAIN='freq' (crelu) paths are not implemented; both are disabled in this config.
# TODO(synk): the fused kernel is specialized to a two-scale fft_list with one merge pair.


# ------------------------- host-side constant matrices -------------------------
@functools.lru_cache(maxsize=None)
def _dft_mats_np(n):
    """torch.stft convention (rectangular window): X = frame @ (cos - i*sin)."""
    fb = n // 2 + 1
    m = np.arange(n, dtype=np.float64)[:, None]
    k = np.arange(fb, dtype=np.float64)[None, :]
    ang = 2.0 * np.pi * m * k / n
    return np.cos(ang).astype(np.float32), (-np.sin(ang)).astype(np.float32)


@functools.lru_cache(maxsize=None)
def _idft_mats_np(n):
    """torch.istft frame synthesis: real iDFT of a one-sided spectrum (1/n norm)."""
    fb = n // 2 + 1
    m = np.arange(n, dtype=np.float64)[:, None]
    k = np.arange(fb, dtype=np.float64)[None, :]
    ang = 2.0 * np.pi * m * k / n
    w = np.full((1, fb), 2.0)
    w[0, 0] = 1.0
    w[0, -1] = 1.0
    return (w / n * np.cos(ang)).astype(np.float32), (-(w / n) * np.sin(ang)).astype(np.float32)


@functools.lru_cache(maxsize=None)
def _stft_op_matrices(T, C, n):
    """Fold torch.stft (center=True reflect pad, rectangular window, hop=n_fft,
    one-sided, last frame dropped) into (C*T, NT*F*C) real/imag matrices acting on the
    flattened (c, t) signal and emitting the spectrum in (nt, f, c) ordering."""
    pad = n // 2
    NT = (T + 2 * pad) // n - 1
    F = n // 2 + 1
    cr, ci = _dft_mats_np(n)
    Sr = np.zeros((C * T, NT * F * C), np.float32)
    Si = np.zeros((C * T, NT * F * C), np.float32)
    for nt in range(NT):
        for m in range(n):
            q = nt * n + m - pad              # position in the un-padded signal
            if q < 0:
                q = -q                        # left reflect (no edge repeat)
            elif q >= T:
                q = 2 * (T - 1) - q           # right reflect
            for f in range(F):
                for c in range(C):
                    col = (nt * F + f) * C + c
                    Sr[c * T + q, col] += cr[m, f]
                    Si[c * T + q, col] += ci[m, f]
    return jnp.asarray(Sr), jnp.asarray(Si)


@functools.lru_cache(maxsize=None)
def _merge_select_matrices():
    """(K4, KM) 0/1 matrices that pick the even / odd scale-4 frames in (nt2, f, c) order."""
    sel_e = np.zeros((K4, KM), np.float32)
    sel_o = np.zeros((K4, KM), np.float32)
    for nt2 in range(NT8):
        for f in range(F4):
            for c in range(C_IN):
                dst = (nt2 * F4 + f) * C_IN + c
                sel_e[((2 * nt2) * F4 + f) * C_IN + c, dst] = 1.0
                sel_o[((2 * nt2 + 1) * F4 + f) * C_IN + c, dst] = 1.0
    return jnp.asarray(sel_e), jnp.asarray(sel_o)


@functools.lru_cache(maxsize=None)
def _merge_place_and_mask():
    """(KM, K8) placement of merged bins at even scale-8 freqs (zero_interp + mask) and
    the (1, K8) odd-frequency mask selecting the scale-8 STFT contribution."""
    place = np.zeros((KM, K8), np.float32)
    mask = np.zeros((1, K8), np.float32)
    for nt in range(NT8):
        for f in range(F8):
            for c in range(C_IN):
                col = (nt * F8 + f) * C_IN + c
                if f % 2 == 0:
                    place[(nt * F4 + f // 2) * C_IN + c, col] = 1.0
                else:
                    mask[0, col] = 1.0
    return jnp.asarray(place), jnp.asarray(mask)


@functools.lru_cache(maxsize=None)
def _frame_map(n, NT, T):
    """istft reassembly map (hop == n_fft, center=True trim, appended copy of frame 0):
    for output sample t, which (spectrum frame, in-frame sample) it comes from."""
    t = np.arange(T)
    src = t + n // 2
    frame = (src // n) % NT              # frame NT is the appended copy of frame 0
    m_idx = src % n
    onehot = np.zeros((NT, T), np.float32)
    onehot[frame, t] = 1.0
    return m_idx, jnp.asarray(onehot)


def _compose_istft_filter_matrices(kr, ki, n, NT, T):
    """Per-forward host composition (tiny einsums) of the complex frequency filter,
    the istft real-iDFT frame synthesis and the overlap-add/centering into two
    (NT*F*C, O*T) matrices; columns ordered (o, t)."""
    F, C, O = kr.shape
    ar = jnp.asarray(_idft_mats_np(n)[0])          # (n, F)
    ai = jnp.asarray(_idft_mats_np(n)[1])
    # frame[m, o] = sum_{f,c} nr[f,c]*wr[f,c,m,o] + ni[f,c]*wi[f,c,m,o]
    wr = jnp.einsum("mf,fco->fcmo", ar, kr) + jnp.einsum("mf,fco->fcmo", ai, ki)
    wi = jnp.einsum("mf,fco->fcmo", ai, kr) - jnp.einsum("mf,fco->fcmo", ar, ki)
    m_idx, onehot = _frame_map(n, NT, T)
    zr = jnp.einsum("fcto,kt->kfcot", wr[:, :, m_idx, :], onehot).reshape(NT * F * C, O * T)
    zi = jnp.einsum("fcto,kt->kfcot", wi[:, :, m_idx, :], onehot).reshape(NT * F * C, O * T)
    return zr, zi


# ------------------------------- Pallas kernel ---------------------------------
def _stf_fused_kernel(x_ref,
                      s4r_ref, s4i_ref, s8r_ref, s8i_ref,
                      sele_ref, selo_ref, place_ref, mask8_ref,
                      z4r_ref, z4i_ref, z8r_ref, z8i_ref,
                      bias4_ref, bias8_ref,
                      g4_ref, be4_ref, g8_ref, be8_ref,
                      mp_ref,
                      out_ref):
    """Entire STFlayer forward for fft_list=(4, 8): a chain of small MXU GEMMs against
    host-precomposed matrices plus VPU elementwise math, fully VMEM-resident."""

    def mm(a, b):
        return jnp.dot(a, b, preferred_element_type=jnp.float32)

    x = x_ref[...]                                     # (B, C*T)

    # --- STFT of both scales (reflect pad + framing + one-sided DFT folded in S) ---
    p4r = mm(x, s4r_ref[...])                          # (B, K4), (nt, f, c) order
    p4i = mm(x, s4i_ref[...])
    p8r = mm(x, s8r_ref[...])                          # (B, K8)
    p8i = mm(x, s8i_ref[...])

    # --- cross-scale attention merge: pairs of scale-4 frames -> scale-8 frame grid ---
    sel_e = sele_ref[...]
    sel_o = selo_ref[...]
    per = mm(p4r, sel_e)                               # even scale-4 frames, (B, KM)
    pei = mm(p4i, sel_e)
    por = mm(p4r, sel_o)                               # odd scale-4 frames
    poi = mm(p4i, sel_o)

    k00r = mp_ref[0]; k00i = mp_ref[1]; k01r = mp_ref[2]; k01i = mp_ref[3]
    k10r = mp_ref[4]; k10i = mp_ref[5]; k11r = mp_ref[6]; k11i = mp_ref[7]
    b0r = mp_ref[8]; b0i = mp_ref[9]; b1r = mp_ref[10]; b1i = mp_ref[11]

    # atten_merge: z[s] = sum_r patch[r]*kernel[r,s] + bias[s]; att = softmax(|z|)
    z0r = per * k00r - pei * k00i + por * k10r - poi * k10i + b0r
    z0i = per * k00i + pei * k00r + por * k10i + poi * k10r + b0i
    z1r = per * k01r - pei * k01i + por * k11r - poi * k11i + b1r
    z1i = per * k01i + pei * k01r + por * k11i + poi * k11r + b1i
    mag0 = jnp.sqrt(z0r * z0r + z0i * z0i)
    mag1 = jnp.sqrt(z1r * z1r + z1i * z1i)
    mx = jnp.maximum(mag0, mag1)
    e0 = jnp.exp(mag0 - mx)
    e1 = jnp.exp(mag1 - mx)
    inv = pl.reciprocal(e0 + e1, approx=False)
    a0 = e0 * inv
    a1 = e1 * inv
    mr = (per * a0 + por * a1) * float(RATIO)          # merged * time_ratio
    mi = (pei * a0 + poi * a1) * float(RATIO)

    # zero_interp + masking: merged values fill the even scale-8 frequency bins,
    # the odd bins keep the scale-8 STFT.
    mask8 = mask8_ref[...]                             # (1, K8): 1 on odd bins
    place = place_ref[...]
    a8r = mm(mr, place) + p8r * mask8                  # accumulated scale-8 spectrum
    a8i = mm(mi, place) + p8i * mask8

    # --- nn.BatchNorm2d(BATCH_SIZE) on the (C, B, NT, F) layout => stats per batch b.
    # TODO(synk): BatchNorm2d does not support complex tensors; approximated with a
    # complex batch-norm (complex mean, E[|z-mu|^2] variance, real affine).
    def cbn(r, i, g, b):
        mu_r = jnp.mean(r, axis=1, keepdims=True)
        mu_i = jnp.mean(i, axis=1, keepdims=True)
        var = (jnp.mean((r - mu_r) * (r - mu_r), axis=1, keepdims=True)
               + jnp.mean((i - mu_i) * (i - mu_i), axis=1, keepdims=True))
        s = lax.rsqrt(var + BN_EPS) * g
        return (r - mu_r) * s + b, (i - mu_i) * s

    n4r, n4i = cbn(p4r, p4i, g4_ref[...], be4_ref[...])
    n8r, n8i = cbn(a8r, a8i, g8_ref[...], be8_ref[...])

    # --- complex frequency filter + istft (iDFT, overlap-add, center trim, appended
    # frame-0 copy) folded into Z, with the bias-add + ReLU epilogue fused in. ---
    y4 = mm(n4r, z4r_ref[...]) + mm(n4i, z4i_ref[...]) + bias4_ref[...]
    y8 = mm(n8r, z8r_ref[...]) + mm(n8i, z8i_ref[...]) + bias8_ref[...]
    out_ref[:, 0:OT] = jnp.maximum(y4, 0.0)            # scale-4 channels, (o, t) order
    out_ref[:, OT:2 * OT] = jnp.maximum(y8, 0.0)       # scale-8 channels


# ------------------------------- forward wrapper --------------------------------
def stf_layer_forward(x, params):
    B, C, T = x.shape
    assert C == C_IN and T == SER_SIZE, (C, T)
    x_flat = x.reshape(B, C * T)

    s4r, s4i = _stft_op_matrices(T, C, N4)
    s8r, s8i = _stft_op_matrices(T, C, N8)
    sel_e, sel_o = _merge_select_matrices()
    place, mask8 = _merge_place_and_mask()

    k4r, k4i = params["filter"][N4]
    k8r, k8i = params["filter"][N8]
    z4r, z4i = _compose_istft_filter_matrices(k4r, k4i, N4, NT4, T)
    z8r, z8i = _compose_istft_filter_matrices(k8r, k8i, N8, NT8, T)

    bias = params["patch_bias_r"]
    bias4 = jnp.repeat(bias[:C_OUT_PER], T).reshape(1, OT)
    bias8 = jnp.repeat(bias[C_OUT_PER:], T).reshape(1, OT)

    g4 = params["bn_gamma"][0].reshape(B, 1)
    be4 = params["bn_beta"][0].reshape(B, 1)
    g8 = params["bn_gamma"][1].reshape(B, 1)
    be8 = params["bn_beta"][1].reshape(B, 1)

    mkr, mki, mbr, mbi = params["merge"][(0, 1)]
    mp = jnp.concatenate([
        jnp.stack([mkr.reshape(-1), mki.reshape(-1)], axis=1).reshape(-1),
        jnp.stack([mbr, mbi], axis=1).reshape(-1),
    ]).astype(jnp.float32)                              # 12 scalars -> SMEM

    vmem = pl.BlockSpec(memory_space=pltpu.MemorySpace.VMEM)
    smem = pl.BlockSpec(memory_space=pltpu.MemorySpace.SMEM)
    out = pl.pallas_call(
        _stf_fused_kernel,
        out_shape=jax.ShapeDtypeStruct((B, FFT_L_SIZE * OT), jnp.float32),
        in_specs=[vmem] * 19 + [smem],
        out_specs=vmem,
    )(x_flat, s4r, s4i, s8r, s8i, sel_e, sel_o, place, mask8,
      z4r, z4i, z8r, z8i, bias4, bias8, g4, be4, g8, be8, mp)
    # (B, 2*O*T) slab -> (B, c_out, T): scale-4 channels 0..3, scale-8 channels 4..7.
    return out.reshape(B, C_OUT, T)


# -------------------------- pure-JAX reference (no Pallas) ----------------------
def _ref_zero_interp(p, ratio, out_f):
    z = jnp.zeros(p.shape[:3] + (ratio - 1,) + p.shape[3:], p.dtype)
    p5 = jnp.concatenate([p[:, :, :, None, :], z], axis=3)
    p5 = p5.reshape(p.shape[0], p.shape[1], -1, p.shape[3])
    return p5[:, :, :out_f, :]


def stf_layer_reference(x, params):
    """Straightforward port of STFlayer.forward used as a numerical cross-check."""
    B, C, T = x.shape
    sig = x.reshape(B * C, T)
    n_scales = len(FFT_LIST)
    acc_r = [None] * n_scales
    acc_i = [None] * n_scales
    mask_lists = [[] for _ in range(n_scales)]

    stft_r, stft_i = [], []
    for fft_n in FFT_LIST:
        pad = fft_n // 2
        padded = jnp.pad(sig, ((0, 0), (pad, pad)), mode="reflect")
        frames = padded.reshape(B * C, -1, fft_n)
        cr, ci = _dft_mats_np(fft_n)
        xr = jnp.einsum("bkn,nf->bkf", frames, jnp.asarray(cr))
        xi = jnp.einsum("bkn,nf->bkf", frames, jnp.asarray(ci))
        fb = fft_n // 2 + 1
        xr = xr.reshape(B, C, -1, fb)[:, :, :-1, :].transpose(0, 2, 3, 1)
        xi = xi.reshape(B, C, -1, fb)[:, :, :-1, :].transpose(0, 2, 3, 1)
        stft_r.append(xr)
        stft_i.append(xi)

    for i, fft_n in enumerate(FFT_LIST):
        pr, pi = stft_r[i], stft_i[i]
        for j, tar in enumerate(FFT_LIST):
            if tar < fft_n:
                continue
            if tar == fft_n:
                mask = jnp.ones_like(pr)
                for m in mask_lists[j]:
                    mask = mask - m
                add_r, add_i = mask * pr, mask * pi
            else:
                ratio = tar // fft_n

                def _mod(p, ratio=ratio):
                    p5 = p.reshape(B, -1, ratio, p.shape[2], p.shape[3])
                    return jnp.transpose(p5, (0, 1, 3, 4, 2))

                kr, ki, br, bi = params["merge"][(i, j)]
                pr5, pi5 = _mod(pr), _mod(pi)
                zr = (jnp.einsum("...r,rs->...s", pr5, kr)
                      - jnp.einsum("...r,rs->...s", pi5, ki) + br)
                zi = (jnp.einsum("...r,rs->...s", pr5, ki)
                      + jnp.einsum("...r,rs->...s", pi5, kr) + bi)
                att = jax.nn.softmax(jnp.sqrt(zr * zr + zi * zi), axis=-1)
                mr = jnp.sum(pr5 * att, axis=-1) * float(ratio)
                mi = jnp.sum(pi5 * att, axis=-1) * float(ratio)
                out_f = tar // 2 + 1
                mask = _ref_zero_interp(jnp.ones_like(mr), ratio, out_f)
                for m in mask_lists[j]:
                    mask = mask - m
                mask_lists[j].append(mask)
                add_r = mask * _ref_zero_interp(mr, ratio, out_f)
                add_i = mask * _ref_zero_interp(mi, ratio, out_f)
            acc_r[j] = add_r if acc_r[j] is None else acc_r[j] + add_r
            acc_i[j] = add_i if acc_i[j] is None else acc_i[j] + add_i

    outs = []
    for i, fft_n in enumerate(FFT_LIST):
        pr, pi = acc_r[i], acc_i[i]
        g = params["bn_gamma"][i].reshape(-1, 1, 1, 1)
        be = params["bn_beta"][i].reshape(-1, 1, 1, 1)
        mu_r = jnp.mean(pr, axis=(1, 2, 3), keepdims=True)
        mu_i = jnp.mean(pi, axis=(1, 2, 3), keepdims=True)
        var = jnp.mean((pr - mu_r) ** 2 + (pi - mu_i) ** 2, axis=(1, 2, 3), keepdims=True)
        inv = lax.rsqrt(var + BN_EPS)
        nr = (pr - mu_r) * inv * g + be
        ni = (pi - mu_i) * inv * g
        kr, ki = params["filter"][fft_n]
        qr = jnp.einsum("btfc,fco->btfo", nr, kr) - jnp.einsum("btfc,fco->btfo", ni, ki)
        qi = jnp.einsum("btfc,fco->btfo", nr, ki) + jnp.einsum("btfc,fco->btfo", ni, kr)
        qr = jnp.concatenate([qr, qr[:, :1]], axis=1)
        qi = jnp.concatenate([qi, qi[:, :1]], axis=1)
        ar, ai = _idft_mats_np(fft_n)
        frames = (jnp.einsum("mf,btfo->btmo", jnp.asarray(ar), qr)
                  + jnp.einsum("mf,btfo->btmo", jnp.asarray(ai), qi))
        ola = jnp.transpose(frames, (0, 3, 1, 2)).reshape(B, C_OUT_PER, -1)
        ola = ola[:, :, fft_n // 2: fft_n // 2 + T]
        outs.append(jnp.transpose(ola, (0, 2, 1)))

    y = jnp.concatenate(outs, axis=2)
    y = jnp.maximum(y + params["patch_bias_r"].reshape(1, 1, C_OUT), 0.0)
    return jnp.transpose(y, (0, 2, 1))


# --------------------------------- parameters -----------------------------------
def init_params(key):
    """Parameter shapes follow STFlayer.__init__ for fft_list=(4,8), c_in=4, c_out=8.
    The module initializes the merge kernels/biases and the filter bias to zero; small
    random values are used here so the kernel/reference cross-check exercises every
    code path (the forward math is init-independent)."""
    keys = jax.random.split(key, 13)
    params = {}
    filt = {}
    for idx, fft_n in enumerate(FFT_LIST):
        fb = fft_n // 2 + 1
        # TODO(synk): complex_glorot_uniform derives the filter via Xavier init + FFT +
        # bilinear resize; here the complex (fb, c_in, c_out_per) filter is drawn directly.
        filt[fft_n] = (
            0.1 * jax.random.normal(keys[2 * idx + 0], (fb, C_IN, C_OUT_PER), jnp.float32),
            0.1 * jax.random.normal(keys[2 * idx + 1], (fb, C_IN, C_OUT_PER), jnp.float32),
        )
    params["filter"] = filt
    params["patch_bias_r"] = 0.05 * jax.random.normal(keys[4], (C_OUT,), jnp.float32)
    params["merge"] = {
        (0, 1): (0.2 * jax.random.normal(keys[5], (RATIO, RATIO), jnp.float32),
                 0.2 * jax.random.normal(keys[6], (RATIO, RATIO), jnp.float32),
                 0.1 * jax.random.normal(keys[7], (RATIO,), jnp.float32),
                 0.1 * jax.random.normal(keys[8], (RATIO,), jnp.float32)),
    }
    params["bn_gamma"] = [1.0 + 0.1 * jax.random.normal(keys[9 + i], (BATCH_SIZE,), jnp.float32)
                          for i in range(FFT_L_SIZE)]
    params["bn_beta"] = [0.1 * jax.random.normal(keys[11 + i], (BATCH_SIZE,), jnp.float32)
                         for i in range(FFT_L_SIZE)]
    return params


# ------------------------------------ main ---------------------------------------
if __name__ == "__main__":
    key = jax.random.PRNGKey(0)
    kx, kp = jax.random.split(key)
    x = jax.random.normal(kx, (BATCH_SIZE, C_IN, SER_SIZE), dtype=jnp.float32)
    params = init_params(kp)

    forward = jax.jit(stf_layer_forward)
    out = jax.block_until_ready(forward(x, params))
    assert out.shape == (BATCH_SIZE, C_OUT, SER_SIZE), out.shape
    assert bool(jnp.all(jnp.isfinite(out)))

    # numerical cross-check against a pure-JAX port of the module
    ref = jax.block_until_ready(stf_layer_reference(x, params))
    err = float(jnp.max(jnp.abs(out - ref)))
    tol = 2e-3 * (1.0 + float(jnp.max(jnp.abs(ref))))
    assert err <= tol, f"kernel vs reference mismatch: max|diff|={err}, tol={tol}"
    print("KERNEL_OK")
</pallas_src>

<mosaic_0001>
module attributes {stable_mosaic.version = 11 : i64} {
  func.func @_stf_fused_kernel(%arg0: memref<2x128xf32, #tpu.memory_space<vmem>>, %arg1: memref<128x96xf32, #tpu.memory_space<vmem>>, %arg2: memref<128x96xf32, #tpu.memory_space<vmem>>, %arg3: memref<128x80xf32, #tpu.memory_space<vmem>>, %arg4: memref<128x80xf32, #tpu.memory_space<vmem>>, %arg5: memref<96x48xf32, #tpu.memory_space<vmem>>, %arg6: memref<96x48xf32, #tpu.memory_space<vmem>>, %arg7: memref<48x80xf32, #tpu.memory_space<vmem>>, %arg8: memref<1x80xf32, #tpu.memory_space<vmem>>, %arg9: memref<96x128xf32, #tpu.memory_space<vmem>>, %arg10: memref<96x128xf32, #tpu.memory_space<vmem>>, %arg11: memref<80x128xf32, #tpu.memory_space<vmem>>, %arg12: memref<80x128xf32, #tpu.memory_space<vmem>>, %arg13: memref<1x128xf32, #tpu.memory_space<vmem>>, %arg14: memref<1x128xf32, #tpu.memory_space<vmem>>, %arg15: memref<2x1xf32, #tpu.memory_space<vmem>>, %arg16: memref<2x1xf32, #tpu.memory_space<vmem>>, %arg17: memref<2x1xf32, #tpu.memory_space<vmem>>, %arg18: memref<2x1xf32, #tpu.memory_space<vmem>>, %arg19: memref<12xf32, #tpu.memory_space<smem>>, %arg20: memref<2x256xf32, #tpu.memory_space<vmem>>) attributes {dimension_semantics = [], scalar_prefetch = 0 : i64, scratch_operands = 0 : i64, tpu.core_type = #tpu.core_type<tc>} {
    %c0 = arith.constant 0 : index
    %c0_0 = arith.constant 0 : index
    %0 = vector.load %arg0[%c0, %c0_0] : memref<2x128xf32, #tpu.memory_space<vmem>>, vector<2x128xf32>
    %c0_1 = arith.constant 0 : index
    %c0_2 = arith.constant 0 : index
    %1 = vector.load %arg1[%c0_1, %c0_2] : memref<128x96xf32, #tpu.memory_space<vmem>>, vector<128x96xf32>
    %cst = arith.constant dense<0.000000e+00> : vector<2x96xf32>
    %2 = tpu.matmul %0, %1, %cst {dimension_numbers = #tpu.dot_dimension_numbers<[1], [0], [0], [1], [0, 0, 1, 1], [], []>, precision = #tpu.contract_precision<fp32>} : vector<2x128xf32>, vector<128x96xf32>, vector<2x96xf32> -> vector<2x96xf32>
    %c0_3 = arith.constant 0 : index
    %c0_4 = arith.constant 0 : index
    %3 = vector.load %arg2[%c0_3, %c0_4] : memref<128x96xf32, #tpu.memory_space<vmem>>, vector<128x96xf32>
    %cst_5 = arith.constant dense<0.000000e+00> : vector<2x96xf32>
    %4 = tpu.matmul %0, %3, %cst_5 {dimension_numbers = #tpu.dot_dimension_numbers<[1], [0], [0], [1], [0, 0, 1, 1], [], []>, precision = #tpu.contract_precision<fp32>} : vector<2x128xf32>, vector<128x96xf32>, vector<2x96xf32> -> vector<2x96xf32>
    %c0_6 = arith.constant 0 : index
    %c0_7 = arith.constant 0 : index
    %5 = vector.load %arg3[%c0_6, %c0_7] : memref<128x80xf32, #tpu.memory_space<vmem>>, vector<128x80xf32>
    %cst_8 = arith.constant dense<0.000000e+00> : vector<2x80xf32>
    %6 = tpu.matmul %0, %5, %cst_8 {dimension_numbers = #tpu.dot_dimension_numbers<[1], [0], [0], [1], [0, 0, 1, 1], [], []>, precision = #tpu.contract_precision<fp32>} : vector<2x128xf32>, vector<128x80xf32>, vector<2x80xf32> -> vector<2x80xf32>
    %c0_9 = arith.constant 0 : index
    %c0_10 = arith.constant 0 : index
    %7 = vector.load %arg4[%c0_9, %c0_10] : memref<128x80xf32, #tpu.memory_space<vmem>>, vector<128x80xf32>
    %cst_11 = arith.constant dense<0.000000e+00> : vector<2x80xf32>
    %8 = tpu.matmul %0, %7, %cst_11 {dimension_numbers = #tpu.dot_dimension_numbers<[1], [0], [0], [1], [0, 0, 1, 1], [], []>, precision = #tpu.contract_precision<fp32>} : vector<2x128xf32>, vector<128x80xf32>, vector<2x80xf32> -> vector<2x80xf32>
    %c0_12 = arith.constant 0 : index
    %c0_13 = arith.constant 0 : index
    %9 = vector.load %arg5[%c0_12, %c0_13] : memref<96x48xf32, #tpu.memory_space<vmem>>, vector<96x48xf32>
    %c0_14 = arith.constant 0 : index
    %c0_15 = arith.constant 0 : index
    %10 = vector.load %arg6[%c0_14, %c0_15] : memref<96x48xf32, #tpu.memory_space<vmem>>, vector<96x48xf32>
    %cst_16 = arith.constant dense<0.000000e+00> : vector<2x48xf32>
    %11 = tpu.matmul %2, %9, %cst_16 {dimension_numbers = #tpu.dot_dimension_numbers<[1], [0], [0], [1], [0, 0, 1, 1], [], []>, precision = #tpu.contract_precision<fp32>} : vector<2x96xf32>, vector<96x48xf32>, vector<2x48xf32> -> vector<2x48xf32>
    %cst_17 = arith.constant dense<0.000000e+00> : vector<2x48xf32>
    %12 = tpu.matmul %4, %9, %cst_17 {dimension_numbers = #tpu.dot_dimension_numbers<[1], [0], [0], [1], [0, 0, 1, 1], [], []>, precision = #tpu.contract_precision<fp32>} : vector<2x96xf32>, vector<96x48xf32>, vector<2x48xf32> -> vector<2x48xf32>
    %cst_18 = arith.constant dense<0.000000e+00> : vector<2x48xf32>
    %13 = tpu.matmul %2, %10, %cst_18 {dimension_numbers = #tpu.dot_dimension_numbers<[1], [0], [0], [1], [0, 0, 1, 1], [], []>, precision = #tpu.contract_precision<fp32>} : vector<2x96xf32>, vector<96x48xf32>, vector<2x48xf32> -> vector<2x48xf32>
    %cst_19 = arith.constant dense<0.000000e+00> : vector<2x48xf32>
    %14 = tpu.matmul %4, %10, %cst_19 {dimension_numbers = #tpu.dot_dimension_numbers<[1], [0], [0], [1], [0, 0, 1, 1], [], []>, precision = #tpu.contract_precision<fp32>} : vector<2x96xf32>, vector<96x48xf32>, vector<2x48xf32> -> vector<2x48xf32>
    %c0_20 = arith.constant 0 : index
    %15 = memref.load %arg19[%c0_20] : memref<12xf32, #tpu.memory_space<smem>>
    %c1 = arith.constant 1 : index
    %16 = memref.load %arg19[%c1] : memref<12xf32, #tpu.memory_space<smem>>
    %c2 = arith.constant 2 : index
    %17 = memref.load %arg19[%c2] : memref<12xf32, #tpu.memory_space<smem>>
    %c3 = arith.constant 3 : index
    %18 = memref.load %arg19[%c3] : memref<12xf32, #tpu.memory_space<smem>>
    %c4 = arith.constant 4 : index
    %19 = memref.load %arg19[%c4] : memref<12xf32, #tpu.memory_space<smem>>
    %c5 = arith.constant 5 : index
    %20 = memref.load %arg19[%c5] : memref<12xf32, #tpu.memory_space<smem>>
    %c6 = arith.constant 6 : index
    %21 = memref.load %arg19[%c6] : memref<12xf32, #tpu.memory_space<smem>>
    %c7 = arith.constant 7 : index
    %22 = memref.load %arg19[%c7] : memref<12xf32, #tpu.memory_space<smem>>
    %c8 = arith.constant 8 : index
    %23 = memref.load %arg19[%c8] : memref<12xf32, #tpu.memory_space<smem>>
    %c9 = arith.constant 9 : index
    %24 = memref.load %arg19[%c9] : memref<12xf32, #tpu.memory_space<smem>>
    %c10 = arith.constant 10 : index
    %25 = memref.load %arg19[%c10] : memref<12xf32, #tpu.memory_space<smem>>
    %c11 = arith.constant 11 : index
    %26 = memref.load %arg19[%c11] : memref<12xf32, #tpu.memory_space<smem>>
    %27 = vector.broadcast %15 : f32 to vector<2x48xf32>
    %28 = arith.mulf %11, %27 : vector<2x48xf32>
    %29 = vector.broadcast %16 : f32 to vector<2x48xf32>
    %30 = arith.mulf %12, %29 : vector<2x48xf32>
    %31 = arith.subf %28, %30 : vector<2x48xf32>
    %32 = vector.broadcast %19 : f32 to vector<2x48xf32>
    %33 = arith.mulf %13, %32 : vector<2x48xf32>
    %34 = arith.addf %31, %33 : vector<2x48xf32>
    %35 = vector.broadcast %20 : f32 to vector<2x48xf32>
    %36 = arith.mulf %14, %35 : vector<2x48xf32>
    %37 = arith.subf %34, %36 : vector<2x48xf32>
    %38 = vector.broadcast %23 : f32 to vector<2x48xf32>
    %39 = arith.addf %37, %38 : vector<2x48xf32>
    %40 = vector.broadcast %16 : f32 to vector<2x48xf32>
    %41 = arith.mulf %11, %40 : vector<2x48xf32>
    %42 = vector.broadcast %15 : f32 to vector<2x48xf32>
    %43 = arith.mulf %12, %42 : vector<2x48xf32>
    %44 = arith.addf %41, %43 : vector<2x48xf32>
    %45 = vector.broadcast %20 : f32 to vector<2x48xf32>
    %46 = arith.mulf %13, %45 : vector<2x48xf32>
    %47 = arith.addf %44, %46 : vector<2x48xf32>
    %48 = vector.broadcast %19 : f32 to vector<2x48xf32>
    %49 = arith.mulf %14, %48 : vector<2x48xf32>
    %50 = arith.addf %47, %49 : vector<2x48xf32>
    %51 = vector.broadcast %24 : f32 to vector<2x48xf32>
    %52 = arith.addf %50, %51 : vector<2x48xf32>
    %53 = vector.broadcast %17 : f32 to vector<2x48xf32>
    %54 = arith.mulf %11, %53 : vector<2x48xf32>
    %55 = vector.broadcast %18 : f32 to vector<2x48xf32>
    %56 = arith.mulf %12, %55 : vector<2x48xf32>
    %57 = arith.subf %54, %56 : vector<2x48xf32>
    %58 = vector.broadcast %21 : f32 to vector<2x48xf32>
    %59 = arith.mulf %13, %58 : vector<2x48xf32>
    %60 = arith.addf %57, %59 : vector<2x48xf32>
    %61 = vector.broadcast %22 : f32 to vector<2x48xf32>
    %62 = arith.mulf %14, %61 : vector<2x48xf32>
    %63 = arith.subf %60, %62 : vector<2x48xf32>
    %64 = vector.broadcast %25 : f32 to vector<2x48xf32>
    %65 = arith.addf %63, %64 : vector<2x48xf32>
    %66 = vector.broadcast %18 : f32 to vector<2x48xf32>
    %67 = arith.mulf %11, %66 : vector<2x48xf32>
    %68 = vector.broadcast %17 : f32 to vector<2x48xf32>
    %69 = arith.mulf %12, %68 : vector<2x48xf32>
    %70 = arith.addf %67, %69 : vector<2x48xf32>
    %71 = vector.broadcast %22 : f32 to vector<2x48xf32>
    %72 = arith.mulf %13, %71 : vector<2x48xf32>
    %73 = arith.addf %70, %72 : vector<2x48xf32>
    %74 = vector.broadcast %21 : f32 to vector<2x48xf32>
    %75 = arith.mulf %14, %74 : vector<2x48xf32>
    %76 = arith.addf %73, %75 : vector<2x48xf32>
    %77 = vector.broadcast %26 : f32 to vector<2x48xf32>
    %78 = arith.addf %76, %77 : vector<2x48xf32>
    %79 = arith.mulf %39, %39 : vector<2x48xf32>
    %80 = arith.mulf %52, %52 : vector<2x48xf32>
    %81 = arith.addf %79, %80 : vector<2x48xf32>
    %82 = math.sqrt %81 : vector<2x48xf32>
    %83 = arith.mulf %65, %65 : vector<2x48xf32>
    %84 = arith.mulf %78, %78 : vector<2x48xf32>
    %85 = arith.addf %83, %84 : vector<2x48xf32>
    %86 = math.sqrt %85 : vector<2x48xf32>
    %87 = arith.maximumf %82, %86 : vector<2x48xf32>
    %88 = arith.subf %82, %87 : vector<2x48xf32>
    %89 = math.exp %88 : vector<2x48xf32>
    %90 = arith.subf %86, %87 : vector<2x48xf32>
    %91 = math.exp %90 : vector<2x48xf32>
    %92 = arith.addf %89, %91 : vector<2x48xf32>
    %93 = tpu.reciprocal %92 : vector<2x48xf32> -> vector<2x48xf32>
    %94 = arith.mulf %89, %93 : vector<2x48xf32>
    %95 = arith.mulf %91, %93 : vector<2x48xf32>
    %96 = arith.mulf %11, %94 : vector<2x48xf32>
    %97 = arith.mulf %13, %95 : vector<2x48xf32>
    %98 = arith.addf %96, %97 : vector<2x48xf32>
    %cst_21 = arith.constant 2.000000e+00 : f32
    %99 = vector.broadcast %cst_21 : f32 to vector<2x48xf32>
    %100 = arith.mulf %98, %99 : vector<2x48xf32>
    %101 = arith.mulf %12, %94 : vector<2x48xf32>
    %102 = arith.mulf %14, %95 : vector<2x48xf32>
    %103 = arith.addf %101, %102 : vector<2x48xf32>
    %cst_22 = arith.constant 2.000000e+00 : f32
    %104 = vector.broadcast %cst_22 : f32 to vector<2x48xf32>
    %105 = arith.mulf %103, %104 : vector<2x48xf32>
    %c0_23 = arith.constant 0 : index
    %c0_24 = arith.constant 0 : index
    %106 = vector.load %arg8[%c0_23, %c0_24] : memref<1x80xf32, #tpu.memory_space<vmem>>, vector<1x80xf32>
    %c0_25 = arith.constant 0 : index
    %c0_26 = arith.constant 0 : index
    %107 = vector.load %arg7[%c0_25, %c0_26] : memref<48x80xf32, #tpu.memory_space<vmem>>, vector<48x80xf32>
    %cst_27 = arith.constant dense<0.000000e+00> : vector<2x80xf32>
    %108 = tpu.matmul %100, %107, %cst_27 {dimension_numbers = #tpu.dot_dimension_numbers<[1], [0], [0], [1], [0, 0, 1, 1], [], []>, precision = #tpu.contract_precision<fp32>} : vector<2x48xf32>, vector<48x80xf32>, vector<2x80xf32> -> vector<2x80xf32>
    %109 = vector.broadcast %106 : vector<1x80xf32> to vector<2x80xf32>
    %110 = arith.mulf %6, %109 : vector<2x80xf32>
    %111 = arith.addf %108, %110 : vector<2x80xf32>
    %cst_28 = arith.constant dense<0.000000e+00> : vector<2x80xf32>
    %112 = tpu.matmul %105, %107, %cst_28 {dimension_numbers = #tpu.dot_dimension_numbers<[1], [0], [0], [1], [0, 0, 1, 1], [], []>, precision = #tpu.contract_precision<fp32>} : vector<2x48xf32>, vector<48x80xf32>, vector<2x80xf32> -> vector<2x80xf32>
    %113 = vector.broadcast %106 : vector<1x80xf32> to vector<2x80xf32>
    %114 = arith.mulf %8, %113 : vector<2x80xf32>
    %115 = arith.addf %112, %114 : vector<2x80xf32>
    %c0_29 = arith.constant 0 : index
    %c0_30 = arith.constant 0 : index
    %116 = vector.load %arg15[%c0_29, %c0_30] : memref<2x1xf32, #tpu.memory_space<vmem>>, vector<2x1xf32>
    %c0_31 = arith.constant 0 : index
    %c0_32 = arith.constant 0 : index
    %117 = vector.load %arg16[%c0_31, %c0_32] : memref<2x1xf32, #tpu.memory_space<vmem>>, vector<2x1xf32>
    %cst_33 = arith.constant dense<0.000000e+00> : vector<2xf32>
    %118 = vector.multi_reduction <add>, %2, %cst_33 [1] : vector<2x96xf32> to vector<2xf32>
    %119 = vector.shape_cast %118 : vector<2xf32> to vector<2x1xf32>
    %cst_34 = arith.constant 9.600000e+01 : f32
    %120 = vector.broadcast %cst_34 : f32 to vector<2x1xf32>
    %121 = arith.divf %119, %120 : vector<2x1xf32>
    %cst_35 = arith.constant dense<0.000000e+00> : vector<2xf32>
    %122 = vector.multi_reduction <add>, %4, %cst_35 [1] : vector<2x96xf32> to vector<2xf32>
    %123 = vector.shape_cast %122 : vector<2xf32> to vector<2x1xf32>
    %cst_36 = arith.constant 9.600000e+01 : f32
    %124 = vector.broadcast %cst_36 : f32 to vector<2x1xf32>
    %125 = arith.divf %123, %124 : vector<2x1xf32>
    %126 = vector.broadcast %121 : vector<2x1xf32> to vector<2x96xf32>
    %127 = arith.subf %2, %126 : vector<2x96xf32>
    %128 = vector.broadcast %121 : vector<2x1xf32> to vector<2x96xf32>
    %129 = arith.subf %2, %128 : vector<2x96xf32>
    %130 = arith.mulf %127, %129 : vector<2x96xf32>
    %cst_37 = arith.constant dense<0.000000e+00> : vector<2xf32>
    %131 = vector.multi_reduction <add>, %130, %cst_37 [1] : vector<2x96xf32> to vector<2xf32>
    %132 = vector.shape_cast %131 : vector<2xf32> to vector<2x1xf32>
    %cst_38 = arith.constant 9.600000e+01 : f32
    %133 = vector.broadcast %cst_38 : f32 to vector<2x1xf32>
    %134 = arith.divf %132, %133 : vector<2x1xf32>
    %135 = vector.broadcast %125 : vector<2x1xf32> to vector<2x96xf32>
    %136 = arith.subf %4, %135 : vector<2x96xf32>
    %137 = vector.broadcast %125 : vector<2x1xf32> to vector<2x96xf32>
    %138 = arith.subf %4, %137 : vector<2x96xf32>
    %139 = arith.mulf %136, %138 : vector<2x96xf32>
    %cst_39 = arith.constant dense<0.000000e+00> : vector<2xf32>
    %140 = vector.multi_reduction <add>, %139, %cst_39 [1] : vector<2x96xf32> to vector<2xf32>
    %141 = vector.shape_cast %140 : vector<2xf32> to vector<2x1xf32>
    %cst_40 = arith.constant 9.600000e+01 : f32
    %142 = vector.broadcast %cst_40 : f32 to vector<2x1xf32>
    %143 = arith.divf %141, %142 : vector<2x1xf32>
    %144 = arith.addf %134, %143 : vector<2x1xf32>
    %cst_41 = arith.constant 9.99999974E-6 : f32
    %145 = vector.broadcast %cst_41 : f32 to vector<2x1xf32>
    %146 = arith.addf %144, %145 : vector<2x1xf32>
    %147 = math.rsqrt %146 : vector<2x1xf32>
    %148 = arith.mulf %147, %116 : vector<2x1xf32>
    %149 = vector.broadcast %121 : vector<2x1xf32> to vector<2x96xf32>
    %150 = arith.subf %2, %149 : vector<2x96xf32>
    %151 = vector.broadcast %148 : vector<2x1xf32> to vector<2x96xf32>
    %152 = arith.mulf %150, %151 : vector<2x96xf32>
    %153 = vector.broadcast %117 : vector<2x1xf32> to vector<2x96xf32>
    %154 = arith.addf %152, %153 : vector<2x96xf32>
    %155 = vector.broadcast %125 : vector<2x1xf32> to vector<2x96xf32>
    %156 = arith.subf %4, %155 : vector<2x96xf32>
    %157 = vector.broadcast %148 : vector<2x1xf32> to vector<2x96xf32>
    %158 = arith.mulf %156, %157 : vector<2x96xf32>
    %c0_42 = arith.constant 0 : index
    %c0_43 = arith.constant 0 : index
    %159 = vector.load %arg17[%c0_42, %c0_43] : memref<2x1xf32, #tpu.memory_space<vmem>>, vector<2x1xf32>
    %c0_44 = arith.constant 0 : index
    %c0_45 = arith.constant 0 : index
    %160 = vector.load %arg18[%c0_44, %c0_45] : memref<2x1xf32, #tpu.memory_space<vmem>>, vector<2x1xf32>
    %cst_46 = arith.constant dense<0.000000e+00> : vector<2xf32>
    %161 = vector.multi_reduction <add>, %111, %cst_46 [1] : vector<2x80xf32> to vector<2xf32>
    %162 = vector.shape_cast %161 : vector<2xf32> to vector<2x1xf32>
    %cst_47 = arith.constant 8.000000e+01 : f32
    %163 = vector.broadcast %cst_47 : f32 to vector<2x1xf32>
    %164 = arith.divf %162, %163 : vector<2x1xf32>
    %cst_48 = arith.constant dense<0.000000e+00> : vector<2xf32>
    %165 = vector.multi_reduction <add>, %115, %cst_48 [1] : vector<2x80xf32> to vector<2xf32>
    %166 = vector.shape_cast %165 : vector<2xf32> to vector<2x1xf32>
    %cst_49 = arith.constant 8.000000e+01 : f32
    %167 = vector.broadcast %cst_49 : f32 to vector<2x1xf32>
    %168 = arith.divf %166, %167 : vector<2x1xf32>
    %169 = vector.broadcast %164 : vector<2x1xf32> to vector<2x80xf32>
    %170 = arith.subf %111, %169 : vector<2x80xf32>
    %171 = vector.broadcast %164 : vector<2x1xf32> to vector<2x80xf32>
    %172 = arith.subf %111, %171 : vector<2x80xf32>
    %173 = arith.mulf %170, %172 : vector<2x80xf32>
    %cst_50 = arith.constant dense<0.000000e+00> : vector<2xf32>
    %174 = vector.multi_reduction <add>, %173, %cst_50 [1] : vector<2x80xf32> to vector<2xf32>
    %175 = vector.shape_cast %174 : vector<2xf32> to vector<2x1xf32>
    %cst_51 = arith.constant 8.000000e+01 : f32
    %176 = vector.broadcast %cst_51 : f32 to vector<2x1xf32>
    %177 = arith.divf %175, %176 : vector<2x1xf32>
    %178 = vector.broadcast %168 : vector<2x1xf32> to vector<2x80xf32>
    %179 = arith.subf %115, %178 : vector<2x80xf32>
    %180 = vector.broadcast %168 : vector<2x1xf32> to vector<2x80xf32>
    %181 = arith.subf %115, %180 : vector<2x80xf32>
    %182 = arith.mulf %179, %181 : vector<2x80xf32>
    %cst_52 = arith.constant dense<0.000000e+00> : vector<2xf32>
    %183 = vector.multi_reduction <add>, %182, %cst_52 [1] : vector<2x80xf32> to vector<2xf32>
    %184 = vector.shape_cast %183 : vector<2xf32> to vector<2x1xf32>
    %cst_53 = arith.constant 8.000000e+01 : f32
    %185 = vector.broadcast %cst_53 : f32 to vector<2x1xf32>
    %186 = arith.divf %184, %185 : vector<2x1xf32>
    %187 = arith.addf %177, %186 : vector<2x1xf32>
    %cst_54 = arith.constant 9.99999974E-6 : f32
    %188 = vector.broadcast %cst_54 : f32 to vector<2x1xf32>
    %189 = arith.addf %187, %188 : vector<2x1xf32>
    %190 = math.rsqrt %189 : vector<2x1xf32>
    %191 = arith.mulf %190, %159 : vector<2x1xf32>
    %192 = vector.broadcast %164 : vector<2x1xf32> to vector<2x80xf32>
    %193 = arith.subf %111, %192 : vector<2x80xf32>
    %194 = vector.broadcast %191 : vector<2x1xf32> to vector<2x80xf32>
    %195 = arith.mulf %193, %194 : vector<2x80xf32>
    %196 = vector.broadcast %160 : vector<2x1xf32> to vector<2x80xf32>
    %197 = arith.addf %195, %196 : vector<2x80xf32>
    %198 = vector.broadcast %168 : vector<2x1xf32> to vector<2x80xf32>
    %199 = arith.subf %115, %198 : vector<2x80xf32>
    %200 = vector.broadcast %191 : vector<2x1xf32> to vector<2x80xf32>
    %201 = arith.mulf %199, %200 : vector<2x80xf32>
    %c0_55 = arith.constant 0 : index
    %c0_56 = arith.constant 0 : index
    %202 = vector.load %arg9[%c0_55, %c0_56] : memref<96x128xf32, #tpu.memory_space<vmem>>, vector<96x128xf32>
    %cst_57 = arith.constant dense<0.000000e+00> : vector<2x128xf32>
    %203 = tpu.matmul %154, %202, %cst_57 {dimension_numbers = #tpu.dot_dimension_numbers<[1], [0], [0], [1], [0, 0, 1, 1], [], []>, precision = #tpu.contract_precision<fp32>} : vector<2x96xf32>, vector<96x128xf32>, vector<2x128xf32> -> vector<2x128xf32>
    %c0_58 = arith.constant 0 : index
    %c0_59 = arith.constant 0 : index
    %204 = vector.load %arg10[%c0_58, %c0_59] : memref<96x128xf32, #tpu.memory_space<vmem>>, vector<96x128xf32>
    %cst_60 = arith.constant dense<0.000000e+00> : vector<2x128xf32>
    %205 = tpu.matmul %158, %204, %cst_60 {dimension_numbers = #tpu.dot_dimension_numbers<[1], [0], [0], [1], [0, 0, 1, 1], [], []>, precision = #tpu.contract_precision<fp32>} : vector<2x96xf32>, vector<96x128xf32>, vector<2x128xf32> -> vector<2x128xf32>
    %206 = arith.addf %203, %205 : vector<2x128xf32>
    %c0_61 = arith.constant 0 : index
    %c0_62 = arith.constant 0 : index
    %207 = vector.load %arg13[%c0_61, %c0_62] : memref<1x128xf32, #tpu.memory_space<vmem>>, vector<1x128xf32>
    %208 = vector.broadcast %207 : vector<1x128xf32> to vector<2x128xf32>
    %209 = arith.addf %206, %208 : vector<2x128xf32>
    %c0_63 = arith.constant 0 : index
    %c0_64 = arith.constant 0 : index
    %210 = vector.load %arg11[%c0_63, %c0_64] : memref<80x128xf32, #tpu.memory_space<vmem>>, vector<80x128xf32>
    %cst_65 = arith.constant dense<0.000000e+00> : vector<2x128xf32>
    %211 = tpu.matmul %197, %210, %cst_65 {dimension_numbers = #tpu.dot_dimension_numbers<[1], [0], [0], [1], [0, 0, 1, 1], [], []>, precision = #tpu.contract_precision<fp32>} : vector<2x80xf32>, vector<80x128xf32>, vector<2x128xf32> -> vector<2x128xf32>
    %c0_66 = arith.constant 0 : index
    %c0_67 = arith.constant 0 : index
    %212 = vector.load %arg12[%c0_66, %c0_67] : memref<80x128xf32, #tpu.memory_space<vmem>>, vector<80x128xf32>
    %cst_68 = arith.constant dense<0.000000e+00> : vector<2x128xf32>
    %213 = tpu.matmul %201, %212, %cst_68 {dimension_numbers = #tpu.dot_dimension_numbers<[1], [0], [0], [1], [0, 0, 1, 1], [], []>, precision = #tpu.contract_precision<fp32>} : vector<2x80xf32>, vector<80x128xf32>, vector<2x128xf32> -> vector<2x128xf32>
    %214 = arith.addf %211, %213 : vector<2x128xf32>
    %c0_69 = arith.constant 0 : index
    %c0_70 = arith.constant 0 : index
    %215 = vector.load %arg14[%c0_69, %c0_70] : memref<1x128xf32, #tpu.memory_space<vmem>>, vector<1x128xf32>
    %216 = vector.broadcast %215 : vector<1x128xf32> to vector<2x128xf32>
    %217 = arith.addf %214, %216 : vector<2x128xf32>
    %cst_71 = arith.constant 0.000000e+00 : f32
    %218 = vector.broadcast %cst_71 : f32 to vector<2x128xf32>
    %219 = arith.maximumf %209, %218 : vector<2x128xf32>
    %c0_72 = arith.constant 0 : index
    %c0_73 = arith.constant 0 : index
    %220 = vector.load %arg20[%c0_72, %c0_73] : memref<2x256xf32, #tpu.memory_space<vmem>>, vector<2x128xf32>
    tpu.vector_store %arg20[%c0_72, %c0_73], %219 {strides = array<i32>} : memref<2x256xf32, #tpu.memory_space<vmem>>, vector<2x128xf32>,
    %cst_74 = arith.constant 0.000000e+00 : f32
    %221 = vector.broadcast %cst_74 : f32 to vector<2x128xf32>
    %222 = arith.maximumf %217, %221 : vector<2x128xf32>
    %c0_75 = arith.constant 0 : index
    %c128 = arith.constant 128 : index
    %223 = vector.load %arg20[%c0_75, %c128] : memref<2x256xf32, #tpu.memory_space<vmem>>, vector<2x128xf32>
    tpu.vector_store %arg20[%c0_75, %c128], %222 {strides = array<i32>} : memref<2x256xf32, #tpu.memory_space<vmem>>, vector<2x128xf32>,
    return
  }
}

</mosaic_0001>

<bundles_post_ra>
// kernel: stf_layer_forward.1
= control target key start
LH: loop header
LB: loop body
LE: loop exit
PB: predicated region body
PF: predicated region fallthrough
CT: control target
= control target key end

     0   :  { %s7684_s0 = inlined_call_operand.vmem [shape: f32[2,128], index: 0, kind: input, shape index: {}]   ;;  %s7685_s1 = inlined_call_operand.vmem [shape: f32[128,96], index: 1, kind: input, shape index: {}]   ;;  %s7686_s2 = inlined_call_operand.vmem [shape: f32[128,96], index: 2, kind: input, shape index: {}]   ;;  %s7687_s3 = inlined_call_operand.vmem [shape: f32[128,80], index: 3, kind: input, shape index: {}]   ;;  %s7688_s4 = inlined_call_operand.vmem [shape: f32[128,80], index: 4, kind: input, shape index: {}]   ;;  %s7689_s5 = inlined_call_operand.vmem [shape: f32[96,48], index: 5, kind: input, shape index: {}]   ;;  %s7690_s6 = inlined_call_operand.vmem [shape: f32[96,48], index: 6, kind: input, shape index: {}]   ;;  %s7691_s7 = inlined_call_operand.vmem [shape: f32[48,80], index: 7, kind: input, shape index: {}]   ;;  %s7692_s8 = inlined_call_operand.vmem [shape: f32[1,80], index: 8, kind: input, shape index: {}]   ;;  %s7693_s9 = inlined_call_operand.vmem [shape: f32[96,128], index: 9, kind: input, shape index: {}]   ;;  %s7694_s10 = inlined_call_operand.vmem [shape: f32[96,128], index: 10, kind: input, shape index: {}]   ;;  %s7695_s11 = inlined_call_operand.vmem [shape: f32[80,128], index: 11, kind: input, shape index: {}]   ;;  %s7696_s12 = inlined_call_operand.vmem [shape: f32[80,128], index: 12, kind: input, shape index: {}]   ;;  %s7697_s13 = inlined_call_operand.vmem [shape: f32[1,128], index: 13, kind: input, shape index: {}]   ;;  %s7698_s14 = inlined_call_operand.vmem [shape: f32[1,128], index: 14, kind: input, shape index: {}]   ;;  %s7699_s15 = inlined_call_operand.vmem [shape: f32[2,1], index: 15, kind: input, shape index: {}]   ;;  %s7700_s16 = inlined_call_operand.vmem [shape: f32[2,1], index: 16, kind: input, shape index: {}]   ;;  %s7701_s17 = inlined_call_operand.vmem [shape: f32[2,1], index: 17, kind: input, shape index: {}]   ;;  %s7702_s18 = inlined_call_operand.vmem [shape: f32[2,1], index: 18, kind: input, shape index: {}]   ;;  %s7703_s19 = inlined_call_operand.vmem [shape: f32[12], index: 19, kind: input, shape index: {}]   ;;  %s7704_s20 = inlined_call_operand.vmem [shape: f32[2,256], index: 20, kind: output, shape index: {}]  }
   0x1   :  { %7767 = sst [smem:[#allocation14_spill]] %s7684_s0 }
   0x2   :  { %7768 = sst [smem:[#allocation15_spill]] %s7685_s1 }
   0x3   :  { %7769 = sst [smem:[#allocation16_spill]] %s7686_s2 }
   0x4   :  { %7770 = sst [smem:[#allocation17_spill]] %s7687_s3 }
   0x5   :  { %7771 = sst [smem:[#allocation18_spill]] %s7688_s4 }
   0x6   :  { %25 = vsyncpa [#allocation3], 0  ;;  %s69_s23 = sshll.u32 %s7703_s19, 4  ;;  %s4598_s24 = smov [#allocation2]   ;;  %s70_s23 = int_to_ptr.vmem [resolvable:$true] %s69_s23 }
   0x7   :  { %72 = dma.vmem_to_smem %s70_s23, 16, %s4598_s24, [#allocation3]  }
   0x8   :  { %4596 = dma.done.wait [#allocation3], 16  }
   0x9   :  { %4597 = vsyncadd [#allocation3], 4294967280 }
   0xa   :  { %77 = sfence }
   0xb   :  { %s7772_s3 = sld [smem:[#allocation15_spill]]  ;;  %vm1531_vm0 = vcmask 785408   ;;  %vm3255_vm1 = vcmask 779264   ;;  %vm2823_vm14 = vcmask 392192   ;;  %vm3311_vm15 = vcmask 648192  }
   0xc   :  { %s7773_s2 = sld [smem:[#allocation16_spill]] }
   0xd   :  { %s7787_s27 = sld [smem:[#allocation14_spill]] }
   0xe   :  { %s7818_s0 = sld [smem:[#allocation17_spill]] }
   0xf   :  { %s7819_s28 = sld [smem:[#allocation18_spill]] }
  0x10   :  { %s6601_s1 = sld [smem:[#allocation2 + $0x2]] }
  0x11   :  { %v94_v0 = vld [vmem:[%s7772_s3 + $0x78] sm:$0xff]  ;;  %v93_v1 = vld [vmem:[%s7772_s3 + $0x70] sm:$0xff]  ;;  %v92_v2 = vld [vmem:[%s7772_s3 + $0x68] sm:$0xff]  ;;  %s6605_s22 = sld [smem:[#allocation2 + $0x4]] }
  0x12   :  { %v4719_v3 = vand.u32 4294901760, %v94_v0  ;;  %v4721_v4 = vand.u32 4294901760, %v93_v1  ;;  %v4723_v5 = vand.u32 4294901760, %v92_v2  ;;  %v91_v6 = vld [vmem:[%s7772_s3 + $0x60] sm:$0xff]  ;;  %v90_v7 = vld [vmem:[%s7772_s3 + $0x58] sm:$0xff]  ;;  %v89_v8 = vld [vmem:[%s7772_s3 + $0x50] sm:$0xff] }
  0x13   :  { %v4734_v9 = vand.u32 4294901760, %v91_v6  ;;  %v4736_v10 = vand.u32 4294901760, %v90_v7  ;;  %v4738_v11 = vand.u32 4294901760, %v89_v8  ;;  %v88_v12 = vld [vmem:[%s7772_s3 + $0x48] sm:$0xff]  ;;  %v87_v13 = vld [vmem:[%s7772_s3 + $0x40] sm:$0xff]  ;;  %v86_v18 = vld [vmem:[%s7772_s3 + $0x38] sm:$0xff] }
  0x14   :  { %96 = vmatpush.msra.mxu0 %v4719_v3  ;;  %292 = vmatpush.msra.mxu3 %v4719_v3  ;;  %v4749_v14 = vsub.f32 %v94_v0, %v4719_v3  ;;  %v4752_v15 = vsub.f32 %v93_v1, %v4721_v4  ;;  %v4755_v16 = vsub.f32 %v92_v2, %v4723_v5  ;;  %v4757_v17 = vand.u32 4294901760, %v88_v12  ;;  %v85_v26 = vld [vmem:[%s7772_s3 + $0x30] sm:$0xff]  ;;  %v84_v34 = vld [vmem:[%s7772_s3 + $0x28] sm:$0xff]  ;;  %v83_v42 = vld [vmem:[%s7772_s3 + $0x20] sm:$0xff]  ;;  %s6607_s23 = sld [smem:[#allocation2 + $0x5]] }
  0x15   :  { %v4763_v19 = vsub.f32 %v91_v6, %v4734_v9  ;;  %v4766_v20 = vsub.f32 %v90_v7, %v4736_v10  ;;  %v4769_v21 = vsub.f32 %v89_v8, %v4738_v11  ;;  %v4776_v25 = vand.u32 4294901760, %v87_v13  ;;  %v82_v52 = vld [vmem:[%s7772_s3 + $0x18] sm:$0xff]  ;;  %v81_v54 = vld [vmem:[%s7772_s3 + $0x10] sm:$0xff]  ;;  %v80_v63 = vld [vmem:[%s7772_s3 + $0x8] sm:$0xff]  ;;  %s6609_s24 = sld [smem:[#allocation2 + $0x6]] }
  0x16   :  { %98 = vmatpush.msra.mxu0 %v4721_v4  ;;  %239 = vmatpush.msra.mxu2 %v4749_v14  ;;  %v7723_v22 = vand.u32 4294901760, %v4749_v14  ;;  %v7722_v23 = vand.u32 4294901760, %v4752_v15  ;;  %v7721_v24 = vand.u32 4294901760, %v4755_v16  ;;  %v4784_v28 = vsub.f32 %v88_v12, %v4757_v17  ;;  %v451_v55 = vld [vmem:[%s7773_s2 + $0x78] sm:$0xff]  ;;  %v450_v59 = vld [vmem:[%s7773_s2 + $0x70] sm:$0xff]  ;;  %v449_v7 = vld [vmem:[%s7773_s2 + $0x68] sm:$0xff] }
  0x17   :  { %294 = vmatpush.msra.mxu3 %v4721_v4  ;;  %v7718_v27 = vand.u32 4294901760, %v4763_v19  ;;  %v4786_v29 = vand.u32 4294901760, %v86_v18  ;;  %v7717_v33 = vand.u32 4294901760, %v4766_v20  ;;  %v4804_v35 = vand.u32 4294901760, %v85_v26  ;;  %v79_v12 = vld [vmem:[%s7772_s3] sm:$0xff]  ;;  %s6599_s3 = sld [smem:[#allocation2 + $0x1]] }
  0x18   :  { %100 = vmatpush.msra.mxu0 %v4723_v5  ;;  %242 = vmatpush.msra.mxu2 %v4752_v15  ;;  %v139_v30 = vsub.f32 %v4749_v14, %v7723_v22  ;;  %v145_v31 = vsub.f32 %v4752_v15, %v7722_v23  ;;  %v151_v32 = vsub.f32 %v4755_v16, %v7721_v24  ;;  %v7715_v36 = vand.u32 4294901760, %v4769_v21  ;;  %v442_v22 = vld [vmem:[%s7773_s2 + $0x30] sm:$0xff]  ;;  %s6611_s25 = sld [smem:[#allocation2 + $0x7]] }
  0x19   :  { %296 = vmatpush.msra.mxu3 %v4723_v5  ;;  %v157_v39 = vsub.f32 %v4763_v19, %v7718_v27  ;;  %v4813_v40 = vsub.f32 %v87_v13, %v4776_v25  ;;  %v4817_v41 = vsub.f32 %v86_v18, %v4786_v29  ;;  %v163_v44 = vsub.f32 %v4766_v20, %v7717_v33  ;;  %s6615_s26 = sld [smem:[#allocation2 + $0x8]] }
  0x1a   :  { %102 = vmatpush.msra.mxu0 %v4734_v9  ;;  %245 = vmatpush.msra.mxu2 %v4755_v16  ;;  %v140_v37 = vand.u32 4294901760, %v139_v30  ;;  %v146_v38 = vand.u32 4294901760, %v145_v31  ;;  %v152_v43 = vand.u32 4294901760, %v151_v32  ;;  %v4826_v45 = vand.u32 4294901760, %v84_v34  ;;  %v448_v32 = vld [vmem:[%s7773_s2 + $0x60] sm:$0xff] }
  0x1b   :  { %298 = vmatpush.msra.mxu3 %v4734_v9  ;;  %v7714_v46 = vand.u32 4294901760, %v4784_v28  ;;  %v169_v47 = vsub.f32 %v4769_v21, %v7715_v36  ;;  %v4835_v48 = vsub.f32 %v85_v26, %v4804_v35  ;;  %v158_v49 = vand.u32 4294901760, %v157_v39  ;;  %v447_v39 = vld [vmem:[%s7773_s2 + $0x58] sm:$0xff]  ;;  %v444_v36 = vld [vmem:[%s7773_s2 + $0x40] sm:$0xff] }
  0x1c   :  { %104 = vmatpush.msra.mxu0 %v4736_v10  ;;  %141 = vmatpush.msra.mxu1 %v140_v37  ;;  %v4838_v50 = vand.u32 4294901760, %v83_v42  ;;  %v7713_v51 = vand.u32 4294901760, %v4813_v40  ;;  %v7711_v53 = vand.u32 4294901760, %v4817_v41  ;;  %v164_v56 = vand.u32 4294901760, %v163_v44 }
  0x1d   :  { %248 = vmatpush.msra.mxu2 %v4763_v19  ;;  %300 = vmatpush.msra.mxu3 %v4736_v10  ;;  %v175_v57 = vsub.f32 %v4784_v28, %v7714_v46  ;;  %v4858_v58 = vsub.f32 %v84_v34, %v4826_v45  ;;  %v170_v60 = vand.u32 4294901760, %v169_v47  ;;  %v4865_v61 = vand.u32 4294901760, %v82_v52 }
  0x1e   :  { %106 = vmatpush.msra.mxu0 %v4738_v11  ;;  %147 = vmatpush.msra.mxu1 %v146_v38  ;;  %v7710_v62 = vand.u32 4294901760, %v4835_v48  ;;  %v181_v0 = vsub.f32 %v4813_v40, %v7713_v51  ;;  %v4876_v1 = vsub.f32 %v83_v42, %v4838_v50  ;;  %v4878_v2 = vand.u32 4294901760, %v81_v54 }
  0x1f   :  { %251 = vmatpush.msra.mxu2 %v4766_v20  ;;  %302 = vmatpush.msra.mxu3 %v4738_v11  ;;  %v4880_v6 = vand.u32 4294901760, %v451_v55  ;;  %v187_v8 = vsub.f32 %v4817_v41, %v7711_v53  ;;  %v4893_v13 = vand.u32 4294901760, %v450_v59  ;;  %v176_v18 = vand.u32 4294901760, %v175_v57 }
  0x20   :  { %108 = vmatpush.msra.mxu0 %v4757_v17  ;;  %153 = vmatpush.msra.mxu1 %v152_v43  ;;  %7774 = vst [vmem:[#allocation5_spill] sm:$0xff] %v4878_v2  ;;  %v4896_v26 = vand.u32 4294901760, %v80_v63  ;;  %v7709_v30 = vand.u32 4294901760, %v4858_v58  ;;  %v193_v34 = vsub.f32 %v4835_v48, %v7710_v62  ;;  %v4911_v37 = vsub.f32 %v82_v52, %v4865_v61 }
  0x21   :  { %254 = vmatpush.msra.mxu2 %v4769_v21  ;;  %304 = vmatpush.msra.mxu3 %v4757_v17  ;;  %v4900_v31 = vsub.f32 %v451_v55, %v4880_v6  ;;  %v4913_v38 = vand.u32 4294901760, %v449_v7  ;;  %v182_v42 = vand.u32 4294901760, %v181_v0  ;;  %v4920_v43 = vsub.f32 %v81_v54, %v4878_v2 }
  0x22   :  { %110 = vmatpush.msra.mxu0 %v4776_v25  ;;  %159 = vmatpush.msra.mxu1 %v158_v49  ;;  %7775 = vst [vmem:[#allocation6_spill] sm:$0xff] %v4896_v26  ;;  %v4922_v44 = vand.u32 4294901760, %v79_v12  ;;  %v7712_v47 = vand.u32 4294901760, %v4876_v1  ;;  %v188_v49 = vand.u32 4294901760, %v187_v8  ;;  %v4928_v52 = vsub.f32 %v450_v59, %v4893_v13 }
  0x23   :  { %257 = vmatpush.msra.mxu2 %v4784_v28  ;;  %306 = vmatpush.msra.mxu3 %v4776_v25  ;;  %v4930_v55 = vand.u32 4294901760, %v448_v32  ;;  %v199_v54 = vsub.f32 %v4858_v58, %v7709_v30  ;;  %v4940_v57 = vsub.f32 %v80_v63, %v4896_v26  ;;  %v4943_v59 = vand.u32 4294901760, %v447_v39 }
  0x24   :  { %112 = vmatpush.msra.mxu0 %v4786_v29  ;;  %165 = vmatpush.msra.mxu1 %v164_v56  ;;  %7776 = vst [vmem:[#allocation7_spill] sm:$0xff] %v4922_v44  ;;  %v446_v56 = vld [vmem:[%s7773_s2 + $0x50] sm:$0xff]  ;;  %v194_v0 = vand.u32 4294901760, %v193_v34  ;;  %v7719_v8 = vand.u32 4294901760, %v4911_v37  ;;  %v205_v63 = vsub.f32 %v4876_v1, %v7712_v47  ;;  %v4956_v30 = vsub.f32 %v79_v12, %v4922_v44  ;;  %v445_v34 = vld [vmem:[%s7773_s2 + $0x48] sm:$0xff] }
  0x25   :  { %260 = vmatpush.msra.mxu2 %v4813_v40  ;;  %308 = vmatpush.msra.mxu3 %v4786_v29  ;;  %7777 = vst [vmem:[#allocation8_spill] sm:$0xff] %v4928_v52  ;;  %v7720_v62 = vand.u32 4294901760, %v4920_v43  ;;  %v4959_v53 = vand.u32 4294901760, %v446_v56  ;;  %v200_v12 = vand.u32 4294901760, %v199_v54  ;;  %v7725_v51 = vand.u32 4294901760, %v4940_v57 }
  0x26   :  { %114 = vmatpush.msra.mxu0 %v4804_v35  ;;  %171 = vmatpush.msra.mxu1 %v170_v60  ;;  %v7716_v60 = vand.u32 4294901760, %v4900_v31  ;;  %v4976_v46 = vsub.f32 %v447_v39, %v4943_v59  ;;  %v4987_v54 = vand.u32 4294901760, %v445_v34  ;;  %v206_v39 = vand.u32 4294901760, %v205_v63 }
  0x27   :  { %263 = vmatpush.msra.mxu2 %v4817_v41  ;;  %310 = vmatpush.msra.mxu3 %v4804_v35  ;;  %v7730_v33 = vand.u32 4294901760, %v4956_v30  ;;  %v4995_v27 = vsub.f32 %v446_v56, %v4959_v53  ;;  %v223_v24 = vsub.f32 %v4940_v57, %v7725_v51 }
  0x28   :  { %116 = vmatpush.msra.mxu0 %v4826_v45  ;;  %177 = vmatpush.msra.mxu1 %v176_v18  ;;  %v4949_v18 = vsub.f32 %v449_v7, %v4913_v38  ;;  %v7724_v7 = vand.u32 4294901760, %v4928_v52  ;;  %v496_v47 = vsub.f32 %v4900_v31, %v7716_v60  ;;  %v217_v60 = vsub.f32 %v4920_v43, %v7720_v62 }
  0x29   :  { %266 = vmatpush.msra.mxu2 %v4835_v48  ;;  %312 = vmatpush.msra.mxu3 %v4826_v45  ;;  %v5006_v62 = vand.u32 4294901760, %v444_v36  ;;  %v229_v23 = vsub.f32 %v4956_v30, %v7730_v33  ;;  %v7780_v33 = vand.u32 4294901760, %v4749_v14 }
  0x2a   :  { %7778 = vst [vmem:[#allocation9_spill] sm:$0xff] %v4949_v18  ;;  %118 = vmatpush.msra.mxu0 %v4838_v50  ;;  %183 = vmatpush.msra.mxu1 %v182_v42  ;;  %v4968_v42 = vsub.f32 %v448_v32, %v4930_v55  ;;  %v211_v32 = vsub.f32 %v4911_v37, %v7719_v8  ;;  %v443_v8 = vld [vmem:[%s7773_s2 + $0x38] sm:$0xff]  ;;  %v497_v56 = vand.u32 4294901760, %v496_v47  ;;  %v218_v51 = vand.u32 4294901760, %v217_v60 }
  0x2b   :  { %269 = vmatpush.msra.mxu2 %v4858_v58  ;;  %314 = vmatpush.msra.mxu3 %v4838_v50  ;;  %v5022_v47 = vsub.f32 %v445_v34, %v4987_v54  ;;  %v5024_v63 = vand.u32 4294901760, %v443_v8  ;;  %v5040_v60 = vsub.f32 %v444_v36, %v5006_v62 }
  0x2c   :  { %120 = vmatpush.msra.mxu0 %v4865_v61  ;;  %189 = vmatpush.msra.mxu1 %v188_v49  ;;  %v7727_v49 = vand.u32 4294901760, %v4949_v18 }
  0x2d   :  { %272 = vmatpush.msra.mxu2 %v4876_v1  ;;  %316 = vmatpush.msra.mxu3 %v4865_v61 }
  0x2e   :  { %122 = vmatpush.msra.mxu0 %v4878_v2  ;;  %195 = vmatpush.msra.mxu1 %v194_v0  ;;  %v502_v0 = vsub.f32 %v4928_v52, %v7724_v7  ;;  %v212_v7 = vand.u32 4294901760, %v211_v32  ;;  %v441_v32 = vld [vmem:[%s7773_s2 + $0x28] sm:$0xff] }
  0x2f   :  { %275 = vmatpush.msra.mxu2 %v4911_v37  ;;  %318 = vmatpush.msra.mxu3 %v4878_v2  ;;  %v7781_v2 = vand.u32 4294901760, %v4976_v46  ;;  %v5057_v14 = vand.u32 4294901760, %v441_v32 }
  0x30   :  { %124 = vmatpush.msra.mxu0 %v4896_v26  ;;  %201 = vmatpush.msra.mxu1 %v200_v12  ;;  %v508_v12 = vsub.f32 %v4949_v18, %v7727_v49  ;;  %v503_v34 = vand.u32 4294901760, %v502_v0  ;;  %v7779_v49 = vand.u32 4294901760, %v4968_v42  ;;  %v5042_v18 = vand.u32 4294901760, %v442_v22  ;;  %v440_v0 = vld [vmem:[%s7773_s2 + $0x20] sm:$0xff] }
  0x31   :  { %278 = vmatpush.msra.mxu2 %v4920_v43  ;;  %320 = vmatpush.msra.mxu3 %v4896_v26  ;;  %v224_v26 = vand.u32 4294901760, %v223_v24  ;;  %v520_v52 = vsub.f32 %v4976_v46, %v7781_v2  ;;  %v7782_v24 = vand.u32 4294901760, %v4752_v15  ;;  %v7783_v2 = vand.u32 4294901760, %v4995_v27 }
  0x32   :  { %126 = vmatpush.msra.mxu0 %v4922_v44  ;;  %207 = vmatpush.msra.mxu1 %v206_v39  ;;  %v514_v39 = vsub.f32 %v4968_v42, %v7779_v49  ;;  %v509_v36 = vand.u32 4294901760, %v508_v12  ;;  %v7735_v12 = vand.u32 4294901760, %v5040_v60  ;;  %v5070_v49 = vsub.f32 %v442_v22, %v5042_v18 }
  0x33   :  { %281 = vmatpush.msra.mxu2 %v4940_v57  ;;  %322 = vmatpush.msra.mxu3 %v4922_v44  ;;  %v5055_v44 = vsub.f32 %v443_v8, %v5024_v63  ;;  %v5072_v15 = vand.u32 4294901760, %v440_v0 }
  0x34   :  { %333 = vmatpush.msrb.mxu0 %v7780_v33  ;;  %213 = vmatpush.msra.mxu1 %v212_v7  ;;  %v230_v33 = vand.u32 4294901760, %v229_v23  ;;  %v526_v7 = vsub.f32 %v4995_v27, %v7783_v2  ;;  %v515_v8 = vand.u32 4294901760, %v514_v39  ;;  %v7784_v23 = vand.u32 4294901760, %v4755_v16  ;;  %v438_v2 = vld [vmem:[%s7773_s2 + $0x10] sm:$0xff] }
  0x35   :  { %498 = vmatpush.msrb.mxu3 %v497_v56  ;;  %284 = vmatpush.msra.mxu2 %v4956_v30  ;;  %v439_v56 = vld [vmem:[%s7773_s2 + $0x18] sm:$0xff]  ;;  %v7736_v22 = vand.u32 4294901760, %v5055_v44  ;;  %v5085_v39 = vsub.f32 %v441_v32, %v5057_v14  ;;  %v5099_v32 = vand.u32 4294901760, %v438_v2 }
  0x36   :  { %337 = vmatpush.msrb.mxu0 %v7782_v24  ;;  %219 = vmatpush.msra.mxu1 %v218_v51  ;;  %v521_v24 = vand.u32 4294901760, %v520_v52  ;;  %v7785_v51 = vand.u32 4294901760, %v5022_v47  ;;  %v5087_v16 = vand.u32 4294901760, %v439_v56  ;;  %v527_v52 = vand.u32 4294901760, %v526_v7  ;;  %v437_v7 = vld [vmem:[%s7773_s2 + $0x8] sm:$0xff] }
  0x37   :  { %453 = vmatpush.msrb.mxu2 %v4880_v6  ;;  %504 = vmatpush.msrb.mxu3 %v503_v34 }
  0x38   :  { %341 = vmatpush.msrb.mxu0 %v7784_v23  ;;  %225 = vmatpush.msra.mxu1 %v224_v26  ;;  %v532_v34 = vsub.f32 %v5022_v47, %v7785_v51  ;;  %v7786_v23 = vand.u32 4294901760, %v4763_v19  ;;  %v538_v26 = vsub.f32 %v5040_v60, %v7735_v12  ;;  %v5097_v51 = vsub.f32 %v440_v0, %v5072_v15  ;;  %v78_v19 = vld [vmem:[%s7787_s27] sm:$0x3]  ;;  %s6617_s27 = sld [smem:[#allocation2 + $0x9]] }
  0x39   :  { %455 = vmatpush.msrb.mxu2 %v4893_v13  ;;  %510 = vmatpush.msrb.mxu3 %v509_v36  ;;  %v5116_v12 = vsub.f32 %v439_v56, %v5087_v16  ;;  %v7789_v36 = vand.u32 4294901760, %v4769_v21  ;;  %v7791_v56 = vand.u32 4294901760, %v5070_v49 }
  0x3a   :  { %345 = vmatpush.msrb.mxu0 %v7786_v23  ;;  %231 = vmatpush.msra.mxu1 %v230_v33  ;;  %v7788_v33 = vand.u32 4294901760, %v4766_v20  ;;  %v533_v0 = vand.u32 4294901760, %v532_v34  ;;  %v555_v23 = vand.u32 4294901760, %v5085_v39  ;;  %v5121_v20 = vand.u32 4294901760, %v78_v19 }
  0x3b   :  { %457 = vmatpush.msrb.mxu2 %v4913_v38  ;;  %516 = vmatpush.msrb.mxu3 %v515_v8  ;;  %v544_v8 = vsub.f32 %v5055_v44, %v7736_v22  ;;  %v539_v34 = vand.u32 4294901760, %v538_v26  ;;  %v561_v21 = vand.u32 4294901760, %v5097_v51  ;;  %v567_v26 = vand.u32 4294901760, %v5116_v12 }
  0x3c   :  { %349 = vmatpush.msrb.mxu0 %v7788_v33  ;;  %400 = vmatpush.msrb.mxu1 %v4719_v3  ;;  %7790 = vst [vmem:[#allocation10_spill] sm:$0xff] %v5121_v20  ;;  %v5123_v3 = vand.u32 4294901760, %v437_v7  ;;  %v550_v33 = vsub.f32 %v5070_v49, %v7791_v56 }
  0x3d   :  { %459 = vmatpush.msrb.mxu2 %v4930_v55  ;;  %522 = vmatpush.msrb.mxu3 %v521_v24  ;;  %v436_v24 = vld [vmem:[%s7773_s2] sm:$0xff]  ;;  %v545_v22 = vand.u32 4294901760, %v544_v8  ;;  %v562_v8 = vsub.f32 %v5097_v51, %v561_v21 }
  0x3e   :  { %353 = vmatpush.msrb.mxu0 %v7789_v36  ;;  %402 = vmatpush.msrb.mxu1 %v4721_v4  ;;  %v5134_v4 = vsub.f32 %v438_v2, %v5099_v32  ;;  %v7792_v36 = vand.u32 4294901760, %v4784_v28  ;;  %v5144_v56 = vand.u32 4294901760, %v436_v24  ;;  %v7793_v2 = vand.u32 4294901760, %v4813_v40 }
  0x3f   :  { %461 = vmatpush.msrb.mxu2 %v4943_v59  ;;  %528 = vmatpush.msrb.mxu3 %v527_v52  ;;  %v556_v52 = vsub.f32 %v5085_v39, %v555_v23  ;;  %v5150_v28 = vsub.f32 %v78_v19, %v5121_v20  ;;  %v7795_v40 = vand.u32 4294901760, %v4817_v41  ;;  %v568_v19 = vsub.f32 %v5116_v12, %v567_v26 }
  0x40   :  { %357 = vmatpush.msrb.mxu0 %v7792_v36  ;;  %404 = vmatpush.msrb.mxu1 %v4723_v5  ;;  %v5153_v5 = vsub.f32 %v437_v7, %v5123_v3  ;;  %v573_v36 = vand.u32 4294901760, %v5134_v4  ;;  %v5168_v7 = vsub.f32 %v436_v24, %v5144_v56  ;;  %v7797_v24 = vand.u32 4294901760, %v4858_v58 }
  0x41   :  { %463 = vmatpush.msrb.mxu2 %v4959_v53  ;;  %534 = vmatpush.msrb.mxu3 %v533_v0  ;;  %7794 = vst [vmem:[#allocation11_spill] sm:$0xff] %v5150_v28  ;;  %v551_v0 = vand.u32 4294901760, %v550_v33 }
  0x42   :  { %361 = vmatpush.msrb.mxu0 %v7793_v2  ;;  %406 = vmatpush.msrb.mxu1 %v4734_v9  ;;  %v557_v9 = vand.u32 4294901760, %v556_v52  ;;  %v579_v41 = vand.u32 4294901760, %v5153_v5  ;;  %v574_v33 = vsub.f32 %v5134_v4, %v573_v36  ;;  %v7798_v52 = vand.u32 4294901760, %v4876_v1 }
  0x43   :  { %465 = vmatpush.msrb.mxu2 %v4987_v54  ;;  %540 = vmatpush.msrb.mxu3 %v539_v34  ;;  %v7796_v34 = vand.u32 4294901760, %v4835_v48  ;;  %v585_v48 = vand.u32 4294901760, %v5168_v7  ;;  %v7800_v1 = vand.u32 4294901760, %v4920_v43  ;;  %v7806_v43 = vld [vmem:[#allocation9_spill] sm:$0xff] }
  0x44   :  { %365 = vmatpush.msrb.mxu0 %v7795_v40  ;;  %408 = vmatpush.msrb.mxu1 %v4736_v10  ;;  %v5175_v10 = vand.u32 4294901760, %v5150_v28  ;;  %v580_v2 = vsub.f32 %v5153_v5, %v579_v41 }
  0x45   :  { %467 = vmatpush.msrb.mxu2 %v5006_v62  ;;  %546 = vmatpush.msrb.mxu3 %v545_v22  ;;  %v563_v22 = vand.u32 4294901760, %v562_v8 }
  0x46   :  { %369 = vmatpush.msrb.mxu0 %v7796_v34  ;;  %410 = vmatpush.msrb.mxu1 %v4738_v11  ;;  %v569_v11 = vand.u32 4294901760, %v568_v19  ;;  %v130_v58 = vsub.f32 %v5150_v28, %v5175_v10  ;;  %v581_v8 = vand.u32 4294901760, %v580_v2  ;;  %v7811_v19 = vand.u32 4294901760, %v4968_v42 }
  0x47   :  { %469 = vmatpush.msrb.mxu2 %v5024_v63  ;;  %552 = vmatpush.msrb.mxu3 %v551_v0  ;;  %v7799_v0 = vand.u32 4294901760, %v4911_v37  ;;  %v7812_v34 = vand.u32 4294901760, %v4976_v46 }
  0x48   :  { %373 = vmatpush.msrb.mxu0 %v7797_v24  ;;  %412 = vmatpush.msrb.mxu1 %v4757_v17  ;;  %v575_v17 = vand.u32 4294901760, %v574_v33  ;;  %v5205_v40 = vand.u32 4294901760, %v130_v58  ;;  %v799_v24 = vld [vmem:[%s7818_s0 + $0x30] sm:$0xff] }
  0x49   :  { %471 = vmatpush.msrb.mxu2 %v5042_v18  ;;  %558 = vmatpush.msrb.mxu3 %v557_v9  ;;  %v7808_v9 = vld [vmem:[#allocation6_spill] sm:$0xff] }
  0x4a   :  { %377 = vmatpush.msrb.mxu0 %v7798_v52  ;;  %414 = vmatpush.msrb.mxu1 %v4776_v25  ;;  %v586_v25 = vsub.f32 %v5168_v7, %v585_v48 }
  0x4b   :  { %473 = vmatpush.msrb.mxu2 %v5057_v14  ;;  %564 = vmatpush.msrb.mxu3 %v563_v22 }
  0x4c   :  { %381 = vmatpush.msrb.mxu0 %v7799_v0  ;;  %416 = vmatpush.msrb.mxu1 %v4786_v29  ;;  %v7801_v29 = vand.u32 4294901760, %v4940_v57  ;;  %v587_v37 = vand.u32 4294901760, %v586_v25 }
  0x4d   :  { %475 = vmatpush.msrb.mxu2 %v5072_v15  ;;  %570 = vmatpush.msrb.mxu3 %v569_v11 }
  0x4e   :  { %385 = vmatpush.msrb.mxu0 %v7800_v1  ;;  %418 = vmatpush.msrb.mxu1 %v4804_v35  ;;  %v7802_v35 = vand.u32 4294901760, %v4956_v30  ;;  %v7804_v30 = vand.u32 4294901760, %v4900_v31 }
  0x4f   :  { %477 = vmatpush.msrb.mxu2 %v5087_v16  ;;  %576 = vmatpush.msrb.mxu3 %v575_v17  ;;  %v798_v17 = vld [vmem:[%s7818_s0 + $0x28] sm:$0xff] }
  0x50   :  { %287 = vmatmul.f32.vlgmr.msra.gmra.mxu2 %v5150_v28  ;;  %389 = vmatpush.msrb.mxu0 %v7801_v29 }
  0x51   :  { %420 = vmatpush.msrb.mxu1 %v4826_v45  ;;  %479 = vmatpush.msrb.mxu2 %v5099_v32  ;;  %v7803_v45 = vld [vmem:[#allocation8_spill] sm:$0xff] }
  0x52   :  { %582 = vmatpush.msrb.mxu3 %v581_v8  ;;  %132 = vmatmul.f32.vlgmr.msra.gmra.mxu0 %v5205_v40  ;;  %v7807_v57 = vand.u32 4294901760, %v7803_v45 }
  0x53   :  { %326 = vmatmul.f32.vlgmr.msra.gmra.mxu3 %v5175_v10  ;;  %393 = vmatpush.msrb.mxu0 %v7802_v35 }
  0x54   :  { %422 = vmatpush.msrb.mxu1 %v4838_v50  ;;  %481 = vmatpush.msrb.mxu2 %v5123_v3  ;;  %v7805_v50 = vld [vmem:[#allocation5_spill] sm:$0xff] }
  0x55   :  { %588 = vmatpush.msrb.mxu3 %v587_v37  ;;  %233 = vmatmul.f32.vlgmr.msra.gmra.mxu1 %v5121_v20 }
  0x56   :  { %596 = vmatpush.msra.mxu0 %v4900_v31  ;;  %424 = vmatpush.msrb.mxu1 %v4865_v61  ;;  %v7809_v61 = vand.u32 4294901760, %v7806_v43  ;;  %v7810_v31 = vld [vmem:[#allocation7_spill] sm:$0xff] }
  0x57   :  { %757 = vmatpush.msra.mxu3 %v4880_v6  ;;  %483 = vmatpush.msrb.mxu2 %v5144_v56 }
  0x58   :  { %599 = vmatpush.msra.mxu0 %v7803_v45  ;;  %426 = vmatpush.msrb.mxu1 %v7805_v50  ;;  %v5431_v45 = vand.u32 4294901760, %v798_v17  ;;  %v1165_v50 = vld [vmem:[%s7819_s28 + $0x78] sm:$0xff] }
  0x59   :  { %690 = vmatpush.msra.mxu2 %v7804_v30  ;;  %759 = vmatpush.msra.mxu3 %v4893_v13 }
  0x5a   :  { %602 = vmatpush.msra.mxu0 %v7806_v43  ;;  %428 = vmatpush.msrb.mxu1 %v7808_v9 }
  0x5b   :  { %694 = vmatpush.msra.mxu2 %v7807_v57  ;;  %761 = vmatpush.msra.mxu3 %v4913_v38  ;;  %v796_v57 = vld [vmem:[%s7818_s0 + $0x18] sm:$0xff] }
  0x5c   :  { %395 = vmatmul.f32.vlgmr.msrb.gmra.mxu0 %v5121_v20  ;;  %430 = vmatpush.msrb.mxu1 %v7810_v31 }
  0x5d   :  { %698 = vmatpush.msra.mxu2 %v7809_v61  ;;  %605 = vmatpush.msra.mxu0 %v4968_v42  ;;  %v7813_v42 = vand.u32 4294901760, %v4995_v27 }
  0x5e   :  { %763 = vmatpush.msra.mxu3 %v4930_v55  ;;  %432 = vmatmul.f32.vlgmr.msrb.gmra.mxu1 %v5121_v20 }
  0x5f   :  { %702 = vmatpush.msra.mxu2 %v7811_v19  ;;  %608 = vmatpush.msra.mxu0 %v4976_v46  ;;  %v7815_v46 = vand.u32 4294901760, %v5040_v60 }
  0x60   :  { %649 = vmatpush.msra.mxu1 %v4880_v6  ;;  %765 = vmatpush.msra.mxu3 %v4943_v59  ;;  %v7814_v6 = vand.u32 4294901760, %v5022_v47 }
  0x61   :  { %611 = vmatpush.msra.mxu0 %v4995_v27  ;;  %706 = vmatpush.msra.mxu2 %v7812_v34  ;;  %v7816_v27 = vand.u32 4294901760, %v5055_v44  ;;  %v1164_v34 = vld [vmem:[%s7819_s28 + $0x70] sm:$0xff] }
  0x62   :  { %651 = vmatpush.msra.mxu1 %v4893_v13  ;;  %767 = vmatpush.msra.mxu3 %v4959_v53  ;;  %v7817_v13 = vand.u32 4294901760, %v5070_v49 }
  0x63   :  { %614 = vmatpush.msra.mxu0 %v5022_v47  ;;  %710 = vmatpush.msra.mxu2 %v7813_v42 }
  0x64   :  { %653 = vmatpush.msra.mxu1 %v4913_v38  ;;  %769 = vmatpush.msra.mxu3 %v4987_v54  ;;  %v808_v38 = vld [vmem:[%s7818_s0 + $0x78] sm:$0xff] }
  0x65   :  { %617 = vmatpush.msra.mxu0 %v5040_v60  ;;  %714 = vmatpush.msra.mxu2 %v7814_v6  ;;  %v795_v6 = vld [vmem:[%s7818_s0 + $0x10] sm:$0xff] }
  0x66   :  { %655 = vmatpush.msra.mxu1 %v4930_v55  ;;  %771 = vmatpush.msra.mxu3 %v5006_v62 }
  0x67   :  { %620 = vmatpush.msra.mxu0 %v5055_v44  ;;  %718 = vmatpush.msra.mxu2 %v7815_v46  ;;  %v5290_v44 = vand.u32 4294901760, %v808_v38  ;;  %v5461_v46 = vand.u32 4294901760, %v1165_v50 }
  0x68   :  { %657 = vmatpush.msra.mxu1 %v4943_v59  ;;  %773 = vmatpush.msra.mxu3 %v5024_v63  ;;  %v805_v59 = vld [vmem:[%s7818_s0 + $0x60] sm:$0xff] }
  0x69   :  { %623 = vmatpush.msra.mxu0 %v5070_v49  ;;  %722 = vmatpush.msra.mxu2 %v7816_v27  ;;  %v5325_v60 = vand.u32 4294901760, %v805_v59  ;;  %v803_v49 = vld [vmem:[%s7818_s0 + $0x50] sm:$0xff] }
  0x6a   :  { %659 = vmatpush.msra.mxu1 %v4959_v53  ;;  %775 = vmatpush.msra.mxu3 %v5042_v18  ;;  %v807_v53 = vld [vmem:[%s7818_s0 + $0x70] sm:$0xff] }
  0x6b   :  { %626 = vmatpush.msra.mxu0 %v5085_v39  ;;  %726 = vmatpush.msra.mxu2 %v7817_v13  ;;  %v5300_v55 = vand.u32 4294901760, %v807_v53 }
  0x6c   :  { %661 = vmatpush.msra.mxu1 %v4987_v54  ;;  %777 = vmatpush.msra.mxu3 %v5057_v14  ;;  %v5310_v54 = vsub.f32 %v808_v38, %v5290_v44  ;;  %v5468_v38 = vsub.f32 %v798_v17, %v5431_v45  ;;  %v5506_v17 = vsub.f32 %v1165_v50, %v5461_v46 }
  0x6d   :  { %629 = vmatpush.msra.mxu0 %v5097_v51  ;;  %730 = vmatpush.msra.mxu2 %v555_v23  ;;  %v5323_v47 = vsub.f32 %v807_v53, %v5300_v55  ;;  %v5350_v51 = vsub.f32 %v805_v59, %v5325_v60  ;;  %v5352_v23 = vand.u32 4294901760, %v803_v49  ;;  %v5470_v53 = vand.u32 4294901760, %v796_v57 }
  0x6e   :  { %663 = vmatpush.msra.mxu1 %v5006_v62  ;;  %779 = vmatpush.msra.mxu3 %v5072_v15  ;;  %v806_v62 = vld [vmem:[%s7818_s0 + $0x68] sm:$0xff]  ;;  %v7748_v39 = vand.u32 4294901760, %v5310_v54 }
  0x6f   :  { %632 = vmatpush.msra.mxu0 %v5116_v12  ;;  %734 = vmatpush.msra.mxu2 %v561_v21  ;;  %v7747_v21 = vand.u32 4294901760, %v5323_v47  ;;  %v7744_v33 = vand.u32 4294901760, %v5350_v51  ;;  %7820 = vst [vmem:[#allocation8_spill] sm:$0xff] %v5470_v53 }
  0x70   :  { %665 = vmatpush.msra.mxu1 %v5024_v63  ;;  %781 = vmatpush.msra.mxu3 %v5087_v16  ;;  %v5312_v63 = vand.u32 4294901760, %v806_v62 }
  0x71   :  { %635 = vmatpush.msra.mxu0 %v5134_v4  ;;  %738 = vmatpush.msra.mxu2 %v567_v26  ;;  %v801_v4 = vld [vmem:[%s7818_s0 + $0x40] sm:$0xff]  ;;  %v871_v25 = vsub.f32 %v5350_v51, %v7744_v33 }
  0x72   :  { %667 = vmatpush.msra.mxu1 %v5042_v18  ;;  %783 = vmatpush.msra.mxu3 %v5099_v32  ;;  %v804_v18 = vld [vmem:[%s7818_s0 + $0x58] sm:$0xff]  ;;  %v5384_v22 = vand.u32 4294901760, %v801_v4 }
  0x73   :  { %489 = vmatmul.f32.vlgmr.msrb.gmra.mxu2 %v5205_v40  ;;  %638 = vmatpush.msra.mxu0 %v5153_v5  ;;  %v5338_v12 = vand.u32 4294901760, %v804_v18  ;;  %v872_v9 = vand.u32 4294901760, %v871_v25  ;;  %v5510_v25 = vsub.f32 %v796_v57, %v5470_v53  ;;  %v1161_v57 = vld [vmem:[%s7819_s28 + $0x58] sm:$0xff] }
  0x74   :  { %669 = vmatpush.msra.mxu1 %v5057_v14  ;;  %742 = vmatpush.msra.mxu2 %v573_v36  ;;  %v5336_v14 = vsub.f32 %v806_v62, %v5312_v63  ;;  %v5416_v1 = vsub.f32 %v801_v4, %v5384_v22  ;;  %v794_v62 = vld [vmem:[%s7818_s0 + $0x8] sm:$0xff] }
  0x75   :  { %785 = vmatpush.msra.mxu3 %v5123_v3  ;;  %641 = vmatpush.msra.mxu0 %v5168_v7  ;;  %v5366_v26 = vsub.f32 %v804_v18, %v5338_v12  ;;  %v800_v7 = vld [vmem:[%s7818_s0 + $0x38] sm:$0xff]  ;;  %v5478_v18 = vand.u32 4294901760, %v1164_v34 }
  0x76   :  { %590 = vmatmul.f32.vlgmr.msrb.gmra.mxu3 %v5121_v20  ;;  %671 = vmatpush.msra.mxu1 %v5072_v15  ;;  %v802_v15 = vld [vmem:[%s7818_s0 + $0x48] sm:$0xff]  ;;  %v7745_v36 = vand.u32 4294901760, %v5336_v14  ;;  %v5392_v11 = vand.u32 4294901760, %v800_v7  ;;  %v7739_v19 = vand.u32 4294901760, %v5416_v1 }
  0x77   :  { %746 = vmatpush.msra.mxu2 %v579_v41  ;;  %787 = vmatpush.msra.mxu3 %v5144_v56  ;;  %v5368_v5 = vand.u32 4294901760, %v802_v15  ;;  %v5382_v41 = vsub.f32 %v803_v49, %v5352_v23  ;;  %v7743_v58 = vand.u32 4294901760, %v5366_v26  ;;  %v1163_v49 = vld [vmem:[%s7819_s28 + $0x68] sm:$0xff]  ;;  %v5521_v50 = vsub.f32 %v1164_v34, %v5478_v18 }
  0x78   :  { %810 = vmatpush.msrb.mxu0 %v5290_v44  ;;  %673 = vmatpush.msra.mxu1 %v5087_v16  ;;  %v853_v16 = vsub.f32 %v5310_v54, %v7748_v39  ;;  %v865_v52 = vsub.f32 %v5336_v14, %v7745_v36  ;;  %v5422_v29 = vsub.f32 %v800_v7, %v5392_v11  ;;  %v5490_v7 = vand.u32 4294901760, %v795_v6 }
  0x79   :  { %1006 = vmatpush.msrb.mxu3 %v5290_v44  ;;  %750 = vmatpush.msra.mxu2 %v585_v48  ;;  %v5400_v2 = vsub.f32 %v802_v15, %v5368_v5  ;;  %v7741_v8 = vand.u32 4294901760, %v5382_v41  ;;  %v877_v35 = vsub.f32 %v5366_v26, %v7743_v58  ;;  %v895_v4 = vsub.f32 %v5416_v1, %v7739_v19 }
  0x7a   :  { %812 = vmatpush.msrb.mxu0 %v5300_v55  ;;  %675 = vmatpush.msra.mxu1 %v5099_v32  ;;  %v859_v32 = vsub.f32 %v5323_v47, %v7747_v21  ;;  %v854_v48 = vand.u32 4294901760, %v853_v16  ;;  %v866_v37 = vand.u32 4294901760, %v865_v52  ;;  %v7738_v42 = vand.u32 4294901760, %v5422_v29  ;;  %7821 = vst [vmem:[#allocation5_spill] sm:$0xff] %v5490_v7  ;;  %v793_v52 = vld [vmem:[%s7818_s0] sm:$0xff] }
  0x7b   :  { %953 = vmatpush.msrb.mxu2 %v5310_v54  ;;  %1008 = vmatpush.msrb.mxu3 %v5300_v55  ;;  %v7740_v30 = vand.u32 4294901760, %v5400_v2  ;;  %v883_v61 = vsub.f32 %v5382_v41, %v7741_v8  ;;  %v878_v27 = vand.u32 4294901760, %v877_v35  ;;  %7823 = vst [vmem:[#allocation6_spill] sm:$0xff] %v5521_v50  ;;  %v7750_v19 = vand.u32 4294901760, %v5510_v25 }
  0x7c   :  { %752 = vmatmul.f32.vlgmr.msra.gmra.mxu2 %v5121_v20  ;;  %814 = vmatpush.msrb.mxu0 %v5312_v63  ;;  %v860_v0 = vand.u32 4294901760, %v859_v32  ;;  %v1162_v32 = vld [vmem:[%s7819_s28 + $0x60] sm:$0xff]  ;;  %v7753_v8 = vand.u32 4294901760, %v5521_v50 }
  0x7d   :  { %956 = vmatpush.msrb.mxu2 %v5323_v47  ;;  %1010 = vmatpush.msrb.mxu3 %v5312_v63  ;;  %v889_v13 = vsub.f32 %v5400_v2, %v7740_v30  ;;  %v884_v15 = vand.u32 4294901760, %v883_v61  ;;  %v896_v61 = vand.u32 4294901760, %v895_v4  ;;  %v1160_v4 = vld [vmem:[%s7819_s28 + $0x50] sm:$0xff]  ;;  %v1159_v30 = vld [vmem:[%s7819_s28 + $0x48] sm:$0xff]  ;;  %v925_v21 = vsub.f32 %v5510_v25, %v7750_v19  ;;  %v1157_v19 = vld [vmem:[%s7819_s28 + $0x38] sm:$0xff] }
  0x7e   :  { %677 = vmatpush.msra.mxu1 %v5123_v3  ;;  %644 = vmatmul.f32.vlgmr.msra.gmra.mxu0 %v5150_v28  ;;  %v5405_v3 = vand.u32 4294901760, %v799_v24  ;;  %v5571_v36 = vand.u32 4294901760, %v1160_v4  ;;  %v5627_v28 = vand.u32 4294901760, %v1157_v19 }
  0x7f   :  { %789 = vmatmul.f32.vlgmr.msra.gmra.mxu3 %v5121_v20  ;;  %816 = vmatpush.msrb.mxu0 %v5325_v60 }
  0x80   :  { %959 = vmatpush.msrb.mxu2 %v5336_v14  ;;  %1012 = vmatpush.msrb.mxu3 %v5325_v60  ;;  %v5440_v43 = vsub.f32 %v799_v24, %v5405_v3  ;;  %v901_v24 = vsub.f32 %v5422_v29, %v7738_v42 }
  0x81   :  { %679 = vmatpush.msra.mxu1 %v5144_v56  ;;  %818 = vmatpush.msrb.mxu0 %v5338_v12  ;;  %v797_v56 = vld [vmem:[%s7818_s0 + $0x20] sm:$0xff]  ;;  %s6621_s0 = sld [smem:[#allocation2 + $0xa]] }
  0x82   :  { %683 = vmatmul.f32.vlgmr.msra.gmra.mxu1 %v5175_v10  ;;  %962 = vmatpush.msrb.mxu2 %v5350_v51  ;;  %v5449_v31 = vand.u32 4294901760, %v797_v56  ;;  %v7737_v59 = vand.u32 4294901760, %v5440_v43  ;;  %v902_v34 = vand.u32 4294901760, %v901_v24 }
  0x83   :  { %855 = vmatpush.msrb.mxu1 %v854_v48  ;;  %1014 = vmatpush.msrb.mxu3 %v5338_v12  ;;  %v5500_v48 = vand.u32 4294901760, %v794_v62 }
  0x84   :  { %820 = vmatpush.msrb.mxu0 %v5352_v23  ;;  %965 = vmatpush.msrb.mxu2 %v5366_v26  ;;  %v5488_v16 = vsub.f32 %v797_v56, %v5449_v31  ;;  %v7742_v56 = vand.u32 4294901760, %v5468_v38  ;;  %v907_v35 = vsub.f32 %v5440_v43, %v7737_v59 }
  0x85   :  { %861 = vmatpush.msrb.mxu1 %v860_v0  ;;  %1016 = vmatpush.msrb.mxu3 %v5352_v23  ;;  %7822 = vst [vmem:[#allocation9_spill] sm:$0xff] %v5500_v48  ;;  %v890_v0 = vand.u32 4294901760, %v889_v13  ;;  %v5532_v13 = vand.u32 4294901760, %v793_v52  ;;  %v5538_v42 = vsub.f32 %v794_v62, %v5500_v48  ;;  %v5552_v62 = vand.u32 4294901760, %v1161_v57 }
  0x86   :  { %822 = vmatpush.msrb.mxu0 %v5368_v5  ;;  %968 = vmatpush.msrb.mxu2 %v5382_v41  ;;  %v7746_v59 = vand.u32 4294901760, %v5488_v16 }
  0x87   :  { %867 = vmatpush.msrb.mxu1 %v866_v37  ;;  %1018 = vmatpush.msrb.mxu3 %v5368_v5  ;;  %v5513_v37 = vand.u32 4294901760, %v1163_v49  ;;  %7824 = vst [vmem:[#allocation7_spill] sm:$0xff] %v5532_v13  ;;  %v5568_v58 = vsub.f32 %v793_v52, %v5532_v13  ;;  %v5582_v52 = vand.u32 4294901760, %v1159_v30  ;;  %v5590_v33 = vsub.f32 %v1161_v57, %v5552_v62 }
  0x88   :  { %824 = vmatpush.msrb.mxu0 %v5384_v22  ;;  %971 = vmatpush.msrb.mxu2 %v5400_v2 }
  0x89   :  { %873 = vmatpush.msrb.mxu1 %v872_v9  ;;  %1020 = vmatpush.msrb.mxu3 %v5384_v22  ;;  %v5523_v9 = vand.u32 4294901760, %v1162_v32  ;;  %v5550_v24 = vsub.f32 %v1163_v49, %v5513_v37  ;;  %v919_v49 = vsub.f32 %v5488_v16, %v7746_v59 }
  0x8a   :  { %826 = vmatpush.msrb.mxu0 %v5392_v11  ;;  %974 = vmatpush.msrb.mxu2 %v5416_v1 }
  0x8b   :  { %879 = vmatpush.msrb.mxu1 %v878_v27  ;;  %1022 = vmatpush.msrb.mxu3 %v5392_v11  ;;  %v5530_v27 = vsub.f32 %v795_v6, %v5490_v7  ;;  %v913_v6 = vsub.f32 %v5468_v38, %v7742_v56  ;;  %7825 = vst [vmem:[#allocation12_spill] sm:$0xff] %v5550_v24  ;;  %v920_v57 = vand.u32 4294901760, %v919_v49  ;;  %v7829_v20 = vand.u32 4294901760, %v5550_v24 }
  0x8c   :  { %828 = vmatpush.msrb.mxu0 %v5405_v3  ;;  %977 = vmatpush.msrb.mxu2 %v5422_v29  ;;  %v5561_v56 = vsub.f32 %v1162_v32, %v5523_v9  ;;  %v5617_v49 = vsub.f32 %v1159_v30, %v5582_v52 }
  0x8d   :  { %885 = vmatpush.msrb.mxu1 %v884_v15  ;;  %1024 = vmatpush.msrb.mxu3 %v5405_v3  ;;  %v7749_v15 = vand.u32 4294901760, %v5506_v17  ;;  %v914_v59 = vand.u32 4294901760, %v913_v6  ;;  %v7827_v39 = vand.u32 4294901760, %v5530_v27 }
  0x8e   :  { %830 = vmatpush.msrb.mxu0 %v5431_v45  ;;  %980 = vmatpush.msrb.mxu2 %v5440_v43  ;;  %7826 = vst [vmem:[#allocation13_spill] sm:$0xff] %v5561_v56 }
  0x8f   :  { %891 = vmatpush.msrb.mxu1 %v890_v0  ;;  %1026 = vmatpush.msrb.mxu3 %v5431_v45  ;;  %v908_v0 = vand.u32 4294901760, %v907_v35  ;;  %v1158_v35 = vld [vmem:[%s7819_s28 + $0x40] sm:$0xff]  ;;  %v1210_v32 = vsub.f32 %v5506_v17, %v7749_v15 }
  0x90   :  { %832 = vmatpush.msrb.mxu0 %v5449_v31  ;;  %983 = vmatpush.msrb.mxu2 %v5468_v38  ;;  %v5598_v6 = vand.u32 4294901760, %v1158_v35 }
  0x91   :  { %897 = vmatpush.msrb.mxu1 %v896_v61  ;;  %1028 = vmatpush.msrb.mxu3 %v5449_v31  ;;  %v931_v61 = vsub.f32 %v5530_v27, %v7827_v39  ;;  %v1211_v15 = vand.u32 4294901760, %v1210_v32  ;;  %v1156_v39 = vld [vmem:[%s7819_s28 + $0x30] sm:$0xff]  ;;  %v7831_v32 = vand.u32 4294901760, %v5568_v58 }
  0x92   :  { %834 = vmatpush.msrb.mxu0 %v5470_v53  ;;  %986 = vmatpush.msrb.mxu2 %v5488_v16 }
  0x93   :  { %903 = vmatpush.msrb.mxu1 %v902_v34  ;;  %1030 = vmatpush.msrb.mxu3 %v5470_v53  ;;  %v1216_v34 = vsub.f32 %v5521_v50, %v7753_v8  ;;  %v5609_v8 = vsub.f32 %v1160_v4, %v5571_v36  ;;  %v7828_v50 = vand.u32 4294901760, %v5538_v42  ;;  %v926_v4 = vand.u32 4294901760, %v925_v21 }
  0x94   :  { %836 = vmatpush.msrb.mxu0 %v5490_v7  ;;  %989 = vmatpush.msrb.mxu2 %v5510_v25  ;;  %v932_v21 = vand.u32 4294901760, %v931_v61  ;;  %v5645_v53 = vand.u32 4294901760, %v1156_v39 }
  0x95   :  { %909 = vmatpush.msrb.mxu1 %v908_v0  ;;  %1032 = vmatpush.msrb.mxu3 %v5490_v7  ;;  %v937_v0 = vsub.f32 %v5538_v42, %v7828_v50  ;;  %v1222_v7 = vsub.f32 %v5550_v24, %v7829_v20  ;;  %v1217_v30 = vand.u32 4294901760, %v1216_v34  ;;  %v7830_v50 = vand.u32 4294901760, %v5561_v56  ;;  %v1155_v20 = vld [vmem:[%s7819_s28 + $0x28] sm:$0xff] }
  0x96   :  { %838 = vmatpush.msrb.mxu0 %v5500_v48  ;;  %992 = vmatpush.msrb.mxu2 %v5530_v27  ;;  %v943_v24 = vsub.f32 %v5568_v58, %v7831_v32  ;;  %v7833_v32 = vand.u32 4294901760, %v5590_v33 }
  0x97   :  { %915 = vmatpush.msrb.mxu1 %v914_v59  ;;  %1034 = vmatpush.msrb.mxu3 %v5500_v48  ;;  %v1228_v59 = vsub.f32 %v5561_v56, %v7830_v50  ;;  %v5635_v48 = vsub.f32 %v1158_v35, %v5598_v6  ;;  %v7832_v50 = vand.u32 4294901760, %v5310_v54  ;;  %v938_v35 = vand.u32 4294901760, %v937_v0 }
  0x98   :  { %840 = vmatpush.msrb.mxu0 %v5532_v13  ;;  %995 = vmatpush.msrb.mxu2 %v5538_v42  ;;  %v1223_v61 = vand.u32 4294901760, %v1222_v7  ;;  %v1234_v34 = vsub.f32 %v5590_v33, %v7833_v32  ;;  %v5660_v54 = vand.u32 4294901760, %v1155_v20  ;;  %v1153_v7 = vld [vmem:[%s7819_s28 + $0x18] sm:$0xff]  ;;  %v5673_v56 = vsub.f32 %v1156_v39, %v5645_v53  ;;  %v1150_v39 = vld [vmem:[%s7819_s28] sm:$0xff] }
  0x99   :  { %921 = vmatpush.msrb.mxu1 %v920_v57  ;;  %1036 = vmatpush.msrb.mxu3 %v5532_v13  ;;  %v1154_v57 = vld [vmem:[%s7819_s28 + $0x20] sm:$0xff]  ;;  %v5658_v13 = vsub.f32 %v1157_v19, %v5627_v28  ;;  %v1229_v0 = vand.u32 4294901760, %v1228_v59  ;;  %v7835_v19 = vand.u32 4294901760, %v5609_v8  ;;  %v7836_v59 = vand.u32 4294901760, %v5336_v14 }
  0x9a   :  { %1047 = vmatpush.msra.mxu0 %v7832_v50  ;;  %998 = vmatpush.msrb.mxu2 %v5568_v58  ;;  %v944_v50 = vand.u32 4294901760, %v943_v24  ;;  %v1152_v24 = vld [vmem:[%s7819_s28 + $0x10] sm:$0xff]  ;;  %v5690_v14 = vand.u32 4294901760, %v1153_v7 }
  0x9b   :  { %1212 = vmatpush.msra.mxu3 %v1211_v15  ;;  %927 = vmatpush.msrb.mxu1 %v926_v4  ;;  %v7834_v15 = vand.u32 4294901760, %v5323_v47  ;;  %v7766_v4 = vand.u32 4294901760, %v5635_v48  ;;  %v1240_v32 = vsub.f32 %v5609_v8, %v7835_v19  ;;  %v5675_v47 = vand.u32 4294901760, %v1154_v57 }
  0x9c   :  { %1167 = vmatpush.msra.mxu2 %v5461_v46  ;;  %v5688_v19 = vsub.f32 %v1155_v20, %v5660_v54  ;;  %v1263_v20 = vand.u32 4294901760, %v5673_v56  ;;  %846 = vmatmul.f32.vlgmr.msrb.gmra.mxu0 %v5205_v40 }
  0x9d   :  { %1051 = vmatpush.msra.mxu0 %v7834_v15  ;;  %1218 = vmatpush.msra.mxu3 %v1217_v30  ;;  %v7837_v15 = vand.u32 4294901760, %v5617_v49 }
  0x9e   :  { %933 = vmatpush.msrb.mxu1 %v932_v21  ;;  %1169 = vmatpush.msra.mxu2 %v5478_v18  ;;  %v1235_v21 = vand.u32 4294901760, %v1234_v34  ;;  %v1151_v34 = vld [vmem:[%s7819_s28 + $0x8] sm:$0xff]  ;;  %s6603_s28 = sld [smem:[#allocation2 + $0x3]] }
  0x9f   :  { %1055 = vmatpush.msra.mxu0 %v7836_v59  ;;  %v1246_v30 = vsub.f32 %v5617_v49, %v7837_v15  ;;  %1224 = vmatpush.msra.mxu3 %v1223_v61  ;;  %v7838_v59 = vand.u32 4294901760, %v5350_v51  ;;  %v1252_v15 = vsub.f32 %v5635_v48, %v7766_v4  ;;  %v5703_v61 = vsub.f32 %v1154_v57, %v5675_v47 }
  0xa0   :  { %939 = vmatpush.msrb.mxu1 %v938_v35  ;;  %1171 = vmatpush.msra.mxu2 %v5513_v37  ;;  %v1241_v35 = vand.u32 4294901760, %v1240_v32  ;;  %v5705_v51 = vand.u32 4294901760, %v1152_v24  ;;  %v5719_v32 = vsub.f32 %v1153_v7, %v5690_v14 }
  0xa1   :  { %1059 = vmatpush.msra.mxu0 %v7838_v59  ;;  %1230 = vmatpush.msra.mxu3 %v1229_v0  ;;  %v7839_v59 = vand.u32 4294901760, %v5366_v26  ;;  %v1247_v4 = vand.u32 4294901760, %v1246_v30  ;;  %v7840_v0 = vand.u32 4294901760, %v5658_v13  ;;  %v5721_v26 = vand.u32 4294901760, %v1151_v34 }
  0xa2   :  { %945 = vmatpush.msrb.mxu1 %v944_v50  ;;  %1173 = vmatpush.msra.mxu2 %v5523_v9  ;;  %v1269_v50 = vand.u32 4294901760, %v5688_v19  ;;  %v1253_v30 = vand.u32 4294901760, %v1252_v15  ;;  %v5732_v7 = vsub.f32 %v1152_v24, %v5705_v51 }
  0xa3   :  { %1063 = vmatpush.msra.mxu0 %v7839_v59  ;;  %1236 = vmatpush.msra.mxu3 %v1235_v21  ;;  %v1258_v57 = vsub.f32 %v5658_v13, %v7840_v0  ;;  %v1264_v21 = vsub.f32 %v5673_v56, %v1263_v20  ;;  %v1275_v59 = vand.u32 4294901760, %v5703_v61  ;;  %v5734_v0 = vand.u32 4294901760, %v1150_v39 }
  0xa4   :  { %1114 = vmatpush.msra.mxu1 %v5290_v44  ;;  %v7841_v44 = vand.u32 4294901760, %v5382_v41  ;;  %1175 = vmatpush.msra.mxu2 %v5552_v62  ;;  %v7842_v41 = vand.u32 4294901760, %v5400_v2  ;;  %v1270_v15 = vsub.f32 %v5688_v19, %v1269_v50  ;;  %v5745_v24 = vsub.f32 %v1151_v34, %v5721_v26 }
  0xa5   :  { %1242 = vmatpush.msra.mxu3 %v1241_v35  ;;  %v1281_v35 = vand.u32 4294901760, %v5719_v32  ;;  %v1276_v2 = vsub.f32 %v5703_v61, %v1275_v59  ;;  %v7844_v34 = vand.u32 4294901760, %v5422_v29 }
  0xa6   :  { %1067 = vmatpush.msra.mxu0 %v7841_v44  ;;  %1116 = vmatpush.msra.mxu1 %v5300_v55  ;;  %v1259_v55 = vand.u32 4294901760, %v1258_v57  ;;  %v7843_v44 = vand.u32 4294901760, %v5416_v1  ;;  %v5756_v57 = vsub.f32 %v1150_v39, %v5734_v0 }
  0xa7   :  { %1177 = vmatpush.msra.mxu2 %v5571_v36  ;;  %1248 = vmatpush.msra.mxu3 %v1247_v4  ;;  %v1287_v4 = vand.u32 4294901760, %v5732_v7  ;;  %v1282_v1 = vsub.f32 %v5719_v32, %v1281_v35  ;;  %v1277_v29 = vand.u32 4294901760, %v1276_v2  ;;  %v7859_v2 = vld [vmem:[#allocation9_spill] sm:$0xff] }
  0xa8   :  { %1071 = vmatpush.msra.mxu0 %v7842_v41  ;;  %1118 = vmatpush.msra.mxu1 %v5312_v63  ;;  %v1265_v63 = vand.u32 4294901760, %v1264_v21  ;;  %v7845_v21 = vand.u32 4294901760, %v5440_v43  ;;  %v1299_v39 = vand.u32 4294901760, %v5756_v57  ;;  %v7846_v41 = vand.u32 4294901760, %v5468_v38 }
  0xa9   :  { %1179 = vmatpush.msra.mxu2 %v5582_v52  ;;  %1254 = vmatpush.msra.mxu3 %v1253_v30  ;;  %v1293_v30 = vand.u32 4294901760, %v5745_v24  ;;  %v1283_v43 = vand.u32 4294901760, %v1282_v1  ;;  %v7863_v1 = vld [vmem:[#allocation7_spill] sm:$0xff] }
  0xaa   :  { %1075 = vmatpush.msra.mxu0 %v7843_v44  ;;  %1120 = vmatpush.msra.mxu1 %v5325_v60  ;;  %v1271_v60 = vand.u32 4294901760, %v1270_v15  ;;  %v7848_v15 = vand.u32 4294901760, %v5510_v25  ;;  %v7849_v44 = vand.u32 4294901760, %v5530_v27  ;;  %v7857_v25 = vld [vmem:[#allocation12_spill] sm:$0xff] }
  0xab   :  { %1181 = vmatpush.msra.mxu2 %v5598_v6  ;;  %1260 = vmatpush.msra.mxu3 %v1259_v55  ;;  %v7847_v55 = vand.u32 4294901760, %v5488_v16 }
  0xac   :  { %1079 = vmatpush.msra.mxu0 %v7844_v34  ;;  %1122 = vmatpush.msra.mxu1 %v5338_v12  ;;  %v1288_v12 = vsub.f32 %v5732_v7, %v1287_v4  ;;  %v7860_v34 = vld [vmem:[#allocation13_spill] sm:$0xff] }
  0xad   :  { %1183 = vmatpush.msra.mxu2 %v5627_v28  ;;  %1266 = vmatpush.msra.mxu3 %v1265_v63  ;;  %v7850_v63 = vand.u32 4294901760, %v5538_v42  ;;  %v7856_v42 = vld [vmem:[#allocation5_spill] sm:$0xff] }
  0xae   :  { %1083 = vmatpush.msra.mxu0 %v7845_v21  ;;  %1124 = vmatpush.msra.mxu1 %v5352_v23  ;;  %v1294_v23 = vsub.f32 %v5745_v24, %v1293_v30  ;;  %v1289_v38 = vand.u32 4294901760, %v1288_v12  ;;  %v7864_v21 = vand.u32 4294901760, %v7860_v34  ;;  %v1513_v12 = vld [vmem:[%s7689_s5 + $0x30] sm:$0xff] }
  0xaf   :  { %1185 = vmatpush.msra.mxu2 %v5645_v53  ;;  %1272 = vmatpush.msra.mxu3 %v1271_v60  ;;  %v7861_v60 = vld [vmem:[#allocation10_spill] sm:$0xff] }
  0xb0   :  { %1087 = vmatpush.msra.mxu0 %v7846_v41  ;;  %1126 = vmatpush.msra.mxu1 %v5368_v5  ;;  %v1300_v5 = vsub.f32 %v5756_v57, %v1299_v39  ;;  %v1295_v16 = vand.u32 4294901760, %v1294_v23 }
  0xb1   :  { %1187 = vmatpush.msra.mxu2 %v5660_v54  ;;  %1278 = vmatpush.msra.mxu3 %v1277_v29  ;;  %v7865_v29 = vand.u32 4294901760, %v5590_v33 }
  0xb2   :  { %1091 = vmatpush.msra.mxu0 %v7847_v55  ;;  %1128 = vmatpush.msra.mxu1 %v5384_v22  ;;  %v1301_v22 = vand.u32 4294901760, %v1300_v5  ;;  %v5947_v55 = vand.u32 4294901760, %v1513_v12 }
  0xb3   :  { %1189 = vmatpush.msra.mxu2 %v5675_v47  ;;  %1284 = vmatpush.msra.mxu3 %v1283_v43  ;;  %v1512_v43 = vld [vmem:[%s7689_s5 + $0x28] sm:$0xff] }
  0xb4   :  { %1095 = vmatpush.msra.mxu0 %v7848_v15  ;;  %1130 = vmatpush.msra.mxu1 %v5392_v11  ;;  %v7851_v11 = vand.u32 4294901760, %v5568_v58  ;;  %v7854_v58 = vld [vmem:[#allocation6_spill] sm:$0xff] }
  0xb5   :  { %1191 = vmatpush.msra.mxu2 %v5690_v14  ;;  %1290 = vmatpush.msra.mxu3 %v1289_v38  ;;  %v7858_v27 = vand.u32 4294901760, %v7854_v58 }
  0xb6   :  { %1099 = vmatpush.msra.mxu0 %v7849_v44  ;;  %1132 = vmatpush.msra.mxu1 %v5405_v3  ;;  %v7852_v3 = vld [vmem:[#allocation8_spill] sm:$0xff]  ;;  %v5981_v44 = vsub.f32 %v1513_v12, %v5947_v55 }
  0xb7   :  { %1193 = vmatpush.msra.mxu2 %v5705_v51  ;;  %1296 = vmatpush.msra.mxu3 %v1295_v16 }
  0xb8   :  { %1103 = vmatpush.msra.mxu0 %v7850_v63  ;;  %1134 = vmatpush.msra.mxu1 %v5431_v45  ;;  %v7853_v45 = vld [vmem:[#allocation11_spill] sm:$0xff] }
  0xb9   :  { %1195 = vmatpush.msra.mxu2 %v5721_v26  ;;  %1302 = vmatpush.msra.mxu3 %v1301_v22 }
  0xba   :  { %1107 = vmatpush.msra.mxu0 %v7851_v11  ;;  %1136 = vmatpush.msra.mxu1 %v5449_v31  ;;  %v7855_v31 = vand.u32 4294901760, %v5506_v17 }
  0xbb   :  { %1040 = vmatmul.f32.vlgmr.msrb.gmra.mxu3 %v5175_v10  ;;  %1197 = vmatpush.msra.mxu2 %v5734_v0 }
  0xbc   :  { %1310 = vmatpush.msrb.mxu0 %v5506_v17  ;;  %1471 = vmatpush.msrb.mxu3 %v5461_v46  ;;  %v7862_v17 = vand.u32 4294901760, %v7857_v25 }
  0xbd   :  { %1138 = vmatpush.msra.mxu1 %v7852_v3  ;;  %1001 = vmatmul.f32.vlgmr.msrb.gmra.mxu2 %v7853_v45 }
  0xbe   :  { %1313 = vmatpush.msrb.mxu0 %v7854_v58  ;;  %1404 = vmatpush.msrb.mxu2 %v7855_v31 }
  0xbf   :  { %1473 = vmatpush.msrb.mxu3 %v5478_v18  ;;  %1140 = vmatpush.msra.mxu1 %v7856_v42 }
  0xc0   :  { %1316 = vmatpush.msrb.mxu0 %v7857_v25  ;;  %1408 = vmatpush.msrb.mxu2 %v7858_v27  ;;  %v1509_v25 = vld [vmem:[%s7689_s5 + $0x10] sm:$0xff] }
  0xc1   :  { %1475 = vmatpush.msrb.mxu3 %v5513_v37  ;;  %1142 = vmatpush.msra.mxu1 %v7859_v2  ;;  %v6018_v2 = vand.u32 4294901760, %v5981_v44 }
  0xc2   :  { %1319 = vmatpush.msrb.mxu0 %v7860_v34  ;;  %947 = vmatmul.f32.vlgmr.msrb.gmra.mxu1 %v7861_v60 }
  0xc3   :  { %1412 = vmatpush.msrb.mxu2 %v7862_v17  ;;  %1477 = vmatpush.msrb.mxu3 %v5523_v9 }
  0xc4   :  { %1144 = vmatpush.msra.mxu1 %v7863_v1  ;;  %1322 = vmatpush.msrb.mxu0 %v5590_v33  ;;  %v7867_v33 = vand.u32 4294901760, %v5617_v49  ;;  %v1508_v1 = vld [vmem:[%s7689_s5 + $0x8] sm:$0xff] }
  0xc5   :  { %1416 = vmatpush.msrb.mxu2 %v7864_v21  ;;  %1479 = vmatpush.msrb.mxu3 %v5552_v62  ;;  %v6031_v21 = vand.u32 4294901760, %v1509_v25 }
  0xc6   :  { %1363 = vmatpush.msrb.mxu1 %v5461_v46  ;;  %1325 = vmatpush.msrb.mxu0 %v5609_v8  ;;  %v7866_v46 = vand.u32 4294901760, %v5609_v8  ;;  %v7868_v8 = vand.u32 4294901760, %v5635_v48 }
  0xc7   :  { %1420 = vmatpush.msrb.mxu2 %v7865_v29  ;;  %1481 = vmatpush.msrb.mxu3 %v5571_v36 }
  0xc8   :  { %1365 = vmatpush.msrb.mxu1 %v5478_v18  ;;  %1109 = vmatmul.f32.vlgmr.msra.gmra.mxu0 %v7861_v60  ;;  %v1518_v18 = vld [vmem:[%s7689_s5 + $0x58] sm:$0xff] }
  0xc9   :  { %1328 = vmatpush.msrb.mxu0 %v5617_v49  ;;  %1424 = vmatpush.msrb.mxu2 %v7866_v46 }
  0xca   :  { %1367 = vmatpush.msrb.mxu1 %v5513_v37  ;;  %1483 = vmatpush.msrb.mxu3 %v5582_v52  ;;  %v7869_v37 = vand.u32 4294901760, %v5658_v13 }
  0xcb   :  { %1146 = vmatmul.f32.vlgmr.msra.gmra.mxu1 %v7861_v60  ;;  %1331 = vmatpush.msrb.mxu0 %v5635_v48 }
  0xcc   :  { %1369 = vmatpush.msrb.mxu1 %v5523_v9  ;;  %1428 = vmatpush.msrb.mxu2 %v7867_v33 }
  0xcd   :  { %1485 = vmatpush.msrb.mxu3 %v5598_v6  ;;  %1334 = vmatpush.msrb.mxu0 %v5658_v13  ;;  %v1517_v13 = vld [vmem:[%s7689_s5 + $0x50] sm:$0xff] }
  0xce   :  { %1371 = vmatpush.msrb.mxu1 %v5552_v62  ;;  %1432 = vmatpush.msrb.mxu2 %v7868_v8 }
  0xcf   :  { %1487 = vmatpush.msrb.mxu3 %v5627_v28  ;;  %1337 = vmatpush.msrb.mxu0 %v5673_v56  ;;  %v133_v48 = vpop.f32.mrf.mxu0  ;;  %v5879_v56 = vand.u32 4294901760, %v1517_v13 }
  0xd0   :  { %1373 = vmatpush.msrb.mxu1 %v5571_v36  ;;  %1436 = vmatpush.msrb.mxu2 %v7869_v37  ;;  %v5867_v36 = vand.u32 4294901760, %v1518_v18 }
  0xd1   :  { %1489 = vmatpush.msrb.mxu3 %v5645_v53  ;;  %1340 = vmatpush.msrb.mxu0 %v5688_v19 }
  0xd2   :  { %1375 = vmatpush.msrb.mxu1 %v5582_v52  ;;  %1440 = vmatpush.msrb.mxu2 %v1263_v20  ;;  %v234_v9 = vpop.f32.mrf.mxu1  ;;  %v1516_v52 = vld [vmem:[%s7689_s5 + $0x48] sm:$0xff]  ;;  %v1515_v20 = vld [vmem:[%s7689_s5 + $0x40] sm:$0xff] }
  0xd3   :  { %1491 = vmatpush.msrb.mxu3 %v5660_v54  ;;  %1343 = vmatpush.msrb.mxu0 %v5703_v61  ;;  %v235_v62 = vadd.f32 %v234_v9, %v133_v48  ;;  %v288_v49 = vpop.f32.mrf.mxu2  ;;  %v5898_v61 = vand.u32 4294901760, %v1516_v52  ;;  %v1609_v48 = vsub.f32 %v5981_v44, %v6018_v2 }
  0xd4   :  { %1377 = vmatpush.msrb.mxu1 %v5598_v6  ;;  %1444 = vmatpush.msrb.mxu2 %v1269_v50  ;;  %v5888_v6 = vsub.f32 %v1518_v18, %v5867_v36  ;;  %v5903_v50 = vsub.f32 %v1517_v13, %v5879_v56  ;;  %v1507_v18 = vld [vmem:[%s7689_s5] sm:$0xff] }
  0xd5   :  { %1493 = vmatpush.msrb.mxu3 %v5675_v47  ;;  %1346 = vmatpush.msrb.mxu0 %v5719_v32  ;;  %v289_v19 = vadd.f32 %v288_v49, %v235_v62  ;;  %v6068_v62 = vsub.f32 %v1509_v25, %v6031_v21  ;;  %v6070_v49 = vand.u32 4294901760, %v1507_v18 }
  0xd6   :  { %1379 = vmatpush.msrb.mxu1 %v5627_v28  ;;  %1448 = vmatpush.msrb.mxu2 %v1275_v59  ;;  %v327_v28 = vpop.f32.mrf.mxu3  ;;  %v5911_v59 = vand.u32 4294901760, %v1515_v20 }
  0xd7   :  { %1495 = vmatpush.msrb.mxu3 %v5690_v14  ;;  %1349 = vmatpush.msrb.mxu0 %v5732_v7  ;;  %v328_v32 = vadd.f32 %v327_v28, %v289_v19  ;;  %v5922_v7 = vsub.f32 %v1516_v52, %v5898_v61  ;;  %v6079_v19 = vand.u32 4294901760, %v1609_v48  ;;  %v6101_v12 = vand.u32 4294901760, %v6068_v62 }
  0xd8   :  { %1381 = vmatpush.msrb.mxu1 %v5645_v53  ;;  %1452 = vmatpush.msrb.mxu2 %v1281_v35  ;;  %v1514_v53 = vld [vmem:[%s7689_s5 + $0x38] sm:$0xff]  ;;  %v5914_v35 = vand.u32 4294901760, %v5888_v6  ;;  %v5939_v41 = vsub.f32 %v1515_v20, %v5911_v59 }
  0xd9   :  { %1497 = vmatpush.msrb.mxu3 %v5705_v51  ;;  %1352 = vmatpush.msrb.mxu0 %v5745_v24  ;;  %v5955_v38 = vand.u32 4294901760, %v5922_v7 }
  0xda   :  { %1383 = vmatpush.msrb.mxu1 %v5660_v54  ;;  %1456 = vmatpush.msrb.mxu2 %v1287_v4  ;;  %v396_v54 = vpop.f32.mrf.mxu0  ;;  %v5924_v4 = vand.u32 4294901760, %v1514_v53  ;;  %v5973_v16 = vand.u32 4294901760, %v5939_v41 }
  0xdb   :  { %1499 = vmatpush.msrb.mxu3 %v5721_v26  ;;  %1355 = vmatpush.msrb.mxu0 %v5756_v57  ;;  %v397_v24 = vadd.f32 %v396_v54, %v328_v32  ;;  %v433_v23 = vpop.f32.mrf.mxu1  ;;  %v1511_v57 = vld [vmem:[%s7689_s5 + $0x20] sm:$0xff]  ;;  %v1591_v11 = vsub.f32 %v5922_v7, %v5955_v38  ;;  %v6098_v54 = vsub.f32 %v1507_v18, %v6070_v49 }
  0xdc   :  { %1385 = vmatpush.msrb.mxu1 %v5675_v47  ;;  %1460 = vmatpush.msrb.mxu2 %v1293_v30  ;;  %v5932_v47 = vand.u32 4294901760, %v5903_v50  ;;  %v1579_v30 = vsub.f32 %v5888_v6, %v5914_v35  ;;  %v5983_v22 = vand.u32 4294901760, %v1511_v57  ;;  %v1597_v42 = vsub.f32 %v5939_v41, %v5973_v16 }
  0xdd   :  { %1501 = vmatpush.msrb.mxu3 %v5734_v0  ;;  %1540 = vmatpush.msra.mxu0 %v5867_v36  ;;  %v5970_v15 = vadd.f32 %v433_v23, %v397_v24  ;;  %v6022_v34 = vand.u32 4294901760, %v1591_v11 }
  0xde   :  { %1304 = vmatmul.f32.vlgmr.msra.gmra.mxu3 %v7861_v60  ;;  %1387 = vmatpush.msrb.mxu1 %v5690_v14  ;;  %v5952_v14 = vsub.f32 %v1514_v53, %v5924_v4  ;;  %v5968_v5 = vand.u32 4294901760, %v1579_v30  ;;  %v6015_v27 = vsub.f32 %v1511_v57, %v5983_v22  ;;  %v6043_v8 = vand.u32 4294901760, %v1597_v42 }
  0xdf   :  { %1704 = vmatpush.msra.mxu3 %v5867_v36  ;;  %1464 = vmatpush.msrb.mxu2 %v1299_v39  ;;  %v5964_v39 = vand.u32 4294901760, %v1512_v43  ;;  %v1533_v63 = vsel %vm1531_vm0, %v5970_v15, 0  ;;  %v3256_v33 = vsel %vm3255_vm1, %v5970_v15, 0.0  ;;  %v1633_v57 = vsub.f32 %v6068_v62, %v6101_v12 }
  0xe0   :  { %1542 = vmatpush.msra.mxu0 %v5879_v56  ;;  %1203 = vmatmul.f32.vlgmr.msra.gmra.mxu2 %v5205_v40  ;;  %v1585_v40 = vsub.f32 %v5903_v50, %v5932_v47  ;;  %v5992_v3 = vand.u32 4294901760, %v5952_v14  ;;  %v6058_v9 = vand.u32 4294901760, %v6015_v27 }
  0xe1   :  { %1706 = vmatpush.msra.mxu3 %v5879_v56  ;;  %1659 = vmatpush.msra.mxu2 %v5888_v6  ;;  %v5999_v58 = vsub.f32 %v1512_v43, %v5964_v39  ;;  %v1634_v42 = vand.u32 4294901760, %v1633_v57 }
  0xe2   :  { %1389 = vmatpush.msrb.mxu1 %v5705_v51  ;;  %1544 = vmatpush.msra.mxu0 %v5898_v61  ;;  %v1510_v51 = vld [vmem:[%s7689_s5 + $0x18] sm:$0xff]  ;;  %v1603_v17 = vsub.f32 %v5952_v14, %v5992_v3  ;;  %v1621_v28 = vsub.f32 %v6015_v27, %v6058_v9  ;;  %s6626_s5 = sld [smem:[#allocation2 + $0xb]] }
  0xe3   :  { %1708 = vmatpush.msra.mxu3 %v5898_v61  ;;  %1662 = vmatpush.msra.mxu2 %v5903_v50  ;;  %v6001_v31 = vand.u32 4294901760, %v1510_v51  ;;  %v6037_v46 = vand.u32 4294901760, %v5999_v58 }
  0xe4   :  { %1391 = vmatpush.msrb.mxu1 %v5721_v26  ;;  %1546 = vmatpush.msra.mxu0 %v5911_v59  ;;  %v5996_v26 = vand.u32 4294901760, %v1585_v40  ;;  %v6062_v13 = vand.u32 4294901760, %v1603_v17  ;;  %v6107_v24 = vand.u32 4294901760, %v1621_v28  ;;  %v6123_v40 = vand.u32 4294901760, %v6098_v54 }
  0xe5   :  { %1710 = vmatpush.msra.mxu3 %v5911_v59  ;;  %1665 = vmatpush.msra.mxu2 %v5922_v7  ;;  %v6034_v29 = vsub.f32 %v1510_v51, %v6001_v31 }
  0xe6   :  { %1393 = vmatpush.msrb.mxu1 %v5734_v0  ;;  %1548 = vmatpush.msra.mxu0 %v5924_v4  ;;  %v6012_v0 = vand.u32 4294901760, %v1533_v63  ;;  %v1645_v25 = vsub.f32 %v6098_v54, %v6123_v40 }
  0xe7   :  { %1668 = vmatpush.msra.mxu2 %v5939_v41  ;;  %1712 = vmatpush.msra.mxu3 %v5924_v4  ;;  %v6073_v52 = vand.u32 4294901760, %v6034_v29 }
  0xe8   :  { %1581 = vmatpush.msra.mxu1 %v5968_v5  ;;  %1466 = vmatmul.f32.vlgmr.msrb.gmra.mxu2 %v7861_v60  ;;  %v6049_v37 = vsub.f32 %v1533_v63, %v6012_v0 }
  0xe9   :  { %1550 = vmatpush.msra.mxu0 %v5947_v55  ;;  %1671 = vmatpush.msra.mxu2 %v5952_v14  ;;  %v1627_v32 = vsub.f32 %v6034_v29, %v6073_v52 }
  0xea   :  { %1587 = vmatpush.msra.mxu1 %v5996_v26  ;;  %1714 = vmatpush.msra.mxu3 %v5947_v55  ;;  %v6087_v53 = vand.u32 4294901760, %v6049_v37 }
  0xeb   :  { %1358 = vmatmul.f32.vlgmr.msrb.gmra.mxu0 %v7853_v45  ;;  %1503 = vmatmul.f32.vlgmr.msrb.gmra.mxu3 %v7861_v60  ;;  %v6055_v45 = vand.u32 4294901760, %v1508_v1  ;;  %v1615_v60 = vsub.f32 %v5999_v58, %v6037_v46  ;;  %v6118_v23 = vand.u32 4294901760, %v1627_v32 }
  0xec   :  { %1552 = vmatpush.msra.mxu0 %v5964_v39  ;;  %1593 = vmatpush.msra.mxu1 %v6022_v34  ;;  %v1566_v30 = vsub.f32 %v6049_v37, %v6087_v53 }
  0xed   :  { %1674 = vmatpush.msra.mxu2 %v5981_v44  ;;  %1716 = vmatpush.msra.mxu3 %v5964_v39  ;;  %v6084_v20 = vsub.f32 %v1508_v1, %v6055_v45 }
  0xee   :  { %3257 = vadd.xlane.f32.xlu0 %v3256_v33  ;;  %1397 = vmatmul.f32.vlgmr.msrb.gmra.mxu1 %v5175_v10  ;;  %v6093_v10 = vand.u32 4294901760, %v1615_v60  ;;  %v6129_v63 = vand.u32 4294901760, %v1566_v30  ;;  %v1646_v60 = vand.u32 4294901760, %v1645_v25 }
  0xef   :  { %1554 = vmatpush.msra.mxu0 %v5983_v22  ;;  %1599 = vmatpush.msra.mxu1 %v6043_v8  ;;  %v6112_v43 = vand.u32 4294901760, %v6084_v20 }
  0xf0   :  { %1677 = vmatpush.msra.mxu2 %v5999_v58  ;;  %1718 = vmatpush.msra.mxu3 %v5983_v22 }
  0xf1   :  { %1556 = vmatpush.msra.mxu0 %v6001_v31  ;;  %1605 = vmatpush.msra.mxu1 %v6062_v13  ;;  %v1639_v11 = vsub.f32 %v6084_v20, %v6112_v43 }
  0xf2   :  { %1680 = vmatpush.msra.mxu2 %v6015_v27  ;;  %1720 = vmatpush.msra.mxu3 %v6001_v31 }
  0xf3   :  { %1558 = vmatpush.msra.mxu0 %v6031_v21  ;;  %1611 = vmatpush.msra.mxu1 %v6079_v19  ;;  %v1640_v33 = vand.u32 4294901760, %v1639_v11 }
  0xf4   :  { %1683 = vmatpush.msra.mxu2 %v6034_v29  ;;  %1722 = vmatpush.msra.mxu3 %v6031_v21 }
  0xf5   :  { %1560 = vmatpush.msra.mxu0 %v6055_v45  ;;  %1617 = vmatpush.msra.mxu1 %v6093_v10 }
  0xf6   :  { %1686 = vmatpush.msra.mxu2 %v6068_v62  ;;  %1724 = vmatpush.msra.mxu3 %v6055_v45  ;;  %v490_v51 = vpop.f32.mrf.mxu2 }
  0xf7   :  { %1562 = vmatpush.msra.mxu0 %v6070_v49  ;;  %1623 = vmatpush.msra.mxu1 %v6107_v24 }
  0xf8   :  { %1689 = vmatpush.msra.mxu2 %v6084_v20  ;;  %1726 = vmatpush.msra.mxu3 %v6070_v49 }
  0xf9   :  { %1741 = vmatpush.msrb.mxu0 %v5914_v35  ;;  %1730 = vmatmul.f32.vlgmr.msra.gmra.mxu3 %v6087_v53  ;;  %v591_v17 = vpop.f32.mrf.mxu3 }
  0xfa   :  { %1629 = vmatpush.msra.mxu1 %v6118_v23  ;;  %1873 = vmatpush.msrb.mxu3 %v5968_v5  ;;  %v592_v1 = vadd.f32 %v591_v17, %v490_v51 }
  0xfb   :  { %1692 = vmatpush.msra.mxu2 %v6098_v54  ;;  %1568 = vmatmul.f32.vlgmr.msra.gmra.mxu0 %v6129_v63  ;;  %v645_v18 = vpop.f32.mrf.mxu0 }
  0xfc   :  { %1695 = vmatmul.f32.vlgmr.msra.gmra.mxu2 %v6049_v37  ;;  %1745 = vmatpush.msrb.mxu0 %v5932_v47  ;;  %v646_v48 = vadd.f32 %v645_v18, %v592_v1 }
  0xfd   :  { %1832 = vmatpush.msrb.mxu2 %v5867_v36  ;;  %1879 = vmatpush.msrb.mxu3 %v5996_v26 }
  0xfe   :  { %1635 = vmatpush.msra.mxu1 %v1634_v42  ;;  %1749 = vmatpush.msrb.mxu0 %v5955_v38 }
  0xff   :  { %1834 = vmatpush.msrb.mxu2 %v5879_v56  ;;  %1885 = vmatpush.msrb.mxu3 %v6022_v34  ;;  %v684_v5 = vpop.f32.mrf.mxu1  ;;  %v753_v28 = vpop.f32.mrf.mxu2 }
 0x100   :  { %1641 = vmatpush.msra.mxu1 %v1640_v33  ;;  %1753 = vmatpush.msrb.mxu0 %v5973_v16  ;;  %v685_v32 = vadd.f32 %v684_v5, %v646_v48 }
 0x101   :  { %1836 = vmatpush.msrb.mxu2 %v5898_v61  ;;  %1891 = vmatpush.msrb.mxu3 %v6043_v8 }
 0x102   :  { %1647 = vmatpush.msra.mxu1 %v1646_v60  ;;  %1757 = vmatpush.msrb.mxu0 %v5992_v3  ;;  %v754_v26 = vadd.f32 %v753_v28, %v685_v32  ;;  %v790_v30 = vpop.f32.mrf.mxu3 }
 0x103   :  { %1649 = vmatmul.f32.vlgmr.msra.gmra.mxu1 %v6012_v0  ;;  %1838 = vmatpush.msrb.mxu2 %v5911_v59 }
 0x104   :  { %1796 = vmatpush.msrb.mxu1 %v5867_v36  ;;  %1897 = vmatpush.msrb.mxu3 %v6062_v13  ;;  %v6160_v34 = vadd.f32 %v790_v30, %v754_v26 }
 0x105   :  { %1761 = vmatpush.msrb.mxu0 %v6018_v2  ;;  %1840 = vmatpush.msrb.mxu2 %v5924_v4 }
 0x106   :  { %1798 = vmatpush.msrb.mxu1 %v5879_v56  ;;  %1903 = vmatpush.msrb.mxu3 %v6079_v19  ;;  %v1825_v8 = vsel %vm1531_vm0, %v6160_v34, 0 }
 0x107   :  { %1765 = vmatpush.msrb.mxu0 %v6037_v46  ;;  %1842 = vmatpush.msrb.mxu2 %v5947_v55  ;;  %v6178_v13 = vand.u32 4294901760, %v1825_v8 }
 0x108   :  { %1800 = vmatpush.msrb.mxu1 %v5898_v61  ;;  %1909 = vmatpush.msrb.mxu3 %v6093_v10  ;;  %v3267_v10 = vsel %vm3255_vm1, %v6160_v34, 0.0 }
 0x109   :  { %1769 = vmatpush.msrb.mxu0 %v6058_v9  ;;  %1844 = vmatpush.msrb.mxu2 %v5964_v39  ;;  %v6186_v19 = vsub.f32 %v1825_v8, %v6178_v13 }
 0x10a   :  { %1802 = vmatpush.msrb.mxu1 %v5911_v59  ;;  %1915 = vmatpush.msrb.mxu3 %v6107_v24 }
 0x10b   :  { %1773 = vmatpush.msrb.mxu0 %v6073_v52  ;;  %1846 = vmatpush.msrb.mxu2 %v5983_v22  ;;  %v6199_v24 = vand.u32 4294901760, %v6186_v19 }
 0x10c   :  { %1804 = vmatpush.msrb.mxu1 %v5924_v4  ;;  %1921 = vmatpush.msrb.mxu3 %v6118_v23 }
 0x10d   :  { %1777 = vmatpush.msrb.mxu0 %v6101_v12  ;;  %1848 = vmatpush.msrb.mxu2 %v6001_v31 }
 0x10e   :  { %1806 = vmatpush.msrb.mxu1 %v5947_v55  ;;  %1927 = vmatpush.msrb.mxu3 %v1634_v42 }
 0x10f   :  { %1781 = vmatpush.msrb.mxu0 %v6112_v43  ;;  %1850 = vmatpush.msrb.mxu2 %v6031_v21 }
 0x110   :  { %1808 = vmatpush.msrb.mxu1 %v5964_v39  ;;  %1933 = vmatpush.msrb.mxu3 %v1640_v33 }
 0x111   :  { %1785 = vmatpush.msrb.mxu0 %v6123_v40  ;;  %1852 = vmatpush.msrb.mxu2 %v6055_v45 }
 0x112   :  { %1810 = vmatpush.msrb.mxu1 %v5983_v22  ;;  %1939 = vmatpush.msrb.mxu3 %v1646_v60  ;;  %v1519_v60 = vld [vmem:[%s7690_s6] sm:$0xff] }
 0x113   :  { %1787 = vmatmul.f32.vlgmr.msrb.gmra.mxu0 %v6012_v0  ;;  %1854 = vmatpush.msrb.mxu2 %v6070_v49 }
 0x114   :  { %1951 = vmatpush.msra.mxu0 %v5888_v6  ;;  %2088 = vmatpush.msra.mxu3 %v5867_v36  ;;  %v1858_v6 = vsub.f32 %v6186_v19, %v6199_v24 }
 0x115   :  { %1812 = vmatpush.msrb.mxu1 %v6001_v31  ;;  %3268 = vadd.xlane.f32.xlu0 %v3267_v10 }
 0x116   :  { %1954 = vmatpush.msra.mxu0 %v5903_v50  ;;  %2033 = vmatpush.msra.mxu2 %v5914_v35  ;;  %v6218_v50 = vand.u32 4294901760, %v1858_v6  ;;  %v1528_v35 = vld [vmem:[%s7690_s6 + $0x48] sm:$0xff] }
 0x117   :  { %2090 = vmatpush.msra.mxu3 %v5879_v56  ;;  %1814 = vmatpush.msrb.mxu1 %v6031_v21 }
 0x118   :  { %1957 = vmatpush.msra.mxu0 %v5922_v7  ;;  %2037 = vmatpush.msra.mxu2 %v5932_v47  ;;  %v1527_v7 = vld [vmem:[%s7690_s6 + $0x40] sm:$0xff]  ;;  %v6263_v47 = vand.u32 4294901760, %v1528_v35 }
 0x119   :  { %2092 = vmatpush.msra.mxu3 %v5898_v61  ;;  %1816 = vmatpush.msrb.mxu1 %v6055_v45  ;;  %v847_v30 = vpop.f32.mrf.mxu0 }
 0x11a   :  { %1960 = vmatpush.msra.mxu0 %v5939_v41  ;;  %2041 = vmatpush.msra.mxu2 %v5955_v38  ;;  %v1526_v41 = vld [vmem:[%s7690_s6 + $0x38] sm:$0xff]  ;;  %v1525_v38 = vld [vmem:[%s7690_s6 + $0x30] sm:$0xff] }
 0x11b   :  { %2094 = vmatpush.msra.mxu3 %v5911_v59  ;;  %1818 = vmatpush.msrb.mxu1 %v6070_v49 }
 0x11c   :  { %1963 = vmatpush.msra.mxu0 %v5952_v14  ;;  %1820 = vmatmul.f32.vlgmr.msrb.gmra.mxu1 %v6012_v0  ;;  %v6275_v14 = vand.u32 4294901760, %v1527_v7 }
 0x11d   :  { %2045 = vmatpush.msra.mxu2 %v5973_v16  ;;  %1996 = vmatpush.msra.mxu1 %v5867_v36  ;;  %v1530_v36 = vld [vmem:[%s7690_s6 + $0x58] sm:$0xff]  ;;  %v6287_v16 = vand.u32 4294901760, %v1526_v41 }
 0x11e   :  { %2096 = vmatpush.msra.mxu3 %v5924_v4  ;;  %1966 = vmatpush.msra.mxu0 %v5981_v44 }
 0x11f   :  { %1941 = vmatmul.f32.vlgmr.msrb.gmra.mxu3 %v6178_v13  ;;  %1998 = vmatpush.msra.mxu1 %v5879_v56  ;;  %v1529_v56 = vld [vmem:[%s7690_s6 + $0x50] sm:$0xff] }
 0x120   :  { %2049 = vmatpush.msra.mxu2 %v5992_v3  ;;  %2098 = vmatpush.msra.mxu3 %v5947_v55  ;;  %v6300_v3 = vsub.f32 %v1527_v7, %v6275_v14 }
 0x121   :  { %1860 = vmatmul.f32.vlgmr.msrb.gmra.mxu2 %v6218_v50  ;;  %1969 = vmatpush.msra.mxu0 %v5999_v58  ;;  %v6302_v58 = vand.u32 4294901760, %v1525_v38 }
 0x122   :  { %2000 = vmatpush.msra.mxu1 %v5898_v61  ;;  %2053 = vmatpush.msra.mxu2 %v6018_v2  ;;  %v6242_v61 = vand.u32 4294901760, %v1530_v36  ;;  %v1523_v2 = vld [vmem:[%s7690_s6 + $0x20] sm:$0xff] }
 0x123   :  { %2100 = vmatpush.msra.mxu3 %v5964_v39  ;;  %1972 = vmatpush.msra.mxu0 %v6015_v27 }
 0x124   :  { %2002 = vmatpush.msra.mxu1 %v5911_v59  ;;  %2057 = vmatpush.msra.mxu2 %v6037_v46  ;;  %v6251_v59 = vand.u32 4294901760, %v1529_v56  ;;  %v6317_v46 = vsub.f32 %v1526_v41, %v6287_v16 }
 0x125   :  { %2102 = vmatpush.msra.mxu3 %v5983_v22  ;;  %1975 = vmatpush.msra.mxu0 %v6034_v29 }
 0x126   :  { %2004 = vmatpush.msra.mxu1 %v5924_v4  ;;  %2061 = vmatpush.msra.mxu2 %v6058_v9  ;;  %v6261_v4 = vsub.f32 %v1530_v36, %v6242_v61  ;;  %v6353_v57 = vand.u32 4294901760, %v6317_v46  ;;  %v6420_v36 = vand.u32 4294901760, %v1519_v60 }
 0x127   :  { %2104 = vmatpush.msra.mxu3 %v6001_v31  ;;  %1978 = vmatpush.msra.mxu0 %v6068_v62 }
 0x128   :  { %2006 = vmatpush.msra.mxu1 %v5947_v55  ;;  %2065 = vmatpush.msra.mxu2 %v6073_v52  ;;  %v6273_v55 = vsub.f32 %v1529_v56, %v6251_v59  ;;  %v6290_v44 = vand.u32 4294901760, %v6261_v4  ;;  %v6331_v52 = vsub.f32 %v1525_v38, %v6302_v58  ;;  %v2184_v1 = vsub.f32 %v6317_v46, %v6353_v57 }
 0x129   :  { %2106 = vmatpush.msra.mxu3 %v6031_v21  ;;  %1981 = vmatpush.msra.mxu0 %v6084_v20  ;;  %v6333_v20 = vand.u32 4294901760, %v1523_v2 }
 0x12a   :  { %2008 = vmatpush.msra.mxu1 %v5964_v39  ;;  %2069 = vmatpush.msra.mxu2 %v6101_v12  ;;  %v6285_v39 = vsub.f32 %v1528_v35, %v6263_v47  ;;  %v6305_v27 = vand.u32 4294901760, %v6273_v55  ;;  %v2160_v29 = vsub.f32 %v6261_v4, %v6290_v44  ;;  %v1522_v12 = vld [vmem:[%s7690_s6 + $0x18] sm:$0xff]  ;;  %v6372_v25 = vand.u32 4294901760, %v6331_v52 }
 0x12b   :  { %2108 = vmatpush.msra.mxu3 %v6055_v45  ;;  %1984 = vmatpush.msra.mxu0 %v6098_v54  ;;  %v6336_v54 = vand.u32 4294901760, %v6300_v3  ;;  %v6369_v42 = vsub.f32 %v1523_v2, %v6333_v20  ;;  %v6413_v8 = vand.u32 4294901760, %v2184_v1  ;;  %v6443_v2 = vsub.f32 %v1519_v60, %v6420_v36 }
 0x12c   :  { %2010 = vmatpush.msra.mxu1 %v5983_v22  ;;  %2073 = vmatpush.msra.mxu2 %v6112_v43  ;;  %v1524_v22 = vld [vmem:[%s7690_s6 + $0x28] sm:$0xff]  ;;  %v2166_v62 = vsub.f32 %v6273_v55, %v6305_v27  ;;  %v2190_v28 = vsub.f32 %v6331_v52, %v6372_v25 }
 0x12d   :  { %2110 = vmatpush.msra.mxu3 %v6070_v49  ;;  %1987 = vmatmul.f32.vlgmr.msra.gmra.mxu0 %v6186_v19  ;;  %v6319_v9 = vand.u32 4294901760, %v1524_v22  ;;  %v2178_v11 = vsub.f32 %v6300_v3, %v6336_v54  ;;  %v6407_v26 = vand.u32 4294901760, %v6369_v42 }
 0x12e   :  { %2112 = vmatmul.f32.vlgmr.msra.gmra.mxu3 %v6178_v13  ;;  %2121 = vmatpush.msrb.mxu0 %v6242_v61  ;;  %v6364_v51 = vand.u32 4294901760, %v2166_v62  ;;  %v6429_v35 = vand.u32 4294901760, %v2190_v28  ;;  %v6464_v28 = vand.u32 4294901760, %v6443_v2 }
 0x12f   :  { %2285 = vmatpush.msrb.mxu3 %v6242_v61  ;;  %2012 = vmatpush.msra.mxu1 %v6001_v31  ;;  %v6322_v31 = vand.u32 4294901760, %v6285_v39  ;;  %v6350_v23 = vsub.f32 %v1524_v22, %v6319_v9  ;;  %v6400_v5 = vand.u32 4294901760, %v2178_v11  ;;  %v2202_v7 = vsub.f32 %v6369_v42, %v6407_v26 }
 0x130   :  { %2077 = vmatpush.msra.mxu2 %v6123_v40  ;;  %2123 = vmatpush.msrb.mxu0 %v6251_v59  ;;  %v6357_v40 = vand.u32 4294901760, %v1522_v12 }
 0x131   :  { %2079 = vmatmul.f32.vlgmr.msra.gmra.mxu2 %v6178_v13  ;;  %2287 = vmatpush.msrb.mxu3 %v6251_v59  ;;  %v2172_v43 = vsub.f32 %v6285_v39, %v6322_v31  ;;  %v6388_v18 = vand.u32 4294901760, %v6350_v23  ;;  %v2203_v11 = vand.u32 4294901760, %v2202_v7 }
 0x132   :  { %2240 = vmatpush.msrb.mxu2 %v6261_v4  ;;  %2014 = vmatpush.msra.mxu1 %v6031_v21  ;;  %v6345_v21 = vand.u32 4294901760, %v2160_v29  ;;  %v6393_v48 = vsub.f32 %v1522_v12, %v6357_v40 }
 0x133   :  { %2125 = vmatpush.msrb.mxu0 %v6263_v47  ;;  %2289 = vmatpush.msrb.mxu3 %v6263_v47  ;;  %v6381_v17 = vand.u32 4294901760, %v2172_v43  ;;  %v2196_v10 = vsub.f32 %v6350_v23, %v6388_v18 }
 0x134   :  { %2243 = vmatpush.msrb.mxu2 %v6273_v55  ;;  %2016 = vmatpush.msra.mxu1 %v6055_v45  ;;  %v1521_v45 = vld [vmem:[%s7690_s6 + $0x10] sm:$0xff]  ;;  %v6425_v56 = vand.u32 4294901760, %v6393_v48 }
 0x135   :  { %2127 = vmatpush.msrb.mxu0 %v6275_v14  ;;  %2291 = vmatpush.msrb.mxu3 %v6275_v14  ;;  %v6385_v33 = vand.u32 4294901760, %v1521_v45  ;;  %v6440_v22 = vand.u32 4294901760, %v2196_v10 }
 0x136   :  { %2246 = vmatpush.msrb.mxu2 %v6285_v39  ;;  %2018 = vmatpush.msra.mxu1 %v6070_v49  ;;  %v1520_v49 = vld [vmem:[%s7690_s6 + $0x8] sm:$0xff]  ;;  %v2208_v43 = vsub.f32 %v6393_v48, %v6425_v56  ;;  %s6597_s6 = sld [smem:[#allocation2]] }
 0x137   :  { %2129 = vmatpush.msrb.mxu0 %v6287_v16  ;;  %2022 = vmatmul.f32.vlgmr.msra.gmra.mxu1 %v6199_v24  ;;  %v6404_v32 = vand.u32 4294901760, %v1520_v49  ;;  %v6418_v6 = vsub.f32 %v1521_v45, %v6385_v33 }
 0x138   :  { %2249 = vmatpush.msrb.mxu2 %v6300_v3  ;;  %2162 = vmatpush.msrb.mxu1 %v6345_v21  ;;  %v2209_v10 = vand.u32 4294901760, %v2208_v43  ;;  %v2226_v43 = vsub.f32 %v6443_v2, %v6464_v28 }
 0x139   :  { %2293 = vmatpush.msrb.mxu3 %v6287_v16  ;;  %2131 = vmatpush.msrb.mxu0 %v6302_v58  ;;  %v6434_v41 = vsub.f32 %v1520_v49, %v6404_v32  ;;  %v6446_v29 = vand.u32 4294901760, %v6418_v6 }
 0x13a   :  { %2252 = vmatpush.msrb.mxu2 %v6317_v46  ;;  %2168 = vmatpush.msrb.mxu1 %v6364_v51 }
 0x13b   :  { %2295 = vmatpush.msrb.mxu3 %v6302_v58  ;;  %2133 = vmatpush.msrb.mxu0 %v6319_v9  ;;  %v6455_v49 = vand.u32 4294901760, %v6434_v41  ;;  %v2214_v60 = vsub.f32 %v6418_v6, %v6446_v29 }
 0x13c   :  { %2255 = vmatpush.msrb.mxu2 %v6331_v52  ;;  %2174 = vmatpush.msrb.mxu1 %v6381_v17 }
 0x13d   :  { %2297 = vmatpush.msrb.mxu3 %v6319_v9  ;;  %2135 = vmatpush.msrb.mxu0 %v6333_v20 }
 0x13e   :  { %2258 = vmatpush.msrb.mxu2 %v6350_v23  ;;  %2180 = vmatpush.msrb.mxu1 %v6400_v5  ;;  %v1041_v45 = vpop.f32.mrf.mxu3 }
 0x13f   :  { %2299 = vmatpush.msrb.mxu3 %v6333_v20  ;;  %2137 = vmatpush.msrb.mxu0 %v6357_v40  ;;  %v948_v38 = vpop.f32.mrf.mxu1 }
 0x140   :  { %2261 = vmatpush.msrb.mxu2 %v6369_v42  ;;  %2186 = vmatpush.msrb.mxu1 %v6413_v8  ;;  %v949_v62 = vadd.f32 %v948_v38, %v847_v30  ;;  %v1002_v12 = vpop.f32.mrf.mxu2  ;;  %v2220_v38 = vsub.f32 %v6434_v41, %v6455_v49 }
 0x141   :  { %2301 = vmatpush.msrb.mxu3 %v6357_v40  ;;  %2139 = vmatpush.msrb.mxu0 %v6385_v33 }
 0x142   :  { %2264 = vmatpush.msrb.mxu2 %v6393_v48  ;;  %2192 = vmatpush.msrb.mxu1 %v6429_v35  ;;  %v1003_v1 = vadd.f32 %v1002_v12, %v949_v62 }
 0x143   :  { %2303 = vmatpush.msrb.mxu3 %v6385_v33  ;;  %2141 = vmatpush.msrb.mxu0 %v6404_v32 }
 0x144   :  { %2267 = vmatpush.msrb.mxu2 %v6418_v6  ;;  %2198 = vmatpush.msrb.mxu1 %v6440_v22  ;;  %v1042_v30 = vadd.f32 %v1041_v45, %v1003_v1  ;;  %v2215_v45 = vand.u32 4294901760, %v2214_v60 }
 0x145   :  { %2305 = vmatpush.msrb.mxu3 %v6404_v32  ;;  %2143 = vmatpush.msrb.mxu0 %v6420_v36  ;;  %v1110_v7 = vpop.f32.mrf.mxu0 }
 0x146   :  { %2270 = vmatpush.msrb.mxu2 %v6434_v41  ;;  %2204 = vmatpush.msrb.mxu1 %v2203_v11  ;;  %v1111_v62 = vadd.f32 %v1110_v7, %v1042_v30 }
 0x147   :  { %2307 = vmatpush.msrb.mxu3 %v6420_v36  ;;  %2149 = vmatmul.f32.vlgmr.msrb.gmra.mxu0 %v6129_v63  ;;  %v2221_v63 = vand.u32 4294901760, %v2220_v38 }
 0x148   :  { %2311 = vmatmul.f32.vlgmr.msrb.gmra.mxu3 %v6087_v53  ;;  %v1147_v12 = vpop.f32.mrf.mxu1  ;;  %2322 = vmatpush.msra.mxu0 %v6290_v44  ;;  %v2227_v53 = vand.u32 4294901760, %v2226_v43  ;;  %v2708_v43 = vstv %s6599_s3 }
 0x149   :  { %2451 = vmatpush.msra.mxu3 %v6345_v21  ;;  %v6477_v1 = vadd.f32 %v1147_v12, %v1111_v62  ;;  %2210 = vmatpush.msrb.mxu1 %v2209_v10  ;;  %v4599_v21 = vmov 96.0  }
 0x14a   :  { %2273 = vmatpush.msrb.mxu2 %v6443_v2  ;;  %2326 = vmatpush.msra.mxu0 %v6305_v27  ;;  %4566 = vrcp.f32 %v4599_v21  ;;  %v2730_v21 = vstv %s6603_s28 }
 0x14b   :  { %2276 = vmatmul.f32.vlgmr.msrb.gmra.mxu2 %v6049_v37  ;;  %2457 = vmatpush.msra.mxu3 %v6364_v51 }
 0x14c   :  { %2410 = vmatpush.msra.mxu2 %v6242_v61  ;;  %2216 = vmatpush.msrb.mxu1 %v2215_v45 }
 0x14d   :  { %2330 = vmatpush.msra.mxu0 %v6322_v31  ;;  %2463 = vmatpush.msra.mxu3 %v6381_v17 }
 0x14e   :  { %2412 = vmatpush.msra.mxu2 %v6251_v59  ;;  %2222 = vmatpush.msrb.mxu1 %v2221_v63 }
 0x14f   :  { %2334 = vmatpush.msra.mxu0 %v6336_v54  ;;  %2469 = vmatpush.msra.mxu3 %v6400_v5 }
 0x150   :  { %2414 = vmatpush.msra.mxu2 %v6263_v47  ;;  %2228 = vmatpush.msrb.mxu1 %v2227_v53  ;;  %v4567_v37 = vpop.eup %4566 }
 0x151   :  { %2338 = vmatpush.msra.mxu0 %v6353_v57  ;;  %2230 = vmatmul.f32.vlgmr.msrb.gmra.mxu1 %v6012_v0  ;;  %v3260_v51 = vmul.f32 96.0, %v4567_v37  ;;  %vm3264_vm2 = vweird.f32 %v4567_v37 }
 0x152   :  { %2416 = vmatpush.msra.mxu2 %v6275_v14  ;;  %2377 = vmatpush.msra.mxu1 %v6242_v61 }
 0x153   :  { %2475 = vmatpush.msra.mxu3 %v6413_v8  ;;  %2342 = vmatpush.msra.mxu0 %v6372_v25  ;;  %v3261_v17 = vsub.f32 1.0, %v3260_v51 }
 0x154   :  { %2418 = vmatpush.msra.mxu2 %v6287_v16  ;;  %2379 = vmatpush.msra.mxu1 %v6251_v59 }
 0x155   :  { %2481 = vmatpush.msra.mxu3 %v6429_v35  ;;  %2346 = vmatpush.msra.mxu0 %v6388_v18  ;;  %v3262_v5 = vmul.f32 %v4567_v37, %v3261_v17 }
 0x156   :  { %2420 = vmatpush.msra.mxu2 %v6302_v58  ;;  %2381 = vmatpush.msra.mxu1 %v6263_v47 }
 0x157   :  { %2487 = vmatpush.msra.mxu3 %v6440_v22  ;;  %2350 = vmatpush.msra.mxu0 %v6407_v26  ;;  %v3263_v35 = vadd.f32 %v4567_v37, %v3262_v5 }
 0x158   :  { %2422 = vmatpush.msra.mxu2 %v6319_v9  ;;  %2383 = vmatpush.msra.mxu1 %v6275_v14 }
 0x159   :  { %2493 = vmatpush.msra.mxu3 %v2203_v11  ;;  %2354 = vmatpush.msra.mxu0 %v6425_v56 }
 0x15a   :  { %2424 = vmatpush.msra.mxu2 %v6333_v20  ;;  %2385 = vmatpush.msra.mxu1 %v6287_v16 }
 0x15b   :  { %2499 = vmatpush.msra.mxu3 %v2209_v10  ;;  %2358 = vmatpush.msra.mxu0 %v6446_v29 }
 0x15c   :  { %2426 = vmatpush.msra.mxu2 %v6357_v40  ;;  %2387 = vmatpush.msra.mxu1 %v6302_v58 }
 0x15d   :  { %2505 = vmatpush.msra.mxu3 %v2215_v45  ;;  %2362 = vmatpush.msra.mxu0 %v6455_v49  ;;  %v2706_v45 = vstv %s6597_s6 }
 0x15e   :  { %2428 = vmatpush.msra.mxu2 %v6385_v33  ;;  %2389 = vmatpush.msra.mxu1 %v6319_v9 }
 0x15f   :  { %2511 = vmatpush.msra.mxu3 %v2221_v63  ;;  %2366 = vmatpush.msra.mxu0 %v6464_v28  ;;  %v2728_v63 = vstv %s6601_s1 }
 0x160   :  { %2430 = vmatpush.msra.mxu2 %v6404_v32  ;;  %2391 = vmatpush.msra.mxu1 %v6333_v20 }
 0x161   :  { %2517 = vmatpush.msra.mxu3 %v2227_v53  ;;  %2368 = vmatmul.f32.vlgmr.msra.gmra.mxu0 %v6012_v0  ;;  %v1305_v8 = vpop.f32.mrf.mxu3  ;;  %v3258_v60 = vpop.xlane.xlu0 %3257 }
 0x162   :  { %2519 = vmatmul.f32.vlgmr.msra.gmra.mxu3 %v6178_v13  ;;  %2529 = vmatpush.msrb.mxu0 %v6261_v4  ;;  %v6532_v4 = vsel %vm3264_vm2, %v4567_v37, %v3263_v35  ;;  %v4600_v35 = vmov 0  }
 0x163   :  { %2666 = vmatpush.msrb.mxu3 %v6242_v61  ;;  %2393 = vmatpush.msra.mxu1 %v6357_v40  ;;  %v1204_v22 = vpop.f32.mrf.mxu2 }
 0x164   :  { %2432 = vmatpush.msra.mxu2 %v6420_v36  ;;  %2532 = vmatpush.msrb.mxu0 %v6273_v55  ;;  %v1306_v11 = vadd.f32 %v1305_v8, %v1204_v22 }
 0x165   :  { %2438 = vmatmul.f32.vlgmr.msra.gmra.mxu2 %v6218_v50  ;;  %2668 = vmatpush.msrb.mxu3 %v6251_v59 }
 0x166   :  { %2611 = vmatpush.msrb.mxu2 %v6290_v44  ;;  %2395 = vmatpush.msra.mxu1 %v6385_v33 }
 0x167   :  { %2535 = vmatpush.msrb.mxu0 %v6285_v39  ;;  %2670 = vmatpush.msrb.mxu3 %v6263_v47  ;;  %v3266_v39 = vmul.f32 %v6532_v4, %v3258_v60 }
 0x168   :  { %2615 = vmatpush.msrb.mxu2 %v6305_v27  ;;  %v1359_v50 = vpop.f32.mrf.mxu0  ;;  %2397 = vmatpush.msra.mxu1 %v6404_v32 }
 0x169   :  { %2538 = vmatpush.msrb.mxu0 %v6300_v3  ;;  %v1360_v55 = vadd.f32 %v1359_v50, %v1306_v11  ;;  %2672 = vmatpush.msrb.mxu3 %v6275_v14  ;;  %v2711_v11 = vstv %s6605_s22 }
 0x16a   :  { %2619 = vmatpush.msrb.mxu2 %v6322_v31  ;;  %2399 = vmatpush.msra.mxu1 %v6420_v36 }
 0x16b   :  { %2541 = vmatpush.msrb.mxu0 %v6317_v46  ;;  %2401 = vmatmul.f32.vlgmr.msra.gmra.mxu1 %v6012_v0  ;;  %v1398_v44 = vpop.f32.mrf.mxu1  ;;  %v1467_v27 = vpop.f32.mrf.mxu2  ;;  %v6550_v46 = vsub.f32 %v5970_v15, %v3266_v39 }
 0x16c   :  { %2623 = vmatpush.msrb.mxu2 %v6336_v54  ;;  %2574 = vmatpush.msrb.mxu1 %v6242_v61  ;;  %v1399_v3 = vadd.f32 %v1398_v44, %v1360_v55 }
 0x16d   :  { %2674 = vmatpush.msrb.mxu3 %v6287_v16  ;;  %2544 = vmatpush.msrb.mxu0 %v6331_v52  ;;  %v3272_v15 = vmul.f32 %v6550_v46, %v6550_v46 }
 0x16e   :  { %2627 = vmatpush.msrb.mxu2 %v6353_v57  ;;  %2576 = vmatpush.msrb.mxu1 %v6251_v59  ;;  %v1468_v0 = vadd.f32 %v1467_v27, %v1399_v3  ;;  %v1504_v31 = vpop.f32.mrf.mxu3  ;;  %v2714_v27 = vstv %s6607_s23  ;;  %v2733_v3 = vstv %s6609_s24 }
 0x16f   :  { %2676 = vmatpush.msrb.mxu3 %v6302_v58  ;;  %2547 = vmatpush.msrb.mxu0 %v6350_v23  ;;  %v3273_v59 = vsel %vm3255_vm1, %v3272_v15, 0.0 }
 0x170   :  { %2631 = vmatpush.msrb.mxu2 %v6372_v25  ;;  %2578 = vmatpush.msrb.mxu1 %v6263_v47  ;;  %v6556_v61 = vadd.f32 %v1504_v31, %v1468_v0  ;;  %v2736_v0 = vstv %s6611_s25 }
 0x171   :  { %2678 = vmatpush.msrb.mxu3 %v6319_v9  ;;  %2550 = vmatpush.msrb.mxu0 %v6369_v42 }
 0x172   :  { %2635 = vmatpush.msrb.mxu2 %v6388_v18  ;;  %2580 = vmatpush.msrb.mxu1 %v6275_v14 }
 0x173   :  { %2680 = vmatpush.msrb.mxu3 %v6333_v20  ;;  %2553 = vmatpush.msrb.mxu0 %v6393_v48 }
 0x174   :  { %2639 = vmatpush.msrb.mxu2 %v6407_v26  ;;  %2582 = vmatpush.msrb.mxu1 %v6287_v16 }
 0x175   :  { %2682 = vmatpush.msrb.mxu3 %v6357_v40  ;;  %2556 = vmatpush.msrb.mxu0 %v6418_v6 }
 0x176   :  { %2643 = vmatpush.msrb.mxu2 %v6425_v56  ;;  %2584 = vmatpush.msrb.mxu1 %v6302_v58 }
 0x177   :  { %2684 = vmatpush.msrb.mxu3 %v6385_v33  ;;  %2559 = vmatpush.msrb.mxu0 %v6434_v41 }
 0x178   :  { %2647 = vmatpush.msrb.mxu2 %v6446_v29  ;;  %2586 = vmatpush.msrb.mxu1 %v6319_v9  ;;  %v1569_v9 = vpop.f32.mrf.mxu0 }
 0x179   :  { %2686 = vmatpush.msrb.mxu3 %v6404_v32  ;;  %3274 = vadd.xlane.f32.xlu2 %v3273_v59 }
 0x17a   :  { %2562 = vmatpush.msrb.mxu0 %v6443_v2  ;;  %2588 = vmatpush.msrb.mxu1 %v6333_v20 }
 0x17b   :  { %2651 = vmatpush.msrb.mxu2 %v6455_v49  ;;  %2688 = vmatpush.msrb.mxu3 %v6420_v36 }
 0x17c   :  { %2565 = vmatmul.f32.vlgmr.msrb.gmra.mxu0 %v6186_v19  ;;  %2690 = vmatmul.f32.vlgmr.msrb.gmra.mxu3 %v6178_v13  ;;  %v1731_v54 = vpop.f32.mrf.mxu3 }
 0x17d   :  { %2590 = vmatpush.msrb.mxu1 %v6357_v40  ;;  %2655 = vmatpush.msrb.mxu2 %v6464_v28 }
 0x17e   :  { %2657 = vmatmul.f32.vlgmr.msrb.gmra.mxu2 %v6178_v13  ;;  %4560 = vset.pattern.permute.xlu2 %v4600_v35 }
 0x17f   :  { %2592 = vmatpush.msrb.mxu1 %v6385_v33  ;;  %v1696_v52 = vpop.f32.mrf.mxu2  ;;  %4561 = vset.pattern.permute.xlu0 %v4600_v35 }
 0x180   :  { %v1650_v13 = vpop.f32.mrf.mxu1  ;;  %4562 = vset.pattern.permute.xlu1 %v4600_v35 }
 0x181   :  { %2594 = vmatpush.msrb.mxu1 %v6404_v32 }
 0x183   :  { %2596 = vmatpush.msrb.mxu1 %v6420_v36 }
 0x184   :  { %2600 = vmatmul.f32.vlgmr.msrb.gmra.mxu1 %v6199_v24 }
 0x188   :  { %v3269_v47 = vpop.xlane.xlu0 %3268 }
 0x189   :  { %v3270_v14 = vmul.f32 %v3269_v47, %v6532_v4 }
 0x18b   :  { %v6592_v19 = vsub.f32 %v6160_v34, %v3270_v14  ;;  %v1651_v34 = vadd.f32 %v1650_v13, %v1569_v9  ;;  %v2717_v9 = vstv %s6615_s26 }
 0x18d   :  { %v3278_v16 = vmul.f32 %v6592_v19, %v6592_v19  ;;  %v1697_v56 = vadd.f32 %v1696_v52, %v1651_v34  ;;  %v2726_v52 = vstv %s6617_s27 }
 0x18f   :  { %v3279_v58 = vsel %vm3255_vm1, %v3278_v16, 0.0  ;;  %v1732_v49 = vadd.f32 %v1731_v54, %v1697_v56 }
 0x190   :  { %3280 = vadd.xlane.f32.xlu2 %v3279_v58  ;;  %v1788_v23 = vpop.f32.mrf.mxu0 }
 0x191   :  { %v1789_v28 = vadd.f32 %v1788_v23, %v1732_v49 }
 0x199   :  { %v1821_v20 = vpop.f32.mrf.mxu1 }
 0x19a   :  { %v6619_v62 = vadd.f32 %v1821_v20, %v1789_v28  ;;  %v2739_v20 = vstv %s6621_s0 }
 0x19c   :  { %v2707_v22 = vmul.f32 %v2706_v45, %v6619_v62  ;;  %v2719_v60 = vmul.f32 %v2708_v43, %v6619_v62  ;;  %v2729_v50 = vmul.f32 %v2728_v63, %v6619_v62  ;;  %v2741_v55 = vmul.f32 %v2730_v21, %v6619_v62 }
 0x1a2   :  { %v1942_v40 = vpop.f32.mrf.mxu3 }
 0x1a4   :  { %v1861_v57 = vpop.f32.mrf.mxu2 }
 0x1a5   :  { %v1943_v25 = vadd.f32 %v1942_v40, %v1861_v57  ;;  %v2818_v40 = vld [vmem:[%s7691_s7 + $0x28] sm:$0xff] }
 0x1a6   :  { %v6671_v34 = vand.u32 4294901760, %v2818_v40 }
 0x1a8   :  { %v6693_v28 = vsub.f32 %v2818_v40, %v6671_v34  ;;  %2954 = vmatpush.msra.mxu3 %v6671_v34  ;;  %2838 = vmatpush.msra.mxu0 %v6671_v34 }
 0x1aa   :  { %v1988_v42 = vpop.f32.mrf.mxu0  ;;  %2921 = vmatpush.msra.mxu2 %v6693_v28 }
 0x1ab   :  { %v1989_v18 = vadd.f32 %v1988_v42, %v1943_v25  ;;  %v2817_v42 = vld [vmem:[%s7691_s7 + $0x20] sm:$0xff]  ;;  %v2816_v25 = vld [vmem:[%s7691_s7 + $0x18] sm:$0xff] }
 0x1b1   :  { %v2113_v32 = vpop.f32.mrf.mxu3 }
 0x1b4   :  { %v2023_v24 = vpop.f32.mrf.mxu1  ;;  %v2080_v33 = vpop.f32.mrf.mxu2 }
 0x1b5   :  { %v2024_v26 = vadd.f32 %v2023_v24, %v1989_v18  ;;  %v2748_v24 = vstv %s6626_s5  ;;  %v6673_v18 = vand.u32 4294901760, %v2817_v42 }
 0x1b7   :  { %v2081_v41 = vadd.f32 %v2080_v33, %v2024_v26  ;;  %v2814_v26 = vld [vmem:[%s7691_s7 + $0x8] sm:$0xff]  ;;  %2956 = vmatpush.msra.mxu3 %v6673_v18  ;;  %2840 = vmatpush.msra.mxu0 %v6673_v18 }
 0x1b9   :  { %v6613_v30 = vadd.f32 %v2113_v32, %v2081_v41  ;;  %v2815_v32 = vld [vmem:[%s7691_s7 + $0x10] sm:$0xff] }
 0x1ba   :  { %v6686_v41 = vand.u32 4294901760, %v2815_v32 }
 0x1bb   :  { %v2709_v37 = vmul.f32 %v2708_v43, %v6613_v30  ;;  %v2720_v51 = vmul.f32 %v2706_v45, %v6613_v30  ;;  %v6632_v17 = vmul.f32 %v2730_v21, %v6613_v30  ;;  %v2742_v5 = vmul.f32 %v2728_v63, %v6613_v30 }
 0x1bc   :  { %v6703_v45 = vsub.f32 %v2815_v32, %v6686_v41 }
 0x1bd   :  { %v2710_v44 = vsub.f32 %v2707_v22, %v2709_v37  ;;  %v2721_v47 = vadd.f32 %v2720_v51, %v2719_v60  ;;  %v2732_v14 = vsub.f32 %v2729_v50, %v6632_v17  ;;  %v2743_v16 = vadd.f32 %v2742_v5, %v2741_v55 }
 0x1be   :  { %v6713_v37 = vand.u32 4294901760, %v6693_v28  ;;  %v6726_v50 = vand.u32 4294901760, %v6703_v45 }
 0x1c4   :  { %v2150_v6 = vpop.f32.mrf.mxu0 }
 0x1cb   :  { %v2312_v10 = vpop.f32.mrf.mxu3 }
 0x1ce   :  { %v2231_v48 = vpop.f32.mrf.mxu1  ;;  %v2277_v2 = vpop.f32.mrf.mxu2 }
 0x1cf   :  { %v2232_v36 = vadd.f32 %v2231_v48, %v2150_v6  ;;  %v6675_v48 = vand.u32 4294901760, %v2816_v25  ;;  %v2813_v6 = vld [vmem:[%s7691_s7] sm:$0xff] }
 0x1d1   :  { %v2278_v29 = vadd.f32 %v2277_v2, %v2232_v36  ;;  %v6688_v2 = vand.u32 4294901760, %v2814_v26  ;;  %2958 = vmatpush.msra.mxu3 %v6675_v48  ;;  %2842 = vmatpush.msra.mxu0 %v6675_v48 }
 0x1d3   :  { %v2313_v38 = vadd.f32 %v2312_v10, %v2278_v29  ;;  %v6690_v29 = vand.u32 4294901760, %v2813_v6  ;;  %v6696_v10 = vsub.f32 %v2817_v42, %v6673_v18  ;;  %v6707_v43 = vsub.f32 %v2814_v26, %v6688_v2  ;;  %2960 = vmatpush.msra.mxu3 %v6686_v41  ;;  %2844 = vmatpush.msra.mxu0 %v6686_v41 }
 0x1d5   :  { %v6710_v63 = vsub.f32 %v2813_v6, %v6690_v29  ;;  %v6716_v51 = vand.u32 4294901760, %v6696_v10  ;;  %2924 = vmatpush.msra.mxu2 %v6696_v10  ;;  %2962 = vmatpush.msra.mxu3 %v6688_v2 }
 0x1d6   :  { %2846 = vmatpush.msra.mxu0 %v6688_v2 }
 0x1d7   :  { %2964 = vmatpush.msra.mxu3 %v6690_v29 }
 0x1d8   :  { %2848 = vmatpush.msra.mxu0 %v6690_v29 }
 0x1da   :  { %2985 = vmatpush.msrb.mxu0 %v6713_v37 }
 0x1dc   :  { %2989 = vmatpush.msrb.mxu0 %v6716_v51 }
 0x1de   :  { %v2369_v7 = vpop.f32.mrf.mxu0 }
 0x1df   :  { %v2370_v53 = vadd.f32 %v2369_v7, %v2313_v38  ;;  %v6699_v7 = vsub.f32 %v2816_v25, %v6675_v48 }
 0x1e1   :  { %v6720_v17 = vand.u32 4294901760, %v6699_v7  ;;  %2927 = vmatpush.msra.mxu2 %v6699_v7 }
 0x1e3   :  { %2930 = vmatpush.msra.mxu2 %v6703_v45  ;;  %2993 = vmatpush.msrb.mxu0 %v6720_v17 }
 0x1e5   :  { %v2520_v15 = vpop.f32.mrf.mxu3  ;;  %2933 = vmatpush.msra.mxu2 %v6707_v43  ;;  %2997 = vmatpush.msrb.mxu0 %v6726_v50 }
 0x1e7   :  { %2936 = vmatpush.msra.mxu2 %v6710_v63 }
 0x1e8   :  { %v2402_v12 = vpop.f32.mrf.mxu1  ;;  %v2439_v39 = vpop.f32.mrf.mxu2 }
 0x1e9   :  { %v6635_v8 = vadd.f32 %v2402_v12, %v2370_v53  ;;  %v2521_v13 = vadd.f32 %v2520_v15, %v2439_v39  ;;  %3053 = vmatpush.msrb.mxu2 %v6671_v34 }
 0x1eb   :  { %v2712_v59 = vmul.f32 %v2711_v11, %v6635_v8  ;;  %v2722_v54 = vmul.f32 %v2714_v27, %v6635_v8  ;;  %v2734_v23 = vmul.f32 %v2733_v3, %v6635_v8  ;;  %v2744_v57 = vmul.f32 %v2736_v0, %v6635_v8  ;;  %3055 = vmatpush.msrb.mxu2 %v6673_v18 }
 0x1ec   :  { %v3275_v31 = vpop.xlane.xlu2 %3274 }
 0x1ed   :  { %v2713_v36 = vadd.f32 %v2712_v59, %v2710_v44  ;;  %v2723_v38 = vadd.f32 %v2722_v54, %v2721_v47  ;;  %v2735_v5 = vadd.f32 %v2734_v23, %v2732_v14  ;;  %v3276_v35 = vmul.f32 %v3275_v31, %v6532_v4  ;;  %3057 = vmatpush.msrb.mxu2 %v6675_v48 }
 0x1ee   :  { %v2745_v55 = vadd.f32 %v2744_v57, %v2743_v16  ;;  %v2871_v44 = vsub.f32 %v6693_v28, %v6713_v37  ;;  %v2877_v31 = vsub.f32 %v6696_v10, %v6716_v51  ;;  %v6739_v59 = vand.u32 4294901760, %v6707_v43 }
 0x1ef   :  { %v6743_v47 = vand.u32 4294901760, %v6710_v63  ;;  %3059 = vmatpush.msrb.mxu2 %v6686_v41 }
 0x1f0   :  { %v2872_v23 = vand.u32 4294901760, %v2871_v44  ;;  %v2878_v57 = vand.u32 4294901760, %v2877_v31  ;;  %v2895_v25 = vsub.f32 %v6707_v43, %v6739_v59  ;;  %3001 = vmatpush.msrb.mxu0 %v6739_v59 }
 0x1f1   :  { %3061 = vmatpush.msrb.mxu2 %v6688_v2 }
 0x1f2   :  { %2873 = vmatpush.msra.mxu1 %v2872_v23  ;;  %3088 = vmatpush.msrb.mxu3 %v2872_v23 }
 0x1f3   :  { %3063 = vmatpush.msrb.mxu2 %v6690_v29  ;;  %3005 = vmatpush.msrb.mxu0 %v6743_v47 }
 0x1f4   :  { %2879 = vmatpush.msra.mxu1 %v2878_v57  ;;  %3094 = vmatpush.msrb.mxu3 %v2878_v57 }
 0x1f9   :  { %v2566_v58 = vpop.f32.mrf.mxu0 }
 0x1fa   :  { %v2567_v33 = vadd.f32 %v2566_v58, %v2521_v13 }
 0x1ff   :  { %v2691_v22 = vpop.f32.mrf.mxu3 }
 0x201   :  { %v2601_v56 = vpop.f32.mrf.mxu1  ;;  %v2658_v12 = vpop.f32.mrf.mxu2 }
 0x202   :  { %v2602_v49 = vadd.f32 %v2601_v56, %v2567_v33  ;;  %v2901_v56 = vsub.f32 %v6710_v63, %v6743_v47 }
 0x203   :  { %v3281_v21 = vpop.xlane.xlu2 %3280 }
 0x204   :  { %v2659_v53 = vadd.f32 %v2658_v12, %v2602_v49  ;;  %v3282_v60 = vmul.f32 %v3281_v21, %v6532_v4  ;;  %v2883_v4 = vsub.f32 %v6699_v7, %v6720_v17  ;;  %v2902_v21 = vand.u32 4294901760, %v2901_v56 }
 0x206   :  { %v6729_v39 = vadd.f32 %v2691_v22, %v2659_v53  ;;  %v3283_v15 = vadd.f32 %v3282_v60, %v3276_v35  ;;  %v2884_v42 = vand.u32 4294901760, %v2883_v4 }
 0x208   :  { %v2715_v14 = vmul.f32 %v2714_v27, %v6729_v39  ;;  %v2724_v16 = vmul.f32 %v2711_v11, %v6729_v39  ;;  %v2737_v58 = vmul.f32 %v2736_v0, %v6729_v39  ;;  %v2746_v13 = vmul.f32 %v2733_v3, %v6729_v39  ;;  %2885 = vmatpush.msra.mxu1 %v2884_v42 }
 0x209   :  { %v6758_v54 = vadd.f32 1e-05, %v3283_v15  ;;  %v2889_v27 = vsub.f32 %v6703_v45, %v6726_v50  ;;  %3100 = vmatpush.msrb.mxu3 %v2884_v42  ;;  %v3253_v15 = vld [vmem:[%s7699_s15] sm:$0x3] }
 0x20a   :  { %v2716_v11 = vsub.f32 %v2713_v36, %v2715_v14  ;;  %v2725_v0 = vadd.f32 %v2724_v16, %v2723_v38  ;;  %v2738_v3 = vsub.f32 %v2735_v5, %v2737_v58  ;;  %v2747_v40 = vadd.f32 %v2746_v13, %v2745_v55 }
 0x20b   :  { %4568 = vrsqrt.f32 %v6758_v54  ;;  %v2890_v36 = vand.u32 4294901760, %v2889_v27  ;;  %vm3291_vm4 = vweird.f32 %v6758_v54 }
 0x20c   :  { %v2718_v33 = vadd.f32 %v2717_v9, %v2716_v11  ;;  %v2727_v32 = vadd.f32 %v2726_v52, %v2725_v0  ;;  %v2740_v26 = vadd.f32 %v2739_v20, %v2738_v3  ;;  %v2749_v6 = vadd.f32 %v2748_v24, %v2747_v40 }
 0x20d   :  { %v2896_v9 = vand.u32 4294901760, %v2895_v25  ;;  %2891 = vmatpush.msra.mxu1 %v2890_v36  ;;  %3106 = vmatpush.msrb.mxu3 %v2890_v36 }
 0x20e   :  { %v2750_v49 = vmul.f32 %v2718_v33, %v2718_v33  ;;  %v2751_v38 = vmul.f32 %v2727_v32, %v2727_v32  ;;  %v2765_v12 = vmul.f32 %v2740_v26, %v2740_v26  ;;  %v2766_v53 = vmul.f32 %v2749_v6, %v2749_v6 }
 0x20f   :  { %2897 = vmatpush.msra.mxu1 %v2896_v9  ;;  %3112 = vmatpush.msrb.mxu3 %v2896_v9 }
 0x210   :  { %v6783_v52 = vadd.f32 %v2751_v38, %v2750_v49  ;;  %v6785_v20 = vadd.f32 %v2766_v53, %v2765_v12 }
 0x211   :  { %v4569_v24 = vpop.eup %4568  ;;  %2903 = vmatpush.msra.mxu1 %v2902_v21  ;;  %3118 = vmatpush.msrb.mxu3 %v2902_v21 }
 0x212   :  { %4570 = vrsqrt.f32 %v6783_v52  ;;  %v3286_v5 = vmul.f32 %v4569_v24, %v6758_v54  ;;  %vm3292_vm3 = vweird.f32 %v4569_v24  ;;  %vm2760_vm6 = vcmp.eq.f32.partialorder %v6783_v52, inf }
 0x213   :  { %4572 = vrsqrt.f32 %v6785_v20  ;;  %3022 = vmatpush.msrb.mxu1 %v6671_v34  ;;  %vm3293_vm5 = vmor %vm3291_vm4, %vm3292_vm3  ;;  %v2763_v42 = vand.u32 2147483648, %v6783_v52  ;;  %vm2762_vm7 = vcmp.eq.f32.partialorder %v6783_v52, 0.0  ;;  %vm2775_vm8 = vcmp.eq.f32.partialorder %v6785_v20, inf }
 0x214   :  { %v3287_v35 = vmul.f32 %v4569_v24, %v3286_v5  ;;  %v2778_v32 = vand.u32 2147483648, %v6785_v20  ;;  %vm2777_vm9 = vcmp.eq.f32.partialorder %v6785_v20, 0.0  ;;  %vm3998_vm4 = vcmask 654336  }
 0x215   :  { %3024 = vmatpush.msrb.mxu1 %v6673_v18 }
 0x216   :  { %v3288_v22 = vmul.f32 0.5, %v3287_v35 }
 0x217   :  { %3026 = vmatpush.msrb.mxu1 %v6675_v48 }
 0x218   :  { %v4571_v60 = vpop.eup %4570  ;;  %v3289_v55 = vsub.f32 1.5, %v3288_v22 }
 0x219   :  { %v4573_v44 = vpop.eup %4572  ;;  %v2754_v31 = vmul.f32 %v4571_v60, %v6783_v52  ;;  %3028 = vmatpush.msrb.mxu1 %v6686_v41 }
 0x21a   :  { %v3290_v4 = vmul.f32 %v4569_v24, %v3289_v55  ;;  %v2769_v14 = vmul.f32 %v4573_v44, %v6785_v20 }
 0x21b   :  { %v2755_v16 = vmul.f32 %v4571_v60, %v2754_v31  ;;  %3030 = vmatpush.msrb.mxu1 %v6688_v2 }
 0x21c   :  { %v3294_v58 = vsel %vm3293_vm5, %v4569_v24, %v3290_v4  ;;  %v2770_v13 = vmul.f32 %v4573_v44, %v2769_v14 }
 0x21d   :  { %v3295_v54 = vmul.f32 %v3294_v58, %v3253_v15  ;;  %v2756_v23 = vmul.f32 0.5, %v2755_v16  ;;  %3032 = vmatpush.msrb.mxu1 %v6690_v29 }
 0x21e   :  { %v2771_v57 = vmul.f32 0.5, %v2770_v13 }
 0x21f   :  { %3298 = vperm.xlu2 %4560, %v3295_v54   ;;  %v2757_v27 = vsub.f32 1.5, %v2756_v23  ;;  %v3388_v23 = vld [vmem:[%s7694_s10 + $0x58] sm:$0xff] }
 0x220   :  { %v2772_v11 = vsub.f32 1.5, %v2771_v57 }
 0x221   :  { %v2758_v0 = vmul.f32 %v4571_v60, %v2757_v27 }
 0x222   :  { %v2773_v3 = vmul.f32 %v4573_v44, %v2772_v11 }
 0x223   :  { %v2759_v40 = vmul.f32 %v2758_v0, %v6783_v52 }
 0x224   :  { %v2774_v25 = vmul.f32 %v2773_v3, %v6785_v20  ;;  %v6833_v3 = vand.u32 4294901760, %v3388_v23 }
 0x225   :  { %v2761_v33 = vsel %vm2760_vm6, %v6783_v52, %v2759_v40 }
 0x226   :  { %v2764_v26 = vsel %vm2762_vm7, %v2763_v42, %v2761_v33  ;;  %v2776_v6 = vsel %vm2775_vm8, %v6785_v20, %v2774_v25  ;;  %v3385_v33 = vld [vmem:[%s7694_s10 + $0x40] sm:$0xff] }
 0x227   :  { %v2779_v36 = vsel %vm2777_vm9, %v2778_v32, %v2776_v6  ;;  %v6851_v32 = vsub.f32 %v3388_v23, %v6833_v3 }
 0x228   :  { %v2780_v56 = vmax.f32 %v2764_v26, %v2779_v36 }
 0x22a   :  { %v2781_v49 = vsub.f32 %v2764_v26, %v2780_v56  ;;  %v2784_v38 = vsub.f32 %v2779_v36, %v2780_v56  ;;  %v6861_v56 = vand.u32 4294901760, %v3385_v33 }
 0x22c   :  { %v2782_v12 = vmul.f32 1.442695, %v2781_v49  ;;  %v2785_v53 = vmul.f32 1.442695, %v2784_v38  ;;  %v3384_v49 = vld [vmem:[%s7694_s10 + $0x38] sm:$0xff] }
 0x22e   :  { %4574 = vpow2.f32 %v2782_v12 }
 0x22f   :  { %4576 = vpow2.f32 %v2785_v53 }
 0x234   :  { %v4575_v9 = vpop.eup %4574 }
 0x235   :  { %v4577_v24 = vpop.eup %4576 }
 0x236   :  { %v2787_v52 = vadd.f32 %v4577_v24, %v4575_v9 }
 0x238   :  { %4578 = vrcp.f32 %v2787_v52  ;;  %v2799_v22 = vand.u32 2147483648, %v2787_v52  ;;  %v2797_v55 = vand.u32 2147483647, %v2787_v52  ;;  %vm2793_vm11 = vweird.f32 %v2787_v52 }
 0x23a   :  { %v2800_v44 = vor.u32 1.1754944e-38, %v2799_v22  ;;  %vm2798_vm13 = vcmp.eq.f32.partialorder %v2797_v55, 8.507059e+37  ;;  %v3382_v22 = vld [vmem:[%s7694_s10 + $0x28] sm:$0xff] }
 0x23e   :  { %v4579_v21 = vpop.eup %4578 }
 0x23f   :  { %v2789_v5 = vmul.f32 %v4579_v21, %v2787_v52  ;;  %vm2794_vm10 = vweird.f32 %v4579_v21  ;;  %v3383_v52 = vld [vmem:[%s7694_s10 + $0x30] sm:$0xff] }
 0x240   :  { %vm2795_vm12 = vmor %vm2793_vm11, %vm2794_vm10 }
 0x241   :  { %v2790_v35 = vsub.f32 1.0, %v2789_v5 }
 0x243   :  { %v2791_v60 = vmul.f32 %v4579_v21, %v2790_v35  ;;  %v6880_v35 = vand.u32 4294901760, %v3384_v49 }
 0x245   :  { %v2792_v20 = vadd.f32 %v4579_v21, %v2791_v60 }
 0x247   :  { %v2796_v31 = vsel %vm2795_vm12, %v4579_v21, %v2792_v20  ;;  %v6892_v20 = vand.u32 4294901760, %v3383_v52 }
 0x248   :  { %v2801_v15 = vsel %vm2798_vm13, %v2800_v44, %v2796_v31  ;;  %v3381_v31 = vld [vmem:[%s7694_s10 + $0x20] sm:$0xff] }
 0x249   :  { %v2802_v4 = vmul.f32 %v4575_v9, %v2801_v15  ;;  %v2803_v14 = vmul.f32 %v4577_v24, %v2801_v15  ;;  %v3435_v9 = vand.u32 4294901760, %v6851_v32  ;;  %v6905_v15 = vsub.f32 %v3384_v49, %v6880_v35 }
 0x24b   :  { %v2804_v16 = vmul.f32 %v2802_v4, %v6619_v62  ;;  %v2805_v58 = vmul.f32 %v2803_v14, %v6635_v8  ;;  %v2808_v13 = vmul.f32 %v2802_v4, %v6613_v30  ;;  %v2809_v54 = vmul.f32 %v2803_v14, %v6729_v39  ;;  %v3387_v62 = vld [vmem:[%s7694_s10 + $0x50] sm:$0xff]  ;;  %v3386_v30 = vld [vmem:[%s7694_s10 + $0x48] sm:$0xff]  ;;  %v3380_v14 = vld [vmem:[%s7694_s10 + $0x18] sm:$0xff] }
 0x24c   :  { %v6845_v25 = vand.u32 4294901760, %v3387_v62  ;;  %v6853_v26 = vand.u32 4294901760, %v3386_v30  ;;  %v6907_v4 = vand.u32 4294901760, %v3382_v22  ;;  %v3459_v23 = vand.u32 4294901760, %v6905_v15 }
 0x24d   :  { %v2806_v57 = vadd.f32 %v2805_v58, %v2804_v16  ;;  %v2810_v27 = vadd.f32 %v2809_v54, %v2808_v13  ;;  %v6920_v58 = vsub.f32 %v3383_v52, %v6892_v20  ;;  %v6922_v13 = vand.u32 4294901760, %v3381_v31  ;;  %v3379_v54 = vld [vmem:[%s7694_s10 + $0x10] sm:$0xff] }
 0x24e   :  { %v6868_v53 = vsub.f32 %v3387_v62, %v6845_v25  ;;  %v6874_v24 = vsub.f32 %v3386_v30, %v6853_v26  ;;  %v6954_v62 = vand.u32 4294901760, %v3379_v54  ;;  %v3377_v30 = vld [vmem:[%s7694_s10] sm:$0xff] }
 0x24f   :  { %v2807_v11 = vmul.f32 2.0, %v2806_v57  ;;  %v2811_v0 = vmul.f32 2.0, %v2810_v27  ;;  %v6936_v57 = vsub.f32 %v3382_v22, %v6907_v4  ;;  %v3378_v27 = vld [vmem:[%s7694_s10 + $0x8] sm:$0xff]  ;;  %v6980_v49 = vand.u32 4294901760, %v3377_v30 }
 0x250   :  { %v3441_v55 = vand.u32 4294901760, %v6868_v53  ;;  %v3447_v44 = vand.u32 4294901760, %v6874_v24 }
 0x251   :  { %v2825_v8 = vsel %vm2823_vm14, %v2807_v11, 0  ;;  %v3040_v39 = vsel %vm2823_vm14, %v2811_v0, 0  ;;  %v3465_v11 = vand.u32 4294901760, %v6920_v58  ;;  %v6952_v0 = vsub.f32 %v3381_v31, %v6922_v13 }
 0x252   :  { %v6841_v40 = vand.u32 4294901760, %v2825_v8  ;;  %v6843_v42 = vand.u32 4294901760, %v3040_v39  ;;  %v3442_v16 = vsub.f32 %v6868_v53, %v3441_v55  ;;  %v7000_v52 = vsub.f32 %v3377_v30, %v6980_v49 }
 0x254   :  { %2905 = vmatmul.f32.vlgmr.msra.gmra.mxu1 %v6841_v40  ;;  %v6857_v6 = vsub.f32 %v3040_v39, %v6843_v42  ;;  %v2850_v36 = vsub.f32 %v2825_v8, %v6841_v40  ;;  %v6968_v39 = vand.u32 4294901760, %v3378_v27 }
 0x255   :  { %3169 = vmatpush.msra.mxu1 %v6671_v34 }
 0x256   :  { %2939 = vmatmul.f32.vlgmr.msra.gmra.mxu2 %v2850_v36  ;;  %v2851_v38 = vand.u32 4294901760, %v2850_v36  ;;  %v3066_v12 = vand.u32 4294901760, %v6857_v6 }
 0x257   :  { %3171 = vmatpush.msra.mxu1 %v6673_v18  ;;  %3200 = vmatpush.msra.mxu2 %v6713_v37  ;;  %v6885_v37 = vsub.f32 %v3385_v33, %v6861_v56  ;;  %v3477_v33 = vand.u32 4294901760, %v6952_v0 }
 0x258   :  { %2968 = vmatmul.f32.vlgmr.msra.gmra.mxu3 %v2851_v38  ;;  %v2852_v21 = vsub.f32 %v2850_v36, %v2851_v38  ;;  %v3067_v5 = vsub.f32 %v6857_v6, %v3066_v12  ;;  %v6978_v36 = vsub.f32 %v3379_v54, %v6954_v62 }
 0x259   :  { %3173 = vmatpush.msra.mxu1 %v6675_v48  ;;  %3204 = vmatpush.msra.mxu2 %v6716_v51  ;;  %v3436_v51 = vsub.f32 %v6851_v32, %v3435_v9 }
 0x25a   :  { %v2853_v60 = vand.u32 4294901760, %v2852_v21  ;;  %3237 = vmatpush.msra.mxu3 %v6671_v34  ;;  %v3068_v34 = vand.u32 4294901760, %v3067_v5 }
 0x25b   :  { %3175 = vmatpush.msra.mxu1 %v6686_v41  ;;  %3208 = vmatpush.msra.mxu2 %v6720_v17  ;;  %v3453_v17 = vand.u32 4294901760, %v6885_v37 }
 0x25c   :  { %2854 = vmatmul.f32.vlgmr.msra.gmra.mxu0 %v2853_v60  ;;  %3034 = vmatmul.f32.vlgmr.msrb.gmra.mxu1 %v6841_v40 }
 0x25d   :  { %3239 = vmatpush.msra.mxu3 %v6673_v18  ;;  %3136 = vmatpush.msra.mxu0 %v6693_v28  ;;  %v3437_v18 = vand.u32 4294901760, %v3436_v51  ;;  %v3448_v28 = vsub.f32 %v6874_v24, %v3447_v44 }
 0x25e   :  { %3069 = vmatmul.f32.vlgmr.msrb.gmra.mxu2 %v3068_v34  ;;  %3177 = vmatpush.msra.mxu1 %v6688_v2 }
 0x25f   :  { %3212 = vmatpush.msra.mxu2 %v6726_v50  ;;  %3241 = vmatpush.msra.mxu3 %v6675_v48  ;;  %v6938_v50 = vand.u32 4294901760, %v3380_v14  ;;  %v3454_v48 = vsub.f32 %v6885_v37, %v3453_v17 }
 0x260   :  { %3120 = vmatmul.f32.vlgmr.msrb.gmra.mxu3 %v6843_v42  ;;  %3139 = vmatpush.msra.mxu0 %v6696_v10  ;;  %v3443_v10 = vand.u32 4294901760, %v3442_v16 }
 0x261   :  { %3179 = vmatpush.msra.mxu1 %v6690_v29  ;;  %3216 = vmatpush.msra.mxu2 %v6739_v59  ;;  %v3449_v59 = vand.u32 4294901760, %v3448_v28  ;;  %v6966_v8 = vsub.f32 %v3380_v14, %v6938_v50 }
 0x262   :  { %3243 = vmatpush.msra.mxu3 %v6686_v41  ;;  %3142 = vmatpush.msra.mxu0 %v6699_v7  ;;  %v3460_v41 = vsub.f32 %v6905_v15, %v3459_v23  ;;  %v3471_v7 = vand.u32 4294901760, %v6936_v57 }
 0x263   :  { %3220 = vmatpush.msra.mxu2 %v6743_v47  ;;  %3438 = vmatpush.msrb.mxu1 %v3437_v18  ;;  %v3455_v47 = vand.u32 4294901760, %v3454_v48  ;;  %v3483_v38 = vand.u32 4294901760, %v6966_v8 }
 0x264   :  { %3007 = vmatmul.f32.vlgmr.msrb.gmra.mxu0 %v6841_v40  ;;  %3183 = vmatmul.f32.vlgmr.msra.gmra.mxu1 %v3066_v12  ;;  %v3466_v40 = vsub.f32 %v6920_v58, %v3465_v11  ;;  %v6990_v12 = vsub.f32 %v3378_v27, %v6968_v39 }
 0x265   :  { %3245 = vmatpush.msra.mxu3 %v6688_v2  ;;  %3145 = vmatpush.msra.mxu0 %v6703_v45  ;;  %v3461_v2 = vand.u32 4294901760, %v3460_v41  ;;  %v3472_v45 = vsub.f32 %v6936_v57, %v3471_v7  ;;  %v3484_v21 = vsub.f32 %v6966_v8, %v3483_v38 }
 0x266   :  { %3222 = vmatmul.f32.vlgmr.msra.gmra.mxu2 %v6843_v42  ;;  %3444 = vmatpush.msrb.mxu1 %v3443_v10  ;;  %v3495_v5 = vand.u32 4294901760, %v6990_v12 }
 0x267   :  { %3247 = vmatpush.msra.mxu3 %v6690_v29  ;;  %3148 = vmatpush.msra.mxu0 %v6707_v43  ;;  %v3467_v29 = vand.u32 4294901760, %v3466_v40  ;;  %v3478_v43 = vsub.f32 %v6952_v0, %v3477_v33  ;;  %v3485_v51 = vand.u32 4294901760, %v3484_v21 }
 0x268   :  { %3249 = vmatmul.f32.vlgmr.msra.gmra.mxu3 %v6843_v42  ;;  %3450 = vmatpush.msrb.mxu1 %v3449_v59  ;;  %v3489_v42 = vand.u32 4294901760, %v6978_v36  ;;  %v3496_v31 = vsub.f32 %v6990_v12, %v3495_v5 }
 0x269   :  { %3151 = vmatpush.msra.mxu0 %v6710_v63  ;;  %3516 = vmatpush.msrb.mxu2 %v6851_v32  ;;  %v3473_v63 = vand.u32 4294901760, %v3472_v45  ;;  %v3479_v22 = vand.u32 4294901760, %v3478_v43  ;;  %v4563_v32 = vld [vmem:[%s7692_s8] ss:$0 sm:$0xff]  ;;  %v3375_v45 = vld [vmem:[%s7693_s9 + $0x50] sm:$0xff] }
 0x26a   :  { %3456 = vmatpush.msrb.mxu1 %v3455_v47  ;;  %3561 = vmatpush.msrb.mxu3 %v6833_v3  ;;  %v3490_v60 = vsub.f32 %v6978_v36, %v3489_v42  ;;  %v3497_v16 = vand.u32 4294901760, %v3496_v31 }
 0x26b   :  { %3397 = vmatpush.msrb.mxu0 %v6833_v3  ;;  %3519 = vmatpush.msrb.mxu2 %v6868_v53  ;;  %v2822_v53 = vmul.f32 %v4563_v32, %v6477_v1 }
 0x26c   :  { %3154 = vmatmul.f32.vlgmr.msra.gmra.mxu0 %v6857_v6  ;;  %3462 = vmatpush.msrb.mxu1 %v3461_v2  ;;  %v3501_v6 = vand.u32 4294901760, %v7000_v52  ;;  %v3491_v34 = vand.u32 4294901760, %v3490_v60  ;;  %v3376_v2 = vld [vmem:[%s7693_s9 + $0x58] sm:$0xff] }
 0x26d   :  { %3399 = vmatpush.msrb.mxu0 %v6845_v25  ;;  %3522 = vmatpush.msrb.mxu2 %v6874_v24 }
 0x26e   :  { %3468 = vmatpush.msrb.mxu1 %v3467_v29  ;;  %3563 = vmatpush.msrb.mxu3 %v6845_v25  ;;  %v3502_v14 = vsub.f32 %v7000_v52, %v3501_v6  ;;  %v7113_v29 = vand.u32 4294901760, %v3375_v45 }
 0x26f   :  { %3401 = vmatpush.msrb.mxu0 %v6853_v26  ;;  %3525 = vmatpush.msrb.mxu2 %v6885_v37 }
 0x270   :  { %3474 = vmatpush.msrb.mxu1 %v3473_v63  ;;  %3565 = vmatpush.msrb.mxu3 %v6853_v26  ;;  %v3503_v18 = vand.u32 4294901760, %v3502_v14  ;;  %v3371_v63 = vld [vmem:[%s7693_s9 + $0x30] sm:$0xff]  ;;  %v7141_v31 = vsub.f32 %v3375_v45, %v7113_v29  ;;  %v3366_v45 = vld [vmem:[%s7693_s9 + $0x8] sm:$0xff] }
 0x271   :  { %3403 = vmatpush.msrb.mxu0 %v6861_v56  ;;  %3528 = vmatpush.msrb.mxu2 %v6905_v15  ;;  %v7132_v60 = vand.u32 4294901760, %v3371_v63 }
 0x272   :  { %3480 = vmatpush.msrb.mxu1 %v3479_v22  ;;  %3567 = vmatpush.msrb.mxu3 %v6861_v56 }
 0x273   :  { %3405 = vmatpush.msrb.mxu0 %v6880_v35  ;;  %3531 = vmatpush.msrb.mxu2 %v6920_v58 }
 0x274   :  { %3486 = vmatpush.msrb.mxu1 %v3485_v51  ;;  %3569 = vmatpush.msrb.mxu3 %v6880_v35 }
 0x275   :  { %3407 = vmatpush.msrb.mxu0 %v6892_v20  ;;  %3534 = vmatpush.msrb.mxu2 %v6936_v57 }
 0x276   :  { %3492 = vmatpush.msrb.mxu1 %v3491_v34  ;;  %3571 = vmatpush.msrb.mxu3 %v6892_v20 }
 0x277   :  { %3409 = vmatpush.msrb.mxu0 %v6907_v4  ;;  %3537 = vmatpush.msrb.mxu2 %v6952_v0 }
 0x278   :  { %3498 = vmatpush.msrb.mxu1 %v3497_v16  ;;  %3573 = vmatpush.msrb.mxu3 %v6907_v4 }
 0x279   :  { %3411 = vmatpush.msrb.mxu0 %v6922_v13  ;;  %v7038_v28 = vpop.permute.xlu2 %3298  ;;  %3540 = vmatpush.msrb.mxu2 %v6966_v8 }
 0x27a   :  { %3504 = vmatpush.msrb.mxu1 %v3503_v18  ;;  %v3308_v54 = vmul.f32 %v7038_v28, %v6592_v19  ;;  %3575 = vmatpush.msrb.mxu3 %v6922_v13 }
 0x27b   :  { %3413 = vmatpush.msrb.mxu0 %v6938_v50  ;;  %3543 = vmatpush.msrb.mxu2 %v6978_v36 }
 0x27c   :  { %3653 = vmatpush.msra.mxu1 %v6833_v3  ;;  %v3390_v48 = vsel %vm1531_vm0, %v3308_v54, 0  ;;  %3577 = vmatpush.msrb.mxu3 %v6938_v50 }
 0x27d   :  { %3415 = vmatpush.msrb.mxu0 %v6954_v62  ;;  %v3420_v27 = vand.u32 4294901760, %v3390_v48  ;;  %3546 = vmatpush.msrb.mxu2 %v6990_v12  ;;  %v7111_v12 = vand.u32 4294901760, %v3376_v2 }
 0x27e   :  { %3655 = vmatpush.msra.mxu1 %v6845_v25  ;;  %3579 = vmatpush.msrb.mxu3 %v6954_v62 }
 0x27f   :  { %3417 = vmatpush.msrb.mxu0 %v6968_v39  ;;  %v3421_v19 = vsub.f32 %v3390_v48, %v3420_v27  ;;  %3506 = vmatmul.f32.vlgmr.msrb.gmra.mxu1 %v3420_v27  ;;  %v7138_v51 = vsub.f32 %v3376_v2, %v7111_v12  ;;  %v7157_v48 = vsub.f32 %v3371_v63, %v7132_v60  ;;  %v3708_v63 = vand.u32 4294901760, %v3366_v45 }
 0x280   :  { %3657 = vmatpush.msra.mxu1 %v6853_v26  ;;  %3549 = vmatpush.msrb.mxu2 %v7000_v52  ;;  %v3372_v52 = vld [vmem:[%s7693_s9 + $0x38] sm:$0xff] }
 0x281   :  { %3419 = vmatpush.msrb.mxu0 %v6980_v49  ;;  %v3422_v3 = vand.u32 4294901760, %v3421_v19  ;;  %3581 = vmatpush.msrb.mxu3 %v6968_v39  ;;  %v7130_v22 = vand.u32 4294901760, %v3372_v52 }
 0x282   :  { %3659 = vmatpush.msra.mxu1 %v6861_v56  ;;  %3552 = vmatmul.f32.vlgmr.msrb.gmra.mxu2 %v3421_v19 }
 0x283   :  { %3598 = vmatpush.msra.mxu0 %v3435_v9  ;;  %v3423_v25 = vsub.f32 %v3421_v19, %v3422_v3  ;;  %3583 = vmatpush.msrb.mxu3 %v6980_v49  ;;  %v7154_v54 = vsub.f32 %v3372_v52, %v7130_v22  ;;  %v3727_v19 = vand.u32 4294901760, %v7138_v51 }
 0x284   :  { %3661 = vmatpush.msra.mxu1 %v6880_v35  ;;  %3587 = vmatmul.f32.vlgmr.msrb.gmra.mxu3 %v3422_v3  ;;  %v3733_v3 = vand.u32 4294901760, %v7141_v31 }
 0x285   :  { %3602 = vmatpush.msra.mxu0 %v3441_v55  ;;  %v3424_v26 = vand.u32 4294901760, %v3423_v25  ;;  %3689 = vmatpush.msra.mxu2 %v7111_v12 }
 0x286   :  { %3663 = vmatpush.msra.mxu1 %v6892_v20 }
 0x287   :  { %3606 = vmatpush.msra.mxu0 %v3447_v44  ;;  %3691 = vmatpush.msra.mxu2 %v7113_v29 }
 0x288   :  { %3665 = vmatpush.msra.mxu1 %v6907_v4  ;;  %3425 = vmatmul.f32.vlgmr.msrb.gmra.mxu0 %v3424_v26 }
 0x289   :  { %3610 = vmatpush.msra.mxu0 %v3453_v17 }
 0x28a   :  { %3667 = vmatpush.msra.mxu1 %v6922_v13  ;;  %v3038_v13 = vmul.f32 %v4563_v32, %v6556_v61  ;;  %v3751_v32 = vand.u32 4294901760, %v7154_v54 }
 0x28b   :  { %3614 = vmatpush.msra.mxu0 %v3459_v23 }
 0x28c   :  { %3669 = vmatpush.msra.mxu1 %v6938_v50 }
 0x28d   :  { %3618 = vmatpush.msra.mxu0 %v3465_v11 }
 0x28e   :  { %3671 = vmatpush.msra.mxu1 %v6954_v62 }
 0x28f   :  { %3622 = vmatpush.msra.mxu0 %v3471_v7 }
 0x290   :  { %3673 = vmatpush.msra.mxu1 %v6968_v39  ;;  %v4601_v39 = vmov 80.0  }
 0x291   :  { %3626 = vmatpush.msra.mxu0 %v3477_v33  ;;  %4580 = vrcp.f32 %v4601_v39  ;;  %v3368_v39 = vld [vmem:[%s7693_s9 + $0x18] sm:$0xff] }
 0x292   :  { %3675 = vmatpush.msra.mxu1 %v6980_v49 }
 0x293   :  { %3677 = vmatmul.f32.vlgmr.msra.gmra.mxu1 %v3420_v27  ;;  %3630 = vmatpush.msra.mxu0 %v3483_v38  ;;  %v3374_v38 = vld [vmem:[%s7693_s9 + $0x48] sm:$0xff] }
 0x294   :  { %v7115_v43 = vand.u32 4294901760, %v3374_v38  ;;  %3853 = vmatpush.msrb.mxu1 %v7111_v12 }
 0x295   :  { %3634 = vmatpush.msra.mxu0 %v3489_v42  ;;  %v3373_v42 = vld [vmem:[%s7693_s9 + $0x40] sm:$0xff] }
 0x296   :  { %v7144_v34 = vsub.f32 %v3374_v38, %v7115_v43  ;;  %3855 = vmatpush.msrb.mxu1 %v7113_v29  ;;  %3693 = vmatpush.msra.mxu2 %v7115_v43 }
 0x297   :  { %3638 = vmatpush.msra.mxu0 %v3495_v5  ;;  %v4581_v47 = vpop.eup %4580  ;;  %v7128_v5 = vand.u32 4294901760, %v3373_v42 }
 0x298   :  { %v3316_v40 = vmul.f32 80.0, %v4581_v47  ;;  %vm3320_vm1 = vweird.f32 %v4581_v47  ;;  %v3739_v25 = vand.u32 4294901760, %v7144_v34  ;;  %3857 = vmatpush.msrb.mxu1 %v7115_v43 }
 0x299   :  { %3642 = vmatpush.msra.mxu0 %v3501_v6  ;;  %v3370_v6 = vld [vmem:[%s7693_s9 + $0x28] sm:$0xff]  ;;  %v7151_v18 = vsub.f32 %v3373_v42, %v7128_v5  ;;  %3695 = vmatpush.msra.mxu2 %v7128_v5 }
 0x29a   :  { %3644 = vmatmul.f32.vlgmr.msra.gmra.mxu0 %v3420_v27  ;;  %v3317_v33 = vsub.f32 1.0, %v3316_v40  ;;  %v7147_v14 = vand.u32 4294901760, %v3370_v6  ;;  %3859 = vmatpush.msrb.mxu1 %v7128_v5  ;;  %v7234_v40 = vand.u32 4294901760, %v3368_v39 }
 0x29b   :  { %3808 = vmatpush.msrb.mxu0 %v7138_v51  ;;  %v3745_v26 = vand.u32 4294901760, %v7151_v18  ;;  %3697 = vmatpush.msra.mxu2 %v7130_v22 }
 0x29c   :  { %v3318_v36 = vmul.f32 %v4581_v47, %v3317_v33  ;;  %3861 = vmatpush.msrb.mxu1 %v7130_v22  ;;  %v3367_v33 = vld [vmem:[%s7693_s9 + $0x10] sm:$0xff] }
 0x29d   :  { %3811 = vmatpush.msrb.mxu0 %v7141_v31  ;;  %3699 = vmatpush.msra.mxu2 %v7132_v60  ;;  %v3706_v2 = vand.u32 4294901760, %v3367_v33 }
 0x29e   :  { %v3319_v49 = vadd.f32 %v4581_v47, %v3318_v36  ;;  %3863 = vmatpush.msrb.mxu1 %v7132_v60 }
 0x29f   :  { %3814 = vmatpush.msrb.mxu0 %v7144_v34  ;;  %3701 = vmatpush.msra.mxu2 %v7147_v14  ;;  %v3780_v52 = vsub.f32 %v3367_v33, %v3706_v2 }
 0x2a0   :  { %v7126_v21 = vsel %vm3320_vm1, %v4581_v47, %v3319_v49  ;;  %3865 = vmatpush.msrb.mxu1 %v7147_v14  ;;  %v3774_v49 = vsub.f32 %v3368_v39, %v7234_v40 }
 0x2a1   :  { %3817 = vmatpush.msrb.mxu0 %v7151_v18 }
 0x2a2   :  { %v3775_v42 = vand.u32 4294901760, %v3774_v49 }
 0x2a3   :  { %3820 = vmatpush.msrb.mxu0 %v7154_v54 }
 0x2a5   :  { %3823 = vmatpush.msrb.mxu0 %v7157_v48 }
 0x2d1   :  { %v2906_v56 = vpop.f32.mrf.mxu1 }
 0x2d9   :  { %v2855_v9 = vpop.f32.mrf.mxu0  ;;  %v2940_v24 = vpop.f32.mrf.mxu2 }
 0x2da   :  { %v2856_v35 = vadd.f32 %v2855_v9, %v2822_v53  ;;  %v3035_v44 = vpop.f32.mrf.mxu1  ;;  %v3728_v9 = vsub.f32 %v7138_v51, %v3727_v19  ;;  %v3301_v51 = vmul.f32 %v7038_v28, %v6550_v46  ;;  %v3997_v46 = vld [vmem:[%s7696_s12 + $0x48] sm:$0xff]  ;;  %v3996_v28 = vld [vmem:[%s7696_s12 + $0x40] sm:$0xff] }
 0x2db   :  { %v2969_v37 = vpop.f32.mrf.mxu3 }
 0x2dc   :  { %v2907_v55 = vadd.f32 %v2906_v56, %v2856_v35  ;;  %v7168_v56 = vsub.f32 %v3370_v6, %v7147_v14  ;;  %v3740_v35 = vsub.f32 %v7144_v34, %v3739_v25  ;;  %v3365_v6 = vld [vmem:[%s7693_s9] sm:$0xff] }
 0x2de   :  { %v2941_v20 = vadd.f32 %v2940_v24, %v2907_v55  ;;  %v3734_v24 = vsub.f32 %v7141_v31, %v3733_v3  ;;  %3826 = vmatpush.msrb.mxu0 %v7168_v56 }
 0x2e0   :  { %v2970_v15 = vadd.f32 %v2969_v37, %v2941_v20  ;;  %v3757_v37 = vand.u32 4294901760, %v7157_v48  ;;  %v3729_v20 = vand.u32 4294901760, %v3728_v9  ;;  %v3781_v9 = vand.u32 4294901760, %v3780_v52 }
 0x2e1   :  { %v3008_v4 = vpop.f32.mrf.mxu0  ;;  %v3070_v17 = vpop.f32.mrf.mxu2 }
 0x2e2   :  { %v3009_v58 = vadd.f32 %v3008_v4, %v2970_v15  ;;  %v3071_v23 = vadd.f32 %v3070_v17, %v3038_v13  ;;  %v3184_v62 = vpop.f32.mrf.mxu1  ;;  %v3746_v15 = vsub.f32 %v7151_v18, %v3745_v26  ;;  %3730 = vmatpush.msra.mxu3 %v3729_v20  ;;  %v3741_v17 = vand.u32 4294901760, %v3740_v35  ;;  %v3310_v35 = vld [vmem:[%s7702_s18] sm:$0x3] }
 0x2e3   :  { %v3121_v50 = vpop.f32.mrf.mxu3  ;;  %v3763_v13 = vand.u32 4294901760, %v7168_v56  ;;  %3360 = vperm.xlu2 %4560, %v3310_v35  }
 0x2e4   :  { %v3036_v57 = vadd.f32 %v3035_v44, %v3009_v58  ;;  %v3122_v1 = vadd.f32 %v3121_v50, %v3071_v23  ;;  %v3735_v44 = vand.u32 4294901760, %v3734_v24  ;;  %v3752_v58 = vsub.f32 %v7154_v54, %v3751_v32 }
 0x2e5   :  { %v3747_v23 = vand.u32 4294901760, %v3746_v15  ;;  %v3786_v24 = vsub.f32 %v3366_v45, %v3708_v63 }
 0x2e6   :  { %v3312_v10 = vsel %vm3311_vm15, %v3036_v57, 0.0  ;;  %3736 = vmatpush.msra.mxu3 %v3735_v44  ;;  %v3753_v50 = vand.u32 4294901760, %v3752_v58  ;;  %v3782_v44 = vsub.f32 %v3780_v52, %v3781_v9 }
 0x2e7   :  { %3313 = vadd.xlane.f32.xlu1 %v3312_v10  ;;  %v3764_v10 = vsub.f32 %v7168_v56, %v3763_v13  ;;  %v3787_v15 = vand.u32 4294901760, %v3786_v24  ;;  %v7301_v56 = vand.u32 4294901760, %v3996_v28 }
 0x2e8   :  { %3742 = vmatpush.msra.mxu3 %v3741_v17  ;;  %v3783_v17 = vand.u32 4294901760, %v3782_v44 }
 0x2e9   :  { %v3155_v11 = vpop.f32.mrf.mxu0  ;;  %v3223_v30 = vpop.f32.mrf.mxu2  ;;  %v3788_v58 = vsub.f32 %v3786_v24, %v3787_v15  ;;  %v7327_v39 = vsub.f32 %v3996_v28, %v7301_v56 }
 0x2ea   :  { %v3156_v0 = vadd.f32 %v3155_v11, %v3122_v1  ;;  %3748 = vmatpush.msra.mxu3 %v3747_v23 }
 0x2eb   :  { %v3250_v7 = vpop.f32.mrf.mxu3  ;;  %v4051_v45 = vand.u32 4294901760, %v7327_v39 }
 0x2ec   :  { %v3185_v59 = vadd.f32 %v3184_v62, %v3156_v0  ;;  %3754 = vmatpush.msra.mxu3 %v3753_v50 }
 0x2ee   :  { %v3224_v41 = vadd.f32 %v3223_v30, %v3185_v59  ;;  %v3765_v59 = vand.u32 4294901760, %v3764_v10 }
 0x2f0   :  { %v7098_v8 = vadd.f32 %v3250_v7, %v3224_v41  ;;  %v3254_v7 = vld [vmem:[%s7700_s16] sm:$0x3] }
 0x2f2   :  { %v3323_v61 = vsel %vm3311_vm15, %v7098_v8, 0.0 }
 0x2f3   :  { %3324 = vadd.xlane.f32.xlu1 %v3323_v61 }
 0x35a   :  { %v3314_v16 = vpop.xlane.xlu1 %3313 }
 0x35b   :  { %v3322_v27 = vmul.f32 %v7126_v21, %v3314_v16 }
 0x35d   :  { %v7171_v53 = vsub.f32 %v3036_v57, %v3322_v27  ;;  %v3758_v57 = vsub.f32 %v7157_v48, %v3757_v37  ;;  %v3776_v27 = vsub.f32 %v3774_v49, %v3775_v42 }
 0x35f   :  { %v3328_v55 = vmul.f32 %v7171_v53, %v7171_v53  ;;  %v3759_v0 = vand.u32 4294901760, %v3758_v57  ;;  %v3777_v20 = vand.u32 4294901760, %v3776_v27  ;;  %v3789_v57 = vand.u32 4294901760, %v3788_v58  ;;  %v3988_v58 = vld [vmem:[%s7696_s12] sm:$0xff] }
 0x361   :  { %v3329_v4 = vsel %vm3311_vm15, %v3328_v55, 0.0  ;;  %3760 = vmatpush.msra.mxu3 %v3759_v0  ;;  %v3710_v55 = vand.u32 4294901760, %v3365_v6 }
 0x362   :  { %3330 = vadd.xlane.f32.xlu0 %v3329_v4 }
 0x363   :  { %3766 = vmatpush.msra.mxu3 %v3765_v59  ;;  %v3792_v4 = vsub.f32 %v3365_v6, %v3710_v55 }
 0x365   :  { %v3793_v23 = vand.u32 4294901760, %v3792_v4 }
 0x366   :  { %v3325_v1 = vpop.xlane.xlu1 %3324 }
 0x367   :  { %v3326_v11 = vmul.f32 %v3325_v1, %v7126_v21  ;;  %v3794_v50 = vsub.f32 %v3792_v4, %v3793_v23  ;;  %v3993_v1 = vld [vmem:[%s7696_s12 + $0x28] sm:$0xff] }
 0x369   :  { %v7217_v62 = vsub.f32 %v7098_v8, %v3326_v11  ;;  %v3369_v8 = vld [vmem:[%s7693_s9 + $0x20] sm:$0xff]  ;;  %v3795_v10 = vand.u32 4294901760, %v3794_v50 }
 0x36a   :  { %v7228_v61 = vand.u32 4294901760, %v3369_v8  ;;  %v3992_v11 = vld [vmem:[%s7696_s12 + $0x20] sm:$0xff] }
 0x36b   :  { %v3334_v30 = vmul.f32 %v7217_v62, %v7217_v62 }
 0x36c   :  { %v3768_v47 = vsub.f32 %v3369_v8, %v7228_v61  ;;  %3703 = vmatpush.msra.mxu2 %v7228_v61  ;;  %3867 = vmatpush.msrb.mxu1 %v7228_v61 }
 0x36d   :  { %v3335_v41 = vsel %vm3311_vm15, %v3334_v30, 0.0  ;;  %v7316_v30 = vand.u32 4294901760, %v3993_v1 }
 0x36e   :  { %3336 = vadd.xlane.f32.xlu1 %v3335_v41  ;;  %v3769_v36 = vand.u32 4294901760, %v3768_v47  ;;  %3705 = vmatpush.msra.mxu2 %v7234_v40  ;;  %v7318_v41 = vand.u32 4294901760, %v3992_v11 }
 0x36f   :  { %3829 = vmatpush.msrb.mxu0 %v3768_v47  ;;  %3869 = vmatpush.msrb.mxu1 %v7234_v40 }
 0x370   :  { %v3770_v38 = vsub.f32 %v3768_v47, %v3769_v36  ;;  %3707 = vmatpush.msra.mxu2 %v3706_v2 }
 0x371   :  { %3832 = vmatpush.msrb.mxu0 %v3774_v49  ;;  %3871 = vmatpush.msrb.mxu1 %v3706_v2  ;;  %v7341_v49 = vsub.f32 %v3992_v11, %v7318_v41 }
 0x372   :  { %v3771_v16 = vand.u32 4294901760, %v3770_v38  ;;  %3709 = vmatpush.msra.mxu2 %v3708_v63 }
 0x373   :  { %3835 = vmatpush.msrb.mxu0 %v3780_v52  ;;  %3873 = vmatpush.msrb.mxu1 %v3708_v63  ;;  %v3990_v52 = vld [vmem:[%s7696_s12 + $0x10] sm:$0xff] }
 0x374   :  { %3772 = vmatpush.msra.mxu3 %v3771_v16  ;;  %3711 = vmatpush.msra.mxu2 %v3710_v55 }
 0x375   :  { %3838 = vmatpush.msrb.mxu0 %v3786_v24  ;;  %3875 = vmatpush.msrb.mxu1 %v3710_v55  ;;  %v4052_v24 = vsub.f32 %v7327_v39, %v4051_v45 }
 0x376   :  { %3304 = vperm.xlu0 %4561, %v3254_v7   ;;  %3778 = vmatpush.msra.mxu3 %v3777_v20  ;;  %v3991_v7 = vld [vmem:[%s7696_s12 + $0x18] sm:$0xff] }
 0x377   :  { %3890 = vmatpush.msrb.mxu2 %v3727_v19  ;;  %3841 = vmatpush.msrb.mxu0 %v3792_v4  ;;  %v7382_v4 = vand.u32 4294901760, %v3990_v52 }
 0x378   :  { %3784 = vmatpush.msra.mxu3 %v3783_v17  ;;  %v3989_v17 = vld [vmem:[%s7696_s12 + $0x8] sm:$0xff] }
 0x379   :  { %3894 = vmatpush.msrb.mxu2 %v3733_v3 }
 0x37a   :  { %3790 = vmatpush.msra.mxu3 %v3789_v57 }
 0x37b   :  { %3898 = vmatpush.msrb.mxu2 %v3739_v25  ;;  %v3995_v25 = vld [vmem:[%s7696_s12 + $0x38] sm:$0xff] }
 0x37c   :  { %3796 = vmatpush.msra.mxu3 %v3795_v10  ;;  %v4053_v10 = vand.u32 4294901760, %v4052_v24 }
 0x37d   :  { %3902 = vmatpush.msrb.mxu2 %v3745_v26 }
 0x37e   :  { %3945 = vmatpush.msrb.mxu3 %v7111_v12 }
 0x37f   :  { %3906 = vmatpush.msrb.mxu2 %v3751_v32  ;;  %v7299_v32 = vand.u32 4294901760, %v3997_v46 }
 0x380   :  { %3947 = vmatpush.msrb.mxu3 %v7113_v29 }
 0x381   :  { %3910 = vmatpush.msrb.mxu2 %v3757_v37  ;;  %v7303_v37 = vand.u32 4294901760, %v3995_v25  ;;  %4009 = vmatpush.msra.mxu0 %v7299_v32 }
 0x382   :  { %3949 = vmatpush.msrb.mxu3 %v7115_v43 }
 0x383   :  { %3914 = vmatpush.msrb.mxu2 %v3763_v13  ;;  %v3994_v13 = vld [vmem:[%s7696_s12 + $0x30] sm:$0xff]  ;;  %v7330_v47 = vsub.f32 %v3995_v25, %v7303_v37  ;;  %4011 = vmatpush.msra.mxu0 %v7301_v56 }
 0x384   :  { %3951 = vmatpush.msrb.mxu3 %v7128_v5  ;;  %v7314_v59 = vand.u32 4294901760, %v3994_v13 }
 0x385   :  { %3918 = vmatpush.msrb.mxu2 %v3769_v36  ;;  %v7338_v36 = vsub.f32 %v3993_v1, %v7316_v30  ;;  %v4057_v38 = vand.u32 4294901760, %v7330_v47  ;;  %4013 = vmatpush.msra.mxu0 %v7303_v37 }
 0x386   :  { %3953 = vmatpush.msrb.mxu3 %v7130_v22  ;;  %v7335_v33 = vsub.f32 %v3994_v13, %v7314_v59 }
 0x387   :  { %3922 = vmatpush.msrb.mxu2 %v3775_v42  ;;  %v7347_v42 = vand.u32 4294901760, %v3991_v7  ;;  %v4069_v27 = vand.u32 4294901760, %v7338_v36  ;;  %v4058_v35 = vsub.f32 %v7330_v47, %v4057_v38  ;;  %4015 = vmatpush.msra.mxu0 %v7314_v59 }
 0x388   :  { %3955 = vmatpush.msrb.mxu3 %v7132_v60  ;;  %v4063_v16 = vand.u32 4294901760, %v7335_v33 }
 0x389   :  { %3926 = vmatpush.msrb.mxu2 %v3781_v9  ;;  %4017 = vmatpush.msra.mxu0 %v7316_v30 }
 0x38a   :  { %3957 = vmatpush.msrb.mxu3 %v7147_v14  ;;  %v4064_v44 = vsub.f32 %v7335_v33, %v4063_v16 }
 0x38b   :  { %3930 = vmatpush.msrb.mxu2 %v3787_v15  ;;  %v4075_v15 = vand.u32 4294901760, %v7341_v49  ;;  %4019 = vmatpush.msra.mxu0 %v7318_v41 }
 0x38c   :  { %3959 = vmatpush.msrb.mxu3 %v7228_v61  ;;  %v7324_v61 = vsub.f32 %v3997_v46, %v7299_v32 }
 0x38d   :  { %3934 = vmatpush.msrb.mxu2 %v3793_v23  ;;  %v3987_v23 = vld [vmem:[%s7695_s11 + $0x48] sm:$0xff]  ;;  %4021 = vmatpush.msra.mxu0 %v7347_v42 }
 0x38e   :  { %3961 = vmatpush.msrb.mxu3 %v7234_v40 }
 0x38f   :  { %4023 = vmatpush.msra.mxu0 %v7382_v4 }
 0x390   :  { %3963 = vmatpush.msrb.mxu3 %v3706_v2  ;;  %v4045_v2 = vand.u32 4294901760, %v7324_v61 }
 0x392   :  { %3965 = vmatpush.msrb.mxu3 %v3708_v63  ;;  %v3309_v63 = vld [vmem:[%s7701_s17] sm:$0x3]  ;;  %v4046_v9 = vsub.f32 %v7324_v61, %v4045_v2 }
 0x394   :  { %3967 = vmatpush.msrb.mxu3 %v3710_v55  ;;  %v7373_v55 = vsub.f32 %v3991_v7, %v7347_v42  ;;  %v4047_v50 = vand.u32 4294901760, %v4046_v9 }
 0x396   :  { %4048 = vmatpush.msra.mxu1 %v4047_v50 }
 0x398   :  { %4054 = vmatpush.msra.mxu1 %v4053_v10 }
 0x3d5   :  { %v3331_v12 = vpop.xlane.xlu0 %3330 }
 0x3d6   :  { %v3332_v43 = vmul.f32 %v3331_v12, %v7126_v21  ;;  %v3986_v12 = vld [vmem:[%s7695_s11 + $0x40] sm:$0xff] }
 0x3e1   :  { %v3337_v29 = vpop.xlane.xlu1 %3336 }
 0x3e2   :  { %v3338_v5 = vmul.f32 %v3337_v29, %v7126_v21  ;;  %v3985_v29 = vld [vmem:[%s7695_s11 + $0x38] sm:$0xff] }
 0x3e4   :  { %v3339_v22 = vadd.f32 %v3338_v5, %v3332_v43  ;;  %v4059_v43 = vand.u32 4294901760, %v4058_v35  ;;  %v4070_v5 = vsub.f32 %v7338_v36, %v4069_v27 }
 0x3e6   :  { %v3340_v60 = vadd.f32 1e-05, %v3339_v22  ;;  %v4081_v22 = vand.u32 4294901760, %v7373_v55  ;;  %4060 = vmatpush.msra.mxu1 %v4059_v43  ;;  %v4071_v1 = vand.u32 4294901760, %v4070_v5 }
 0x3e8   :  { %4582 = vrsqrt.f32 %v3340_v60  ;;  %v3305_v31 = vpop.permute.xlu0 %3304  ;;  %v4082_v11 = vsub.f32 %v7373_v55, %v4081_v22 }
 0x3e9   :  { %v3307_v34 = vadd.f32 %v3305_v31, %v3301_v51  ;;  %v7409_v51 = vand.u32 4294901760, %v3989_v17  ;;  %v7411_v31 = vand.u32 4294901760, %v3988_v58 }
 0x3eb   :  { %v3682_v14 = vsel %vm1531_vm0, %v3307_v34, 0  ;;  %vm3347_vm0 = vweird.f32 %v3340_v60  ;;  %v7413_v34 = vand.u32 4294901760, %v3987_v23  ;;  %v7430_v46 = vsub.f32 %v3989_v17, %v7409_v51  ;;  %4025 = vmatpush.msra.mxu0 %v7409_v51 }
 0x3ec   :  { %v7281_v18 = vand.u32 4294901760, %v3682_v14  ;;  %v7433_v28 = vsub.f32 %v3988_v58, %v7411_v31 }
 0x3ed   :  { %v7436_v25 = vsub.f32 %v3987_v23, %v7413_v34  ;;  %4027 = vmatpush.msra.mxu0 %v7411_v31 }
 0x3ee   :  { %v7283_v54 = vpop.eup %4582  ;;  %v3713_v48 = vsub.f32 %v3682_v14, %v7281_v18  ;;  %3798 = vmatmul.f32.vlgmr.msra.gmra.mxu3 %v7281_v18  ;;  %v3984_v14 = vld [vmem:[%s7695_s11 + $0x30] sm:$0xff]  ;;  %v4099_v9 = vand.u32 4294901760, %v7433_v28 }
 0x3ef   :  { %v3342_v21 = vmul.f32 %v7283_v54, %v3340_v60  ;;  %vm3348_vm2 = vweird.f32 %v7283_v54  ;;  %4157 = vmatpush.msra.mxu3 %v7299_v32  ;;  %v7407_v60 = vsub.f32 %v3990_v52, %v7382_v4  ;;  %v4311_v7 = vand.u32 4294901760, %v7436_v25 }
 0x3f0   :  { %3844 = vmatmul.f32.vlgmr.msrb.gmra.mxu0 %v3713_v48  ;;  %v3714_v19 = vand.u32 4294901760, %v3713_v48  ;;  %vm3349_vm3 = vmor %vm3347_vm0, %vm3348_vm2  ;;  %v4100_v50 = vsub.f32 %v7433_v28, %v4099_v9 }
 0x3f1   :  { %v3343_v3 = vmul.f32 %v7283_v54, %v3342_v21  ;;  %4159 = vmatpush.msra.mxu3 %v7301_v56  ;;  %v7423_v21 = vand.u32 4294901760, %v3986_v12  ;;  %v4312_v24 = vsub.f32 %v7436_v25, %v4311_v7  ;;  %4192 = vmatpush.msrb.mxu0 %v4045_v2  ;;  %v3979_v2 = vld [vmem:[%s7695_s11 + $0x8] sm:$0xff] }
 0x3f2   :  { %3879 = vmatmul.f32.vlgmr.msrb.gmra.mxu1 %v3714_v19  ;;  %v3715_v26 = vsub.f32 %v3713_v48, %v3714_v19  ;;  %v4076_v48 = vsub.f32 %v7341_v49, %v4075_v15  ;;  %v7425_v19 = vand.u32 4294901760, %v3985_v29  ;;  %v4101_v5 = vand.u32 4294901760, %v4100_v50 }
 0x3f3   :  { %v3344_v0 = vmul.f32 0.5, %v3343_v3  ;;  %4161 = vmatpush.msra.mxu3 %v7303_v37  ;;  %v4087_v3 = vand.u32 4294901760, %v7407_v60  ;;  %v4313_v58 = vand.u32 4294901760, %v4312_v24  ;;  %4196 = vmatpush.msrb.mxu0 %v4051_v45  ;;  %v3426_v24 = vpop.f32.mrf.mxu0 }
 0x3f4   :  { %v3716_v8 = vand.u32 4294901760, %v3715_v26  ;;  %v7441_v26 = vsub.f32 %v3986_v12, %v7423_v21  ;;  %v7446_v13 = vsub.f32 %v3985_v29, %v7425_v19 }
 0x3f5   :  { %v3345_v40 = vsub.f32 1.5, %v3344_v0  ;;  %4163 = vmatpush.msra.mxu3 %v7314_v59  ;;  %v4093_v0 = vand.u32 4294901760, %v7430_v46  ;;  %4200 = vmatpush.msrb.mxu0 %v4057_v38 }
 0x3f6   :  { %3717 = vmatmul.f32.vlgmr.msra.gmra.mxu2 %v3716_v8  ;;  %3969 = vmatmul.f32.vlgmr.msrb.gmra.mxu3 %v7281_v18  ;;  %v4317_v8 = vand.u32 4294901760, %v7441_v26 }
 0x3f7   :  { %v3346_v6 = vmul.f32 %v7283_v54, %v3345_v40  ;;  %4116 = vmatpush.msra.mxu2 %v7324_v61  ;;  %4165 = vmatpush.msra.mxu3 %v7316_v30  ;;  %v4323_v40 = vand.u32 4294901760, %v7446_v13 }
 0x3f8   :  { %v4318_v35 = vsub.f32 %v7441_v26, %v4317_v8  ;;  %4204 = vmatpush.msrb.mxu0 %v4063_v16  ;;  %v7576_v16 = vand.u32 4294901760, %v3979_v2 }
 0x3f9   :  { %v3350_v20 = vsel %vm3349_vm3, %v7283_v54, %v3346_v6  ;;  %4119 = vmatpush.msra.mxu2 %v7327_v39  ;;  %v4065_v54 = vand.u32 4294901760, %v4064_v44  ;;  %4167 = vmatpush.msra.mxu3 %v7318_v41  ;;  %v4088_v6 = vsub.f32 %v7407_v60, %v4087_v3  ;;  %v4094_v44 = vsub.f32 %v7430_v46, %v4093_v0  ;;  %v3980_v39 = vld [vmem:[%s7695_s11 + $0x10] sm:$0xff] }
 0x3fa   :  { %v3351_v57 = vmul.f32 %v3350_v20, %v3309_v63  ;;  %v4077_v63 = vand.u32 4294901760, %v4076_v48  ;;  %v4083_v20 = vand.u32 4294901760, %v4082_v11  ;;  %v4324_v23 = vsub.f32 %v7446_v13, %v4323_v40  ;;  %4208 = vmatpush.msrb.mxu0 %v4069_v27 }
 0x3fb   :  { %4122 = vmatpush.msra.mxu2 %v7330_v47  ;;  %4066 = vmatpush.msra.mxu1 %v4065_v54  ;;  %v4319_v10 = vand.u32 4294901760, %v4318_v35  ;;  %v4095_v12 = vand.u32 4294901760, %v4094_v44  ;;  %v3983_v54 = vld [vmem:[%s7695_s11 + $0x28] sm:$0xff]  ;;  %v3507_v35 = vpop.f32.mrf.mxu1  ;;  %v3553_v44 = vpop.f32.mrf.mxu2 }
 0x3fc   :  { %3354 = vperm.xlu1 %4562, %v3351_v57   ;;  %4169 = vmatpush.msra.mxu3 %v7347_v42  ;;  %v4089_v57 = vand.u32 4294901760, %v4088_v6  ;;  %v4325_v43 = vand.u32 4294901760, %v4324_v23  ;;  %v7507_v48 = vand.u32 4294901760, %v3983_v54 }
 0x3fd   :  { %4125 = vmatpush.msra.mxu2 %v7335_v33  ;;  %4072 = vmatpush.msra.mxu1 %v4071_v1 }
 0x3fe   :  { %3936 = vmatmul.f32.vlgmr.msrb.gmra.mxu2 %v7281_v18  ;;  %v7443_v18 = vand.u32 4294901760, %v3984_v14  ;;  %4171 = vmatpush.msra.mxu3 %v7382_v4 }
 0x3ff   :  { %4128 = vmatpush.msra.mxu2 %v7338_v36  ;;  %4078 = vmatpush.msra.mxu1 %v4077_v63  ;;  %v7563_v36 = vand.u32 4294901760, %v3980_v39 }
 0x400   :  { %v7459_v52 = vsub.f32 %v3984_v14, %v7443_v18  ;;  %4173 = vmatpush.msra.mxu3 %v7409_v51  ;;  %4212 = vmatpush.msrb.mxu0 %v4075_v15 }
 0x401   :  { %4131 = vmatpush.msra.mxu2 %v7341_v49  ;;  %4084 = vmatpush.msra.mxu1 %v4083_v20  ;;  %v7579_v27 = vsub.f32 %v3980_v39, %v7563_v36  ;;  %v3508_v20 = vadd.f32 %v3507_v35, %v3426_v24  ;;  %v4565_v24 = vld [vmem:[%s7698_s14] ss:$0 sm:$0xff] }
 0x402   :  { %v4329_v17 = vand.u32 4294901760, %v7459_v52  ;;  %4175 = vmatpush.msra.mxu3 %v7411_v31  ;;  %4216 = vmatpush.msrb.mxu0 %v4081_v22 }
 0x403   :  { %4134 = vmatpush.msra.mxu2 %v7373_v55  ;;  %4090 = vmatpush.msra.mxu1 %v4089_v57  ;;  %v3978_v55 = vld [vmem:[%s7695_s11] sm:$0xff] }
 0x404   :  { %v4330_v29 = vsub.f32 %v7459_v52, %v4329_v17  ;;  %4314 = vmatpush.msrb.mxu3 %v4313_v58  ;;  %4220 = vmatpush.msrb.mxu0 %v4087_v3  ;;  %v7588_v22 = vand.u32 4294901760, %v3978_v55  ;;  %v3554_v58 = vadd.f32 %v3553_v44, %v3508_v20 }
 0x405   :  { %4137 = vmatpush.msra.mxu2 %v7407_v60  ;;  %4096 = vmatpush.msra.mxu1 %v4095_v12  ;;  %v7591_v60 = vsub.f32 %v3979_v2, %v7576_v16  ;;  %v3588_v12 = vpop.f32.mrf.mxu3 }
 0x406   :  { %4320 = vmatpush.msrb.mxu3 %v4319_v10  ;;  %v4331_v14 = vand.u32 4294901760, %v4330_v29  ;;  %4224 = vmatpush.msrb.mxu0 %v4093_v0  ;;  %v3361_v10 = vpop.permute.xlu2 %3360  ;;  %v3645_v29 = vpop.f32.mrf.mxu0 }
 0x407   :  { %4140 = vmatpush.msra.mxu2 %v7430_v46  ;;  %4102 = vmatpush.msra.mxu1 %v4101_v5  ;;  %v4359_v3 = vand.u32 4294901760, %v7591_v60  ;;  %v7597_v46 = vsub.f32 %v3978_v55, %v7588_v22 }
 0x408   :  { %4326 = vmatpush.msrb.mxu3 %v4325_v43  ;;  %4228 = vmatpush.msrb.mxu0 %v4099_v9 }
 0x409   :  { %4143 = vmatpush.msra.mxu2 %v7433_v28  ;;  %4241 = vmatpush.msrb.mxu1 %v7299_v32  ;;  %v3982_v32 = vld [vmem:[%s7695_s11 + $0x20] sm:$0xff]  ;;  %v4360_v1 = vsub.f32 %v7591_v60, %v4359_v3  ;;  %v4365_v11 = vand.u32 4294901760, %v7597_v46 }
 0x40a   :  { %4332 = vmatpush.msrb.mxu3 %v4331_v14  ;;  %v3589_v14 = vadd.f32 %v3588_v12, %v3554_v58 }
 0x40b   :  { %4275 = vmatpush.msrb.mxu2 %v7413_v34  ;;  %4243 = vmatpush.msrb.mxu1 %v7301_v56  ;;  %v7540_v56 = vand.u32 4294901760, %v3982_v32  ;;  %v4361_v63 = vand.u32 4294901760, %v4360_v1  ;;  %v4366_v6 = vsub.f32 %v7597_v46, %v4365_v11 }
 0x40d   :  { %4277 = vmatpush.msrb.mxu2 %v7423_v21  ;;  %4245 = vmatpush.msrb.mxu1 %v7303_v37  ;;  %v7543_v37 = vsub.f32 %v3983_v54, %v7507_v48  ;;  %v7553_v61 = vsub.f32 %v3982_v32, %v7540_v56  ;;  %v4367_v9 = vand.u32 4294901760, %v4366_v6 }
 0x40f   :  { %4279 = vmatpush.msrb.mxu2 %v7425_v19  ;;  %4247 = vmatpush.msrb.mxu1 %v7314_v59  ;;  %v3981_v59 = vld [vmem:[%s7695_s11 + $0x18] sm:$0xff]  ;;  %v4341_v33 = vand.u32 4294901760, %v7553_v61 }
 0x411   :  { %4281 = vmatpush.msrb.mxu2 %v7443_v18  ;;  %4249 = vmatpush.msrb.mxu1 %v7316_v30  ;;  %v4335_v30 = vand.u32 4294901760, %v7543_v37  ;;  %v4342_v38 = vsub.f32 %v7553_v61, %v4341_v33 }
 0x413   :  { %4283 = vmatpush.msrb.mxu2 %v7507_v48  ;;  %4251 = vmatpush.msrb.mxu1 %v7318_v41  ;;  %v7550_v41 = vand.u32 4294901760, %v3981_v59  ;;  %v4336_v47 = vsub.f32 %v7543_v37, %v4335_v30  ;;  %v4343_v15 = vand.u32 4294901760, %v4342_v38 }
 0x415   :  { %4253 = vmatpush.msrb.mxu1 %v7347_v42  ;;  %4285 = vmatpush.msrb.mxu2 %v7540_v56  ;;  %v7566_v49 = vsub.f32 %v3981_v59, %v7550_v41  ;;  %v4337_v45 = vand.u32 4294901760, %v4336_v47  ;;  %v3646_v59 = vadd.f32 %v3645_v29, %v3589_v14 }
 0x417   :  { %4255 = vmatpush.msrb.mxu1 %v7382_v4  ;;  %4287 = vmatpush.msrb.mxu2 %v7550_v41  ;;  %v4347_v42 = vand.u32 4294901760, %v7566_v49 }
 0x418   :  { %4338 = vmatpush.msrb.mxu3 %v4337_v45 }
 0x419   :  { %4257 = vmatpush.msrb.mxu1 %v7409_v51  ;;  %4289 = vmatpush.msrb.mxu2 %v7563_v36  ;;  %v4348_v4 = vsub.f32 %v7566_v49, %v4347_v42  ;;  %v4353_v51 = vand.u32 4294901760, %v7579_v27 }
 0x41a   :  { %4344 = vmatpush.msrb.mxu3 %v4343_v15 }
 0x41b   :  { %4259 = vmatpush.msrb.mxu1 %v7411_v31  ;;  %4291 = vmatpush.msrb.mxu2 %v7576_v16  ;;  %v4349_v31 = vand.u32 4294901760, %v4348_v4  ;;  %v4354_v28 = vsub.f32 %v7579_v27, %v4353_v51 }
 0x41d   :  { %4293 = vmatpush.msrb.mxu2 %v7588_v22  ;;  %4350 = vmatpush.msrb.mxu3 %v4349_v31  ;;  %v4355_v0 = vand.u32 4294901760, %v4354_v28 }
 0x41f   :  { %4356 = vmatpush.msrb.mxu3 %v4355_v0 }
 0x421   :  { %4362 = vmatpush.msrb.mxu3 %v4361_v63 }
 0x423   :  { %4368 = vmatpush.msrb.mxu3 %v4367_v9 }
 0x46d   :  { %v3845_v63 = vpop.f32.mrf.mxu0 }
 0x46e   :  { %v3355_v23 = vpop.permute.xlu1 %3354 }
 0x46f   :  { %v3357_v57 = vmul.f32 %v3355_v23, %v7171_v53  ;;  %v3364_v50 = vmul.f32 %v3355_v23, %v7217_v62  ;;  %v3678_v62 = vpop.f32.mrf.mxu1 }
 0x470   :  { %v3679_v45 = vadd.f32 %v3678_v62, %v3646_v59 }
 0x471   :  { %v3363_v43 = vadd.f32 %v3361_v10, %v3357_v57  ;;  %v4000_v5 = vsel %vm3998_vm4, %v3364_v50, 0  ;;  %v3799_v15 = vpop.f32.mrf.mxu3 }
 0x472   :  { %v4028_v54 = vand.u32 4294901760, %v4000_v5 }
 0x473   :  { %v4266_v32 = vsel %vm3998_vm4, %v3363_v43, 0 }
 0x474   :  { %v4029_v39 = vsub.f32 %v4000_v5, %v4028_v54  ;;  %v7611_v47 = vand.u32 4294901760, %v4266_v32  ;;  %4104 = vmatmul.f32.vlgmr.msra.gmra.mxu1 %v4028_v54 }
 0x475   :  { %4423 = vmatpush.msra.mxu1 %v7413_v34 }
 0x476   :  { %v7615_v2 = vsub.f32 %v4266_v32, %v7611_v47  ;;  %4146 = vmatmul.f32.vlgmr.msra.gmra.mxu2 %v4029_v39  ;;  %v4030_v53 = vand.u32 4294901760, %v4029_v39 }
 0x477   :  { %4425 = vmatpush.msra.mxu1 %v7423_v21  ;;  %4458 = vmatpush.msra.mxu2 %v4311_v7 }
 0x478   :  { %4179 = vmatmul.f32.vlgmr.msra.gmra.mxu3 %v4030_v53  ;;  %v4031_v38 = vsub.f32 %v4029_v39, %v4030_v53  ;;  %v4296_v55 = vand.u32 4294901760, %v7615_v2 }
 0x479   :  { %4427 = vmatpush.msra.mxu1 %v7425_v19  ;;  %4462 = vmatpush.msra.mxu2 %v4317_v8  ;;  %v3718_v4 = vpop.f32.mrf.mxu2  ;;  %v3880_v8 = vpop.f32.mrf.mxu1 }
 0x47a   :  { %4507 = vmatpush.msra.mxu3 %v7413_v34  ;;  %v3719_v31 = vadd.f32 %v3718_v4, %v3679_v45  ;;  %v4032_v28 = vand.u32 4294901760, %v4031_v38  ;;  %v4297_v1 = vsub.f32 %v7615_v2, %v4296_v55 }
 0x47b   :  { %4429 = vmatpush.msra.mxu1 %v7443_v18  ;;  %4466 = vmatpush.msra.mxu2 %v4323_v40 }
 0x47c   :  { %v3800_v7 = vadd.f32 %v3799_v15, %v3719_v31  ;;  %4509 = vmatpush.msra.mxu3 %v7423_v21  ;;  %4033 = vmatmul.f32.vlgmr.msra.gmra.mxu0 %v4032_v28  ;;  %v4298_v0 = vand.u32 4294901760, %v4297_v1 }
 0x47d   :  { %4261 = vmatmul.f32.vlgmr.msrb.gmra.mxu1 %v4028_v54  ;;  %4382 = vmatpush.msra.mxu0 %v7436_v25 }
 0x47e   :  { %4431 = vmatpush.msra.mxu1 %v7507_v48  ;;  %4470 = vmatpush.msra.mxu2 %v4329_v17  ;;  %v3846_v34 = vadd.f32 %v3845_v63, %v3800_v7  ;;  %v3970_v17 = vpop.f32.mrf.mxu3 }
 0x47f   :  { %4511 = vmatpush.msra.mxu3 %v7425_v19  ;;  %4299 = vmatmul.f32.vlgmr.msrb.gmra.mxu2 %v4298_v0  ;;  %v4564_v19 = vld [vmem:[%s7697_s13] ss:$0 sm:$0xff] }
 0x480   :  { %4385 = vmatpush.msra.mxu0 %v7441_v26  ;;  %4433 = vmatpush.msra.mxu1 %v7540_v56  ;;  %v3881_v21 = vadd.f32 %v3880_v8, %v3846_v34 }
 0x481   :  { %4474 = vmatpush.msra.mxu2 %v4335_v30  ;;  %4513 = vmatpush.msra.mxu3 %v7443_v18  ;;  %v3937_v25 = vpop.f32.mrf.mxu2 }
 0x482   :  { %4370 = vmatmul.f32.vlgmr.msrb.gmra.mxu3 %v7611_v47  ;;  %4388 = vmatpush.msra.mxu0 %v7446_v13  ;;  %v3938_v40 = vadd.f32 %v3937_v25, %v3881_v21 }
 0x483   :  { %4435 = vmatpush.msra.mxu1 %v7550_v41  ;;  %4478 = vmatpush.msra.mxu2 %v4341_v33 }
 0x484   :  { %4515 = vmatpush.msra.mxu3 %v7507_v48  ;;  %v3971_v26 = vadd.f32 %v3970_v17, %v3938_v40  ;;  %4391 = vmatpush.msra.mxu0 %v7459_v52 }
 0x485   :  { %4437 = vmatpush.msra.mxu1 %v7563_v36  ;;  %4482 = vmatpush.msra.mxu2 %v4347_v42 }
 0x486   :  { %v3977_v18 = vadd.f32 %v4564_v19, %v3971_v26  ;;  %4517 = vmatpush.msra.mxu3 %v7540_v56  ;;  %4230 = vmatmul.f32.vlgmr.msrb.gmra.mxu0 %v4028_v54 }
 0x487   :  { %4394 = vmatpush.msra.mxu0 %v7543_v37  ;;  %4439 = vmatpush.msra.mxu1 %v7576_v16 }
 0x488   :  { %v4536_v13 = vmax.f32 %v3977_v18, 0.0  ;;  %4486 = vmatpush.msra.mxu2 %v4353_v51  ;;  %4519 = vmatpush.msra.mxu3 %v7550_v41 }
 0x489   :  { %4397 = vmatpush.msra.mxu0 %v7553_v61  ;;  %4441 = vmatpush.msra.mxu1 %v7588_v22 }
 0x48a   :  { %4537 = vst [vmem:[%s7704_s20] sm:$0x3] %v4536_v13  ;;  %4490 = vmatpush.msra.mxu2 %v4359_v3  ;;  %4521 = vmatpush.msra.mxu3 %v7563_v36 }
 0x48b   :  { %4445 = vmatmul.f32.vlgmr.msra.gmra.mxu1 %v4296_v55  ;;  %4400 = vmatpush.msra.mxu0 %v7566_v49 }
 0x48c   :  { %4494 = vmatpush.msra.mxu2 %v4365_v11  ;;  %4523 = vmatpush.msra.mxu3 %v7576_v16 }
 0x48d   :  { %4496 = vmatmul.f32.vlgmr.msra.gmra.mxu2 %v7611_v47  ;;  %4403 = vmatpush.msra.mxu0 %v7579_v27 }
 0x48e   :  { %4525 = vmatpush.msra.mxu3 %v7588_v22 }
 0x48f   :  { %4527 = vmatmul.f32.vlgmr.msra.gmra.mxu3 %v7611_v47  ;;  %4406 = vmatpush.msra.mxu0 %v7591_v60 }
 0x491   :  { %4409 = vmatpush.msra.mxu0 %v7597_v46 }
 0x492   :  { %4412 = vmatmul.f32.vlgmr.msra.gmra.mxu0 %v7615_v2 }
 0x4f1   :  { %v4105_v52 = vpop.f32.mrf.mxu1 }
 0x4f9   :  { %v4034_v48 = vpop.f32.mrf.mxu0  ;;  %v4147_v37 = vpop.f32.mrf.mxu2 }
 0x4fa   :  { %v4106_v56 = vadd.f32 %v4105_v52, %v4034_v48  ;;  %v4262_v49 = vpop.f32.mrf.mxu1 }
 0x4fb   :  { %v4180_v41 = vpop.f32.mrf.mxu3 }
 0x4fc   :  { %v4148_v30 = vadd.f32 %v4147_v37, %v4106_v56 }
 0x4fe   :  { %v4181_v61 = vadd.f32 %v4180_v41, %v4148_v30 }
 0x502   :  { %v4300_v16 = vpop.f32.mrf.mxu2 }
 0x503   :  { %v4231_v33 = vpop.f32.mrf.mxu0 }
 0x504   :  { %v4232_v36 = vadd.f32 %v4231_v33, %v4181_v61 }
 0x505   :  { %v4371_v22 = vpop.f32.mrf.mxu3 }
 0x506   :  { %v4263_v42 = vadd.f32 %v4262_v49, %v4232_v36 }
 0x508   :  { %v4301_v27 = vadd.f32 %v4300_v16, %v4263_v42  ;;  %v4446_v46 = vpop.f32.mrf.mxu1 }
 0x50a   :  { %v4372_v51 = vadd.f32 %v4371_v22, %v4301_v27 }
 0x50f   :  { %v4413_v60 = vpop.f32.mrf.mxu0 }
 0x510   :  { %v4414_v3 = vadd.f32 %v4413_v60, %v4372_v51  ;;  %v4497_v6 = vpop.f32.mrf.mxu2 }
 0x512   :  { %v4447_v11 = vadd.f32 %v4446_v46, %v4414_v3  ;;  %v4528_v35 = vpop.f32.mrf.mxu3 }
 0x514   :  { %v4498_v9 = vadd.f32 %v4497_v6, %v4447_v11 }
 0x516   :  { %v4529_v20 = vadd.f32 %v4528_v35, %v4498_v9 }
 0x518   :  { %v4535_v44 = vadd.f32 %v4565_v24, %v4529_v20 }
 0x51a   :  { %v4538_v58 = vmax.f32 %v4535_v44, 0.0 }
 0x51c   :  { %4539 = vst [vmem:[%s7704_s20 + $0x2] sm:$0x3] %v4538_v58 }
 0x51d   :  { %4544 = vsyncpa [#allocation3], 1 }

</bundles_post_ra>
